<compile_context>
chip_gen: v5e
topology: v5e:2x2
jax: 0.10.0
libtpu: 0.0.40
codegen_flags: <defaults>
</compile_context>

<pallas_src>
import functools

import jax
import jax.numpy as jnp
from jax.experimental import pallas as pl
from jax.experimental.pallas import tpu as pltpu

VMEM_LIMIT = 48 * 1024 * 1024   # > v5e's 16MiB / v6e's 32MiB scoped defaults,
                                # < v7x's 64MiB physical VMEM.


# ----------------------------- Pallas kernels --------------------------------

def conv_gemm_kernel(x_ref, w_ref, b_ref, scale_ref, shift_ref, o_ref):
    """Conv-as-GEMM, transposed orientation: o = BN(ReLU(w @ x + b)), bf16 out.

    x_ref: (K, TILE_R) bf16 im2col patches (rows on lanes)
    w_ref: (Cout, K) bf16; b/scale/shift: (Cout, 1) f32; o_ref: (Cout, TILE_R) bf16
    Order matches the PyTorch module: Conv -> ReLU -> BatchNorm (folded, eval).
    """
    z = jnp.dot(w_ref[...], x_ref[...], preferred_element_type=jnp.float32)
    z = jnp.maximum(z + b_ref[...], 0.0)
    o_ref[...] = (z * scale_ref[...] + shift_ref[...]).astype(o_ref.dtype)


def matmul_kernel(x_ref, w_ref, o_ref):
    """Row-tiled o = x @ w (bf16 operands, f32 accumulate, out in o.dtype)."""
    o_ref[...] = jnp.dot(x_ref[...], w_ref[...],
                         preferred_element_type=jnp.float32).astype(o_ref.dtype)


def matmul2_kernel(x0_ref, x1_ref, w0_ref, w1_ref, o_ref):
    """Row-tiled o = x0 @ w0 + x1 @ w1 (consumes fwd/bwd planes w/o concat)."""
    acc = jnp.dot(x0_ref[...], w0_ref[...], preferred_element_type=jnp.float32)
    acc += jnp.dot(x1_ref[...], w1_ref[...], preferred_element_type=jnp.float32)
    o_ref[...] = acc.astype(o_ref.dtype)


def linear2_logsoftmax_kernel(x0_ref, x1_ref, w0_ref, w1_ref, b_ref, o_ref):
    """Fused final Linear (split fwd/bwd inputs) + log_softmax over last axis.

    Output columns are padded to a 128 multiple; pad bias = -1e30 so padded
    columns contribute exp(...) == 0 to the normalizer (lane-dense stores).
    """
    z = (jnp.dot(x0_ref[...], w0_ref[...], preferred_element_type=jnp.float32)
         + jnp.dot(x1_ref[...], w1_ref[...], preferred_element_type=jnp.float32)
         + b_ref[...])
    m = jnp.max(z, axis=-1, keepdims=True)
    o_ref[...] = ((z - m) - jnp.log(jnp.sum(jnp.exp(z - m), axis=-1,
                                            keepdims=True))).astype(o_ref.dtype)


def bilstm_kernel(gxf_ref, gxb_ref, whh_ref, b_ref, of_ref, ob_ref,
                  h_scr, c_scr, *, steps, t_real, t_pad):
    """Both LSTM directions, S=`steps` time steps per grid iteration.

    grid = (nblk,) over time blocks; per grid step t the forward direction
    consumes block t (ascending in-block) and the backward direction consumes
    block nblk-1-t (descending in-block) — all indices static.

    gxf_ref/gxb_ref: (steps, B, 4H) bf16 precomputed x@W_ih (NO bias)
    whh_ref        : (2, H, 4H)     bf16 recurrent weights (resident)
    b_ref          : (1, 8H)        f32  combined b_ih+b_hh, both directions
    of_ref/ob_ref  : (steps, B, H)  bf16 hidden states (original time order)
    h_scr/c_scr    : (2, B, H)      f32  carried state (0=fwd, 1=bwd)
    PyTorch gate order (i, f, g, o).
    """
    t = pl.program_id(0)
    nblk = pl.num_programs(0)
    padded = (t_pad != t_real)                       # static python bool

    @pl.when(t == 0)
    def _():
        h_scr[...] = jnp.zeros(h_scr.shape, h_scr.dtype)
        c_scr[...] = jnp.zeros(c_scr.shape, c_scr.dtype)

    H = of_ref.shape[-1]
    w_f = whh_ref[0]                                 # (H, 4H) bf16
    w_b = whh_ref[1]
    b_all = b_ref[...]                               # (1, 8H) f32
    b_f = b_all[:, :4 * H]
    b_b = b_all[:, 4 * H:]

    def cell(gates, c):
        i_g = jax.nn.sigmoid(gates[:, 0 * H:1 * H])
        f_g = jax.nn.sigmoid(gates[:, 1 * H:2 * H])
        g_g = jnp.tanh(gates[:, 2 * H:3 * H])
        o_g = jax.nn.sigmoid(gates[:, 3 * H:4 * H])
        c_new = f_g * c + i_g * g_g
        h_new = o_g * jnp.tanh(c_new)
        return h_new, c_new

    h_f, c_f = h_scr[0], c_scr[0]
    h_b, c_b = h_scr[1], c_scr[1]
    # TODO(synk): for large B/H replace this static unroll with
    # lax.fori_loop(..., unroll=True) to bound vreg live ranges.
    for s in range(steps):
        sb = steps - 1 - s
        # ---- forward: time index t*steps + s (ascending) ----
        g_fwd = (gxf_ref[s].astype(jnp.float32) + b_f
                 + jnp.dot(h_f.astype(w_f.dtype), w_f,
                           preferred_element_type=jnp.float32))
        h_f, c_f = cell(g_fwd, c_f)
        # ---- backward: time index (nblk-1-t)*steps + sb (descending) ----
        bias_b = b_b
        if padded:
            # Zero gx + zero bias at padded steps keeps the bwd state exactly 0
            # until the first real time step is reached.
            valid_b = (((nblk - 1 - t) * steps + sb) < t_real)
            bias_b = b_b * valid_b.astype(jnp.float32)
        g_bwd = (gxb_ref[sb].astype(jnp.float32) + bias_b
                 + jnp.dot(h_b.astype(w_b.dtype), w_b,
                           preferred_element_type=jnp.float32))
        h_b, c_b = cell(g_bwd, c_b)
        # ---- stores (original time order) ----
        if padded:
            valid_f = ((t * steps + s) < t_real)
            of_ref[s] = (h_f * valid_f.astype(jnp.float32)).astype(of_ref.dtype)
        else:
            of_ref[s] = h_f.astype(of_ref.dtype)
        ob_ref[sb] = h_b.astype(ob_ref.dtype)        # exactly 0 on padded steps
    h_scr[0], c_scr[0] = h_f, c_f
    h_scr[1], c_scr[1] = h_b, c_b


# ------------------------------- JAX glue -------------------------------------

def _round_up(x, m):
    return (x + m - 1) // m * m


def _im2col_T(x_cbhw, k=3, stride=2, pad=1):
    """(C,B,H,W) -> (C*k*k, B*Ho*Wo); K order (c, kh, kw) matches torch weights.

    TODO(synk): fully fusing the im2col gather into the conv kernel (9-tap grid
    axis + manual strided DMA) would remove this materialized patch tensor; we
    at least build it in bf16 straight from bf16 conv activations.
    """
    C, B, H, W = x_cbhw.shape
    Ho = (H + 2 * pad - k) // stride + 1
    Wo = (W + 2 * pad - k) // stride + 1
    xp = jnp.pad(x_cbhw, ((0, 0), (0, 0), (pad, pad), (pad, pad)))
    cols = []
    for kh in range(k):
        for kw in range(k):
            cols.append(xp[:, :,
                           kh:kh + stride * (Ho - 1) + 1:stride,
                           kw:kw + stride * (Wo - 1) + 1:stride])   # (C,B,Ho,Wo)
    p = jnp.stack(cols, axis=1)                                     # (C,9,B,Ho,Wo)
    return p.reshape(C * k * k, B * Ho * Wo), Ho, Wo


def conv_relu_bn(x_cbhw, w_bf16, b, bn_scale, bn_shift, pref_tile=512):
    """Conv2d(3x3,s=2,p=1)+ReLU+BatchNorm2d(eval); C-major in, C-major bf16 out."""
    C, B, H, W = x_cbhw.shape
    Cout = w_bf16.shape[0]
    patches_T, Ho, Wo = _im2col_T(x_cbhw.astype(jnp.bfloat16))
    K, rows = patches_T.shape
    tile_c = pref_tile if rows >= pref_tile else _round_up(rows, 128)
    rows_p = _round_up(rows, tile_c)
    if rows_p != rows:
        patches_T = jnp.pad(patches_T, ((0, 0), (0, rows_p - rows)))
    wmat = w_bf16.reshape(Cout, K)
    out = pl.pallas_call(
        conv_gemm_kernel,
        out_shape=jax.ShapeDtypeStruct((Cout, rows_p), jnp.bfloat16),
        grid_spec=pltpu.PrefetchScalarGridSpec(
            num_scalar_prefetch=0,
            grid=(rows_p // tile_c,),
            in_specs=[
                pl.BlockSpec((K, tile_c), lambda i: (0, i)),
                pl.BlockSpec((Cout, K), lambda i: (0, 0)),
                pl.BlockSpec((Cout, 1), lambda i: (0, 0)),
                pl.BlockSpec((Cout, 1), lambda i: (0, 0)),
                pl.BlockSpec((Cout, 1), lambda i: (0, 0)),
            ],
            out_specs=pl.BlockSpec((Cout, tile_c), lambda i: (0, i)),
        ),
        compiler_params=pltpu.CompilerParams(
            dimension_semantics=("parallel",), vmem_limit_bytes=VMEM_LIMIT),
    )(patches_T, wmat, b.reshape(Cout, 1),
      bn_scale.reshape(Cout, 1), bn_shift.reshape(Cout, 1))
    if rows_p != rows:
        out = out[:, :rows]
    return out.reshape(Cout, B, Ho, Wo)              # stays C-major: no transpose


def _row_tiled_call(kernel, row_inputs, const_inputs, out_cols,
                    out_dtype=jnp.float32, pref_tile=512):
    """Row-tiled GEMM-style pallas_call: row inputs streamed, consts resident."""
    rows = row_inputs[0].shape[0]
    tile_r = pref_tile if rows >= pref_tile else _round_up(rows, 8)
    rows_p = _round_up(rows, tile_r)
    if rows_p != rows:
        row_inputs = [jnp.pad(a, ((0, rows_p - rows), (0, 0))) for a in row_inputs]
    in_specs = ([pl.BlockSpec((tile_r, a.shape[1]), lambda i: (i, 0))
                 for a in row_inputs]
                + [pl.BlockSpec(c.shape, lambda i, nd=c.ndim: (0,) * nd)
                   for c in const_inputs])
    out = pl.pallas_call(
        kernel,
        out_shape=jax.ShapeDtypeStruct((rows_p, out_cols), out_dtype),
        grid_spec=pltpu.PrefetchScalarGridSpec(
            num_scalar_prefetch=0,
            grid=(rows_p // tile_r,),
            in_specs=in_specs,
            out_specs=pl.BlockSpec((tile_r, out_cols), lambda i: (i, 0)),
        ),
        compiler_params=pltpu.CompilerParams(
            dimension_semantics=("parallel",), vmem_limit_bytes=VMEM_LIMIT),
    )(*row_inputs, *const_inputs)
    return out[:rows] if rows_p != rows else out


def bilstm_layer(gx, whh_both, bias, steps, t_real):
    """One bidirectional LSTM layer; both directions in a single kernel.

    gx      : (Tp_pad, B, 8H) bf16 — x@W_ih (no bias); cols [0:4H] fwd, [4H:8H] bwd
    whh_both: (2, H, 4H) bf16; bias: (1, 8H) f32
    returns : out_f, out_b, each (Tp_pad, B, H) bf16, original time order.
    Assumes 4H is a multiple of 128 (H % 32 == 0).
    TODO(synk): on v7x a direction grid axis with CORE_PARALLEL semantics could
    shard the two directions across the two TensorCores.
    """
    t_pad, B, _ = gx.shape
    H = whh_both.shape[1]
    nblk = t_pad // steps
    kern = functools.partial(bilstm_kernel, steps=steps, t_real=t_real, t_pad=t_pad)
    out_f, out_b = pl.pallas_call(
        kern,
        out_shape=(jax.ShapeDtypeStruct((t_pad, B, H), jnp.bfloat16),
                   jax.ShapeDtypeStruct((t_pad, B, H), jnp.bfloat16)),
        grid_spec=pltpu.PrefetchScalarGridSpec(
            num_scalar_prefetch=0,
            grid=(nblk,),
            in_specs=[
                # forward gate half: time block t, column block 0
                pl.BlockSpec((steps, B, 4 * H), lambda t: (t, 0, 0)),
                # backward gate half: time block nblk-1-t, column block 1
                pl.BlockSpec((steps, B, 4 * H), lambda t: (nblk - 1 - t, 0, 1)),
                pl.BlockSpec((2, H, 4 * H), lambda t: (0, 0, 0)),   # W_hh resident
                pl.BlockSpec((1, 8 * H), lambda t: (0, 0)),         # bias resident
            ],
            out_specs=[pl.BlockSpec((steps, B, H), lambda t: (t, 0, 0)),
                       pl.BlockSpec((steps, B, H), lambda t: (nblk - 1 - t, 0, 0))],
            scratch_shapes=[pltpu.VMEM((2, B, H), jnp.float32),
                            pltpu.VMEM((2, B, H), jnp.float32)],
        ),
        compiler_params=pltpu.CompilerParams(
            dimension_semantics=("arbitrary",), vmem_limit_bytes=VMEM_LIMIT),
    )(gx, gx, whh_both, bias)
    return out_f, out_b


def init_params(key, input_dim, hidden_dim, output_dim, num_layers):
    keys = iter(jax.random.split(key, 128))

    def rnd(shape, scale=0.1):
        return (scale * jax.random.normal(next(keys), shape)).astype(jnp.float32)

    p = {}
    eps = 1e-5
    for i, cin in zip((1, 2), (1, 32)):
        p[f'conv{i}_w'] = rnd((32, cin, 3, 3)).astype(jnp.bfloat16)
        p[f'conv{i}_b'] = rnd((32,))
        gamma = 1.0 + rnd((32,))
        beta = rnd((32,))
        run_mean = jnp.zeros((32,), jnp.float32)      # fresh-module running stats
        run_var = jnp.ones((32,), jnp.float32)
        scale = gamma / jnp.sqrt(run_var + eps)
        p[f'bn{i}_scale'] = scale
        p[f'bn{i}_shift'] = beta - run_mean * scale

    H = hidden_dim
    D0 = 32 * (input_dim // 4)
    for L in range(num_layers):
        # Input-projection weights stored transposed so the hoisted GEMM is x@W;
        # columns [0:4H] forward gates (i,f,g,o), [4H:8H] backward gates.
        if L == 0:
            p[f'lstm_l{L}_wih'] = rnd((D0, 8 * H)).astype(jnp.bfloat16)
        else:
            # Row-split halves: '_hf' multiplies the forward hidden plane, '_hb'
            # the backward plane (avoids materializing the (T,B,2H) concat).
            p[f'lstm_l{L}_wih_hf'] = rnd((H, 8 * H)).astype(jnp.bfloat16)
            p[f'lstm_l{L}_wih_hb'] = rnd((H, 8 * H)).astype(jnp.bfloat16)
        p[f'lstm_l{L}_b'] = rnd((1, 8 * H))           # b_ih + b_hh, both dirs
        p[f'lstm_l{L}_whh'] = rnd((2, H, 4 * H)).astype(jnp.bfloat16)
    p['fc_w_hf'] = rnd((H, output_dim)).astype(jnp.bfloat16)
    p['fc_w_hb'] = rnd((H, output_dim)).astype(jnp.bfloat16)
    p['fc_b'] = rnd((1, output_dim))
    return p


def asr_ctc_forward(params, x, hidden_dim, output_dim, num_layers=3, lstm_steps=8):
    B, F, T = x.shape
    H = hidden_dim
    # unsqueeze(1) then keep a C-major (C,B,H,W) layout through the conv stack.
    h = x[None].astype(jnp.bfloat16)                          # (1, B, F, T)
    for i in (1, 2):
        h = conv_relu_bn(h, params[f'conv{i}_w'], params[f'conv{i}_b'],
                         params[f'bn{i}_scale'], params[f'bn{i}_shift'])
    C, _, Fp, Tp = h.shape
    # (C,B,F',T') -> (T',B,C*F'); feature order (c, f') matches the PyTorch
    # permute(0,3,1,2).reshape.  conv_dropout: identity in eval mode.
    seq = jnp.transpose(h, (3, 1, 0, 2)).reshape(Tp, B, C * Fp)   # bf16

    # Pad time so the recurrent kernel runs S steps per grid iteration; zero
    # padding keeps the backward direction's pre-sequence state exactly zero.
    S = min(lstm_steps, Tp)
    Tp_pad = _round_up(Tp, S)
    if Tp_pad != Tp:
        seq = jnp.pad(seq, ((0, Tp_pad - Tp), (0, 0), (0, 0)))
    rows = Tp_pad * B

    x_f = seq.reshape(rows, C * Fp)                           # layer-0 input (bf16)
    x_b = None
    for L in range(num_layers):
        # Hoisted input projection for both directions (one tiled GEMM, bf16 out).
        if L == 0:
            gx = _row_tiled_call(matmul_kernel, [x_f],
                                 [params['lstm_l0_wih']], 8 * H,
                                 out_dtype=jnp.bfloat16, pref_tile=512)
        else:
            gx = _row_tiled_call(matmul2_kernel, [x_f, x_b],
                                 [params[f'lstm_l{L}_wih_hf'],
                                  params[f'lstm_l{L}_wih_hb']],
                                 8 * H, out_dtype=jnp.bfloat16, pref_tile=512)
        gx = gx.reshape(Tp_pad, B, 8 * H)
        hf, hb = bilstm_layer(gx, params[f'lstm_l{L}_whh'], params[f'lstm_l{L}_b'],
                              steps=S, t_real=Tp)
        # inter-layer LSTM dropout: identity in eval mode
        x_f = hf.reshape(rows, H)                             # bf16, no cast pass
        x_b = hb.reshape(rows, H)

    # fc_dropout: identity in eval mode.  Final Linear + log_softmax, fused.
    # Output columns padded to a 128 multiple for lane-dense stores; padded
    # columns get bias -1e30 so they do not disturb the softmax normalizer.
    V = output_dim
    Vp = _round_up(V, 128)
    fc_wf = jnp.pad(params['fc_w_hf'], ((0, 0), (0, Vp - V)))
    fc_wb = jnp.pad(params['fc_w_hb'], ((0, 0), (0, Vp - V)))
    fc_b = jnp.pad(params['fc_b'], ((0, 0), (0, Vp - V)), constant_values=-1e30)
    out = _row_tiled_call(linear2_logsoftmax_kernel, [x_f, x_b],
                          [fc_wf, fc_wb, fc_b], Vp, out_dtype=jnp.float32)
    out = out.reshape(Tp_pad, B, Vp)[:Tp, :, :V]
    return out.transpose(1, 0, 2)                             # (B, T', V)


# TODO(synk): get_output_lengths is host-side integer arithmetic (no kernel needed).

if __name__ == "__main__":
    B, F, T = 2, 16, 40
    hidden_dim, output_dim, num_layers = 32, 16, 3

    key = jax.random.PRNGKey(0)
    kx, kp = jax.random.split(key)
    x = jax.random.normal(kx, (B, F, T), dtype=jnp.float32)
    params = init_params(kp, F, hidden_dim, output_dim, num_layers)

    fwd = jax.jit(functools.partial(asr_ctc_forward, hidden_dim=hidden_dim,
                                    output_dim=output_dim, num_layers=num_layers))
    out = jax.block_until_ready(fwd(params, x))

    t1 = (T - 1) // 2 + 1                        # time after conv1 (stride 2)
    Tp = (t1 - 1) // 2 + 1                       # time after conv2 (stride 2)
    assert out.shape == (B, Tp, output_dim), out.shape
    assert bool(jnp.all(jnp.isfinite(out)))
    # log_softmax rows must exponentiate to probability distributions
    assert bool(jnp.allclose(jnp.sum(jnp.exp(out), axis=-1), 1.0, atol=1e-3))
    print("KERNEL_OK")
</pallas_src>

<mosaic_0001>
module attributes {stable_mosaic.version = 11 : i64} {
  func.func @conv_gemm_kernel(%arg0: i32, %arg1: memref<9x384xbf16, #tpu.memory_space<vmem>>, %arg2: memref<32x9xbf16, #tpu.memory_space<vmem>>, %arg3: memref<32x1xf32, #tpu.memory_space<vmem>>, %arg4: memref<32x1xf32, #tpu.memory_space<vmem>>, %arg5: memref<32x1xf32, #tpu.memory_space<vmem>>, %arg6: memref<32x384xbf16, #tpu.memory_space<vmem>>) attributes {dimension_semantics = [#tpu.dimension_semantics<parallel>], iteration_bounds = array<i64: 1>, scalar_prefetch = 0 : i64, scratch_operands = 0 : i64, tpu.core_type = #tpu.core_type<tc>, window_params = [{transform_indices = @transform_0, window_bounds = array<i64: 9, 384>}, {pipeline_mode = #tpu.pipeline_mode<synchronous>, transform_indices = @transform_1, window_bounds = array<i64: 32, 9>}, {pipeline_mode = #tpu.pipeline_mode<synchronous>, transform_indices = @transform_2, window_bounds = array<i64: 32, 1>}, {pipeline_mode = #tpu.pipeline_mode<synchronous>, transform_indices = @transform_3, window_bounds = array<i64: 32, 1>}, {pipeline_mode = #tpu.pipeline_mode<synchronous>, transform_indices = @transform_4, window_bounds = array<i64: 32, 1>}, {transform_indices = @transform_5, window_bounds = array<i64: 32, 384>}]} {
    %c0 = arith.constant 0 : index
    %c0_0 = arith.constant 0 : index
    %0 = vector.load %arg2[%c0, %c0_0] : memref<32x9xbf16, #tpu.memory_space<vmem>>, vector<32x9xbf16>
    %c0_1 = arith.constant 0 : index
    %c0_2 = arith.constant 0 : index
    %1 = vector.load %arg1[%c0_1, %c0_2] : memref<9x384xbf16, #tpu.memory_space<vmem>>, vector<9x384xbf16>
    %cst = arith.constant dense<0.000000e+00> : vector<32x384xf32>
    %2 = tpu.matmul %0, %1, %cst {dimension_numbers = #tpu.dot_dimension_numbers<[1], [0], [0], [1], [0, 0, 1, 1], [], []>} : vector<32x9xbf16>, vector<9x384xbf16>, vector<32x384xf32> -> vector<32x384xf32>
    %c0_3 = arith.constant 0 : index
    %c0_4 = arith.constant 0 : index
    %3 = vector.load %arg3[%c0_3, %c0_4] : memref<32x1xf32, #tpu.memory_space<vmem>>, vector<32x1xf32>
    %4 = vector.broadcast %3 : vector<32x1xf32> to vector<32x384xf32>
    %5 = arith.addf %2, %4 : vector<32x384xf32>
    %cst_5 = arith.constant 0.000000e+00 : f32
    %6 = vector.broadcast %cst_5 : f32 to vector<32x384xf32>
    %7 = arith.maximumf %5, %6 : vector<32x384xf32>
    %c0_6 = arith.constant 0 : index
    %c0_7 = arith.constant 0 : index
    %8 = vector.load %arg4[%c0_6, %c0_7] : memref<32x1xf32, #tpu.memory_space<vmem>>, vector<32x1xf32>
    %9 = vector.broadcast %8 : vector<32x1xf32> to vector<32x384xf32>
    %10 = arith.mulf %7, %9 : vector<32x384xf32>
    %c0_8 = arith.constant 0 : index
    %c0_9 = arith.constant 0 : index
    %11 = vector.load %arg5[%c0_8, %c0_9] : memref<32x1xf32, #tpu.memory_space<vmem>>, vector<32x1xf32>
    %12 = vector.broadcast %11 : vector<32x1xf32> to vector<32x384xf32>
    %13 = arith.addf %10, %12 : vector<32x384xf32>
    %14 = arith.truncf %13 : vector<32x384xf32> to vector<32x384xbf16>
    %c0_10 = arith.constant 0 : index
    %c0_11 = arith.constant 0 : index
    %15 = vector.load %arg6[%c0_10, %c0_11] : memref<32x384xbf16, #tpu.memory_space<vmem>>, vector<32x384xbf16>
    tpu.vector_store %arg6[%c0_10, %c0_11], %14 {strides = array<i32>} : memref<32x384xbf16, #tpu.memory_space<vmem>>, vector<32x384xbf16>,
    return
  }
  func.func @transform_0(%arg0: i32) -> (i32, i32) {
    %c0_i32 = arith.constant 0 : i32
    %c0_i32_0 = arith.constant 0 : i32
    return %c0_i32, %arg0 : i32, i32
  }
  func.func @transform_1(%arg0: i32) -> (i32, i32) {
    %c0_i32 = arith.constant 0 : i32
    %c0_i32_0 = arith.constant 0 : i32
    %c0_i32_1 = arith.constant 0 : i32
    return %c0_i32, %c0_i32_0 : i32, i32
  }
  func.func @transform_2(%arg0: i32) -> (i32, i32) {
    %c0_i32 = arith.constant 0 : i32
    %c0_i32_0 = arith.constant 0 : i32
    %c0_i32_1 = arith.constant 0 : i32
    return %c0_i32, %c0_i32_0 : i32, i32
  }
  func.func @transform_3(%arg0: i32) -> (i32, i32) {
    %c0_i32 = arith.constant 0 : i32
    %c0_i32_0 = arith.constant 0 : i32
    %c0_i32_1 = arith.constant 0 : i32
    return %c0_i32, %c0_i32_0 : i32, i32
  }
  func.func @transform_4(%arg0: i32) -> (i32, i32) {
    %c0_i32 = arith.constant 0 : i32
    %c0_i32_0 = arith.constant 0 : i32
    %c0_i32_1 = arith.constant 0 : i32
    return %c0_i32, %c0_i32_0 : i32, i32
  }
  func.func @transform_5(%arg0: i32) -> (i32, i32) {
    %c0_i32 = arith.constant 0 : i32
    %c0_i32_0 = arith.constant 0 : i32
    return %c0_i32, %arg0 : i32, i32
  }
}

module attributes {stable_mosaic.version = 11 : i64} {
  func.func @conv_gemm_kernel(%arg0: i32, %arg1: memref<288x128xbf16, #tpu.memory_space<vmem>>, %arg2: memref<32x288xbf16, #tpu.memory_space<vmem>>, %arg3: memref<32x1xf32, #tpu.memory_space<vmem>>, %arg4: memref<32x1xf32, #tpu.memory_space<vmem>>, %arg5: memref<32x1xf32, #tpu.memory_space<vmem>>, %arg6: memref<32x128xbf16, #tpu.memory_space<vmem>>) attributes {dimension_semantics = [#tpu.dimension_semantics<parallel>], iteration_bounds = array<i64: 1>, scalar_prefetch = 0 : i64, scratch_operands = 0 : i64, tpu.core_type = #tpu.core_type<tc>, window_params = [{transform_indices = @transform_0, window_bounds = array<i64: 288, 128>}, {pipeline_mode = #tpu.pipeline_mode<synchronous>, transform_indices = @transform_1, window_bounds = array<i64: 32, 288>}, {pipeline_mode = #tpu.pipeline_mode<synchronous>, transform_indices = @transform_2, window_bounds = array<i64: 32, 1>}, {pipeline_mode = #tpu.pipeline_mode<synchronous>, transform_indices = @transform_3, window_bounds = array<i64: 32, 1>}, {pipeline_mode = #tpu.pipeline_mode<synchronous>, transform_indices = @transform_4, window_bounds = array<i64: 32, 1>}, {transform_indices = @transform_5, window_bounds = array<i64: 32, 128>}]} {
    %c0 = arith.constant 0 : index
    %c0_0 = arith.constant 0 : index
    %0 = vector.load %arg2[%c0, %c0_0] : memref<32x288xbf16, #tpu.memory_space<vmem>>, vector<32x288xbf16>
    %c0_1 = arith.constant 0 : index
    %c0_2 = arith.constant 0 : index
    %1 = vector.load %arg1[%c0_1, %c0_2] : memref<288x128xbf16, #tpu.memory_space<vmem>>, vector<288x128xbf16>
    %cst = arith.constant dense<0.000000e+00> : vector<32x128xf32>
    %2 = tpu.matmul %0, %1, %cst {dimension_numbers = #tpu.dot_dimension_numbers<[1], [0], [0], [1], [0, 0, 1, 1], [], []>} : vector<32x288xbf16>, vector<288x128xbf16>, vector<32x128xf32> -> vector<32x128xf32>
    %c0_3 = arith.constant 0 : index
    %c0_4 = arith.constant 0 : index
    %3 = vector.load %arg3[%c0_3, %c0_4] : memref<32x1xf32, #tpu.memory_space<vmem>>, vector<32x1xf32>
    %4 = vector.broadcast %3 : vector<32x1xf32> to vector<32x128xf32>
    %5 = arith.addf %2, %4 : vector<32x128xf32>
    %cst_5 = arith.constant 0.000000e+00 : f32
    %6 = vector.broadcast %cst_5 : f32 to vector<32x128xf32>
    %7 = arith.maximumf %5, %6 : vector<32x128xf32>
    %c0_6 = arith.constant 0 : index
    %c0_7 = arith.constant 0 : index
    %8 = vector.load %arg4[%c0_6, %c0_7] : memref<32x1xf32, #tpu.memory_space<vmem>>, vector<32x1xf32>
    %9 = vector.broadcast %8 : vector<32x1xf32> to vector<32x128xf32>
    %10 = arith.mulf %7, %9 : vector<32x128xf32>
    %c0_8 = arith.constant 0 : index
    %c0_9 = arith.constant 0 : index
    %11 = vector.load %arg5[%c0_8, %c0_9] : memref<32x1xf32, #tpu.memory_space<vmem>>, vector<32x1xf32>
    %12 = vector.broadcast %11 : vector<32x1xf32> to vector<32x128xf32>
    %13 = arith.addf %10, %12 : vector<32x128xf32>
    %14 = arith.truncf %13 : vector<32x128xf32> to vector<32x128xbf16>
    %c0_10 = arith.constant 0 : index
    %c0_11 = arith.constant 0 : index
    %15 = vector.load %arg6[%c0_10, %c0_11] : memref<32x128xbf16, #tpu.memory_space<vmem>>, vector<32x128xbf16>
    tpu.vector_store %arg6[%c0_10, %c0_11], %14 {strides = array<i32>} : memref<32x128xbf16, #tpu.memory_space<vmem>>, vector<32x128xbf16>,
    return
  }
  func.func @transform_0(%arg0: i32) -> (i32, i32) {
    %c0_i32 = arith.constant 0 : i32
    %c0_i32_0 = arith.constant 0 : i32
    return %c0_i32, %arg0 : i32, i32
  }
  func.func @transform_1(%arg0: i32) -> (i32, i32) {
    %c0_i32 = arith.constant 0 : i32
    %c0_i32_0 = arith.constant 0 : i32
    %c0_i32_1 = arith.constant 0 : i32
    return %c0_i32, %c0_i32_0 : i32, i32
  }
  func.func @transform_2(%arg0: i32) -> (i32, i32) {
    %c0_i32 = arith.constant 0 : i32
    %c0_i32_0 = arith.constant 0 : i32
    %c0_i32_1 = arith.constant 0 : i32
    return %c0_i32, %c0_i32_0 : i32, i32
  }
  func.func @transform_3(%arg0: i32) -> (i32, i32) {
    %c0_i32 = arith.constant 0 : i32
    %c0_i32_0 = arith.constant 0 : i32
    %c0_i32_1 = arith.constant 0 : i32
    return %c0_i32, %c0_i32_0 : i32, i32
  }
  func.func @transform_4(%arg0: i32) -> (i32, i32) {
    %c0_i32 = arith.constant 0 : i32
    %c0_i32_0 = arith.constant 0 : i32
    %c0_i32_1 = arith.constant 0 : i32
    return %c0_i32, %c0_i32_0 : i32, i32
  }
  func.func @transform_5(%arg0: i32) -> (i32, i32) {
    %c0_i32 = arith.constant 0 : i32
    %c0_i32_0 = arith.constant 0 : i32
    return %c0_i32, %arg0 : i32, i32
  }
}

module attributes {stable_mosaic.version = 11 : i64} {
  func.func @matmul2_kernel(%arg0: i32, %arg1: memref<32x32xbf16, #tpu.memory_space<vmem>>, %arg2: memref<32x32xbf16, #tpu.memory_space<vmem>>, %arg3: memref<32x256xbf16, #tpu.memory_space<vmem>>, %arg4: memref<32x256xbf16, #tpu.memory_space<vmem>>, %arg5: memref<32x256xbf16, #tpu.memory_space<vmem>>) attributes {dimension_semantics = [#tpu.dimension_semantics<parallel>], iteration_bounds = array<i64: 1>, scalar_prefetch = 0 : i64, scratch_operands = 0 : i64, tpu.core_type = #tpu.core_type<tc>, window_params = [{transform_indices = @transform_0, window_bounds = array<i64: 32, 32>}, {transform_indices = @transform_1, window_bounds = array<i64: 32, 32>}, {pipeline_mode = #tpu.pipeline_mode<synchronous>, transform_indices = @transform_2, window_bounds = array<i64: 32, 256>}, {pipeline_mode = #tpu.pipeline_mode<synchronous>, transform_indices = @transform_3, window_bounds = array<i64: 32, 256>}, {transform_indices = @transform_4, window_bounds = array<i64: 32, 256>}]} {
    %c0 = arith.constant 0 : index
    %c0_0 = arith.constant 0 : index
    %0 = vector.load %arg1[%c0, %c0_0] : memref<32x32xbf16, #tpu.memory_space<vmem>>, vector<32x32xbf16>
    %c0_1 = arith.constant 0 : index
    %c0_2 = arith.constant 0 : index
    %1 = vector.load %arg3[%c0_1, %c0_2] : memref<32x256xbf16, #tpu.memory_space<vmem>>, vector<32x256xbf16>
    %cst = arith.constant dense<0.000000e+00> : vector<32x256xf32>
    %2 = tpu.matmul %0, %1, %cst {dimension_numbers = #tpu.dot_dimension_numbers<[1], [0], [0], [1], [0, 0, 1, 1], [], []>} : vector<32x32xbf16>, vector<32x256xbf16>, vector<32x256xf32> -> vector<32x256xf32>
    %c0_3 = arith.constant 0 : index
    %c0_4 = arith.constant 0 : index
    %3 = vector.load %arg2[%c0_3, %c0_4] : memref<32x32xbf16, #tpu.memory_space<vmem>>, vector<32x32xbf16>
    %c0_5 = arith.constant 0 : index
    %c0_6 = arith.constant 0 : index
    %4 = vector.load %arg4[%c0_5, %c0_6] : memref<32x256xbf16, #tpu.memory_space<vmem>>, vector<32x256xbf16>
    %cst_7 = arith.constant dense<0.000000e+00> : vector<32x256xf32>
    %5 = tpu.matmul %3, %4, %cst_7 {dimension_numbers = #tpu.dot_dimension_numbers<[1], [0], [0], [1], [0, 0, 1, 1], [], []>} : vector<32x32xbf16>, vector<32x256xbf16>, vector<32x256xf32> -> vector<32x256xf32>
    %6 = arith.addf %2, %5 : vector<32x256xf32>
    %7 = arith.truncf %6 : vector<32x256xf32> to vector<32x256xbf16>
    %c0_8 = arith.constant 0 : index
    %c0_9 = arith.constant 0 : index
    %8 = vector.load %arg5[%c0_8, %c0_9] : memref<32x256xbf16, #tpu.memory_space<vmem>>, vector<32x256xbf16>
    tpu.vector_store %arg5[%c0_8, %c0_9], %7 {strides = array<i32>} : memref<32x256xbf16, #tpu.memory_space<vmem>>, vector<32x256xbf16>,
    return
  }
  func.func @transform_0(%arg0: i32) -> (i32, i32) {
    %c0_i32 = arith.constant 0 : i32
    %c0_i32_0 = arith.constant 0 : i32
    return %arg0, %c0_i32 : i32, i32
  }
  func.func @transform_1(%arg0: i32) -> (i32, i32) {
    %c0_i32 = arith.constant 0 : i32
    %c0_i32_0 = arith.constant 0 : i32
    return %arg0, %c0_i32 : i32, i32
  }
  func.func @transform_2(%arg0: i32) -> (i32, i32) {
    %c0_i32 = arith.constant 0 : i32
    %c0_i32_0 = arith.constant 0 : i32
    %c0_i32_1 = arith.constant 0 : i32
    return %c0_i32, %c0_i32_0 : i32, i32
  }
  func.func @transform_3(%arg0: i32) -> (i32, i32) {
    %c0_i32 = arith.constant 0 : i32
    %c0_i32_0 = arith.constant 0 : i32
    %c0_i32_1 = arith.constant 0 : i32
    return %c0_i32, %c0_i32_0 : i32, i32
  }
  func.func @transform_4(%arg0: i32) -> (i32, i32) {
    %c0_i32 = arith.constant 0 : i32
    %c0_i32_0 = arith.constant 0 : i32
    return %arg0, %c0_i32 : i32, i32
  }
}

module attributes {stable_mosaic.version = 11 : i64} {
  func.func @matmul_kernel(%arg0: i32, %arg1: memref<32x128xbf16, #tpu.memory_space<vmem>>, %arg2: memref<128x256xbf16, #tpu.memory_space<vmem>>, %arg3: memref<32x256xbf16, #tpu.memory_space<vmem>>) attributes {dimension_semantics = [#tpu.dimension_semantics<parallel>], iteration_bounds = array<i64: 1>, scalar_prefetch = 0 : i64, scratch_operands = 0 : i64, tpu.core_type = #tpu.core_type<tc>, window_params = [{transform_indices = @transform_0, window_bounds = array<i64: 32, 128>}, {pipeline_mode = #tpu.pipeline_mode<synchronous>, transform_indices = @transform_1, window_bounds = array<i64: 128, 256>}, {transform_indices = @transform_2, window_bounds = array<i64: 32, 256>}]} {
    %c0 = arith.constant 0 : index
    %c0_0 = arith.constant 0 : index
    %0 = vector.load %arg1[%c0, %c0_0] : memref<32x128xbf16, #tpu.memory_space<vmem>>, vector<32x128xbf16>
    %c0_1 = arith.constant 0 : index
    %c0_2 = arith.constant 0 : index
    %1 = vector.load %arg2[%c0_1, %c0_2] : memref<128x256xbf16, #tpu.memory_space<vmem>>, vector<128x256xbf16>
    %cst = arith.constant dense<0.000000e+00> : vector<32x256xf32>
    %2 = tpu.matmul %0, %1, %cst {dimension_numbers = #tpu.dot_dimension_numbers<[1], [0], [0], [1], [0, 0, 1, 1], [], []>} : vector<32x128xbf16>, vector<128x256xbf16>, vector<32x256xf32> -> vector<32x256xf32>
    %3 = arith.truncf %2 : vector<32x256xf32> to vector<32x256xbf16>
    %c0_3 = arith.constant 0 : index
    %c0_4 = arith.constant 0 : index
    %4 = vector.load %arg3[%c0_3, %c0_4] : memref<32x256xbf16, #tpu.memory_space<vmem>>, vector<32x256xbf16>
    tpu.vector_store %arg3[%c0_3, %c0_4], %3 {strides = array<i32>} : memref<32x256xbf16, #tpu.memory_space<vmem>>, vector<32x256xbf16>,
    return
  }
  func.func @transform_0(%arg0: i32) -> (i32, i32) {
    %c0_i32 = arith.constant 0 : i32
    %c0_i32_0 = arith.constant 0 : i32
    return %arg0, %c0_i32 : i32, i32
  }
  func.func @transform_1(%arg0: i32) -> (i32, i32) {
    %c0_i32 = arith.constant 0 : i32
    %c0_i32_0 = arith.constant 0 : i32
    %c0_i32_1 = arith.constant 0 : i32
    return %c0_i32, %c0_i32_0 : i32, i32
  }
  func.func @transform_2(%arg0: i32) -> (i32, i32) {
    %c0_i32 = arith.constant 0 : i32
    %c0_i32_0 = arith.constant 0 : i32
    return %arg0, %c0_i32 : i32, i32
  }
}

module attributes {stable_mosaic.version = 11 : i64} {
  func.func @bilstm_kernel(%arg0: i32, %arg1: memref<8x2x128xbf16, #tpu.memory_space<vmem>>, %arg2: memref<8x2x128xbf16, #tpu.memory_space<vmem>>, %arg3: memref<2x32x128xbf16, #tpu.memory_space<vmem>>, %arg4: memref<1x256xf32, #tpu.memory_space<vmem>>, %arg5: memref<8x2x32xbf16, #tpu.memory_space<vmem>>, %arg6: memref<8x2x32xbf16, #tpu.memory_space<vmem>>, %arg7: memref<2x2x32xf32, #tpu.memory_space<vmem>>, %arg8: memref<2x2x32xf32, #tpu.memory_space<vmem>>) attributes {dimension_semantics = [#tpu.dimension_semantics<arbitrary>], iteration_bounds = array<i64: 2>, scalar_prefetch = 0 : i64, scratch_operands = 2 : i64, tpu.core_type = #tpu.core_type<tc>, window_params = [{transform_indices = @transform_0, window_bounds = array<i64: 8, 2, 128>}, {transform_indices = @transform_1, window_bounds = array<i64: 8, 2, 128>}, {pipeline_mode = #tpu.pipeline_mode<synchronous>, transform_indices = @transform_2, window_bounds = array<i64: 2, 32, 128>}, {pipeline_mode = #tpu.pipeline_mode<synchronous>, transform_indices = @transform_3, window_bounds = array<i64: 1, 256>}, {transform_indices = @transform_4, window_bounds = array<i64: 8, 2, 32>}, {transform_indices = @transform_5, window_bounds = array<i64: 8, 2, 32>}]} {
    %c0_i32 = arith.constant 0 : i32
    %0 = arith.cmpi eq, %arg0, %c0_i32 : i32
    %1 = arith.extui %0 : i1 to i32
    %c0_i32_0 = arith.constant 0 : i32
    %2 = arith.cmpi ne, %1, %c0_i32_0 : i32
    scf.if %2 {
      %cst_231 = arith.constant 0.000000e+00 : f32
      %742 = vector.broadcast %cst_231 : f32 to vector<2x2x32xf32>
      %c0_232 = arith.constant 0 : index
      %c0_233 = arith.constant 0 : index
      %c0_234 = arith.constant 0 : index
      %743 = vector.load %arg7[%c0_232, %c0_233, %c0_234] : memref<2x2x32xf32, #tpu.memory_space<vmem>>, vector<2x2x32xf32>
      tpu.vector_store %arg7[%c0_232, %c0_233, %c0_234], %742 {strides = array<i32>} : memref<2x2x32xf32, #tpu.memory_space<vmem>>, vector<2x2x32xf32>,
      %cst_235 = arith.constant 0.000000e+00 : f32
      %744 = vector.broadcast %cst_235 : f32 to vector<2x2x32xf32>
      %c0_236 = arith.constant 0 : index
      %c0_237 = arith.constant 0 : index
      %c0_238 = arith.constant 0 : index
      %745 = vector.load %arg8[%c0_236, %c0_237, %c0_238] : memref<2x2x32xf32, #tpu.memory_space<vmem>>, vector<2x2x32xf32>
      tpu.vector_store %arg8[%c0_236, %c0_237, %c0_238], %744 {strides = array<i32>} : memref<2x2x32xf32, #tpu.memory_space<vmem>>, vector<2x2x32xf32>,
    } else {
    }
    %c0 = arith.constant 0 : index
    %c0_1 = arith.constant 0 : index
    %c0_2 = arith.constant 0 : index
    %3 = vector.load %arg3[%c0, %c0_1, %c0_2] : memref<2x32x128xbf16, #tpu.memory_space<vmem>>, vector<1x32x128xbf16>
    %4 = vector.shape_cast %3 : vector<1x32x128xbf16> to vector<32x128xbf16>
    %c1 = arith.constant 1 : index
    %c0_3 = arith.constant 0 : index
    %c0_4 = arith.constant 0 : index
    %5 = vector.load %arg3[%c1, %c0_3, %c0_4] : memref<2x32x128xbf16, #tpu.memory_space<vmem>>, vector<1x32x128xbf16>
    %6 = vector.shape_cast %5 : vector<1x32x128xbf16> to vector<32x128xbf16>
    %c0_5 = arith.constant 0 : index
    %c0_6 = arith.constant 0 : index
    %7 = vector.load %arg4[%c0_5, %c0_6] : memref<1x256xf32, #tpu.memory_space<vmem>>, vector<1x256xf32>
    %8 = vector.extract_strided_slice %7 {offsets = [0, 0], sizes = [1, 128], strides = [1, 1]} : vector<1x256xf32> to vector<1x128xf32>
    %9 = vector.extract_strided_slice %7 {offsets = [0, 128], sizes = [1, 128], strides = [1, 1]} : vector<1x256xf32> to vector<1x128xf32>
    %c0_7 = arith.constant 0 : index
    %c0_8 = arith.constant 0 : index
    %c0_9 = arith.constant 0 : index
    %10 = vector.load %arg7[%c0_7, %c0_8, %c0_9] : memref<2x2x32xf32, #tpu.memory_space<vmem>>, vector<1x2x32xf32>
    %11 = vector.shape_cast %10 : vector<1x2x32xf32> to vector<2x32xf32>
    %c0_10 = arith.constant 0 : index
    %c0_11 = arith.constant 0 : index
    %c0_12 = arith.constant 0 : index
    %12 = vector.load %arg8[%c0_10, %c0_11, %c0_12] : memref<2x2x32xf32, #tpu.memory_space<vmem>>, vector<1x2x32xf32>
    %13 = vector.shape_cast %12 : vector<1x2x32xf32> to vector<2x32xf32>
    %c1_13 = arith.constant 1 : index
    %c0_14 = arith.constant 0 : index
    %c0_15 = arith.constant 0 : index
    %14 = vector.load %arg7[%c1_13, %c0_14, %c0_15] : memref<2x2x32xf32, #tpu.memory_space<vmem>>, vector<1x2x32xf32>
    %15 = vector.shape_cast %14 : vector<1x2x32xf32> to vector<2x32xf32>
    %c1_16 = arith.constant 1 : index
    %c0_17 = arith.constant 0 : index
    %c0_18 = arith.constant 0 : index
    %16 = vector.load %arg8[%c1_16, %c0_17, %c0_18] : memref<2x2x32xf32, #tpu.memory_space<vmem>>, vector<1x2x32xf32>
    %17 = vector.shape_cast %16 : vector<1x2x32xf32> to vector<2x32xf32>
    %c0_19 = arith.constant 0 : index
    %c0_20 = arith.constant 0 : index
    %c0_21 = arith.constant 0 : index
    %18 = vector.load %arg1[%c0_19, %c0_20, %c0_21] : memref<8x2x128xbf16, #tpu.memory_space<vmem>>, vector<1x2x128xbf16>
    %19 = vector.shape_cast %18 : vector<1x2x128xbf16> to vector<2x128xbf16>
    %20 = arith.extf %19 : vector<2x128xbf16> to vector<2x128xf32>
    %21 = vector.broadcast %8 : vector<1x128xf32> to vector<2x128xf32>
    %22 = arith.addf %20, %21 : vector<2x128xf32>
    %23 = arith.truncf %11 : vector<2x32xf32> to vector<2x32xbf16>
    %cst = arith.constant dense<0.000000e+00> : vector<2x128xf32>
    %24 = tpu.matmul %23, %4, %cst {dimension_numbers = #tpu.dot_dimension_numbers<[1], [0], [0], [1], [0, 0, 1, 1], [], []>} : vector<2x32xbf16>, vector<32x128xbf16>, vector<2x128xf32> -> vector<2x128xf32>
    %25 = arith.addf %22, %24 : vector<2x128xf32>
    %26 = vector.extract_strided_slice %25 {offsets = [0, 0], sizes = [2, 32], strides = [1, 1]} : vector<2x128xf32> to vector<2x32xf32>
    %27 = arith.negf %26 : vector<2x32xf32>
    %28 = math.exp %27 : vector<2x32xf32>
    %cst_22 = arith.constant 1.000000e+00 : f32
    %29 = vector.broadcast %cst_22 : f32 to vector<2x32xf32>
    %30 = arith.addf %29, %28 : vector<2x32xf32>
    %31 = arith.divf %29, %30 : vector<2x32xf32>
    %32 = vector.extract_strided_slice %25 {offsets = [0, 32], sizes = [2, 32], strides = [1, 1]} : vector<2x128xf32> to vector<2x32xf32>
    %33 = arith.negf %32 : vector<2x32xf32>
    %34 = math.exp %33 : vector<2x32xf32>
    %cst_23 = arith.constant 1.000000e+00 : f32
    %35 = vector.broadcast %cst_23 : f32 to vector<2x32xf32>
    %36 = arith.addf %35, %34 : vector<2x32xf32>
    %37 = arith.divf %35, %36 : vector<2x32xf32>
    %38 = vector.extract_strided_slice %25 {offsets = [0, 64], sizes = [2, 32], strides = [1, 1]} : vector<2x128xf32> to vector<2x32xf32>
    %39 = math.tanh %38 : vector<2x32xf32>
    %40 = vector.extract_strided_slice %25 {offsets = [0, 96], sizes = [2, 32], strides = [1, 1]} : vector<2x128xf32> to vector<2x32xf32>
    %41 = arith.negf %40 : vector<2x32xf32>
    %42 = math.exp %41 : vector<2x32xf32>
    %cst_24 = arith.constant 1.000000e+00 : f32
    %43 = vector.broadcast %cst_24 : f32 to vector<2x32xf32>
    %44 = arith.addf %43, %42 : vector<2x32xf32>
    %45 = arith.divf %43, %44 : vector<2x32xf32>
    %46 = arith.mulf %37, %13 : vector<2x32xf32>
    %47 = arith.mulf %31, %39 : vector<2x32xf32>
    %48 = arith.addf %46, %47 : vector<2x32xf32>
    %49 = math.tanh %48 : vector<2x32xf32>
    %50 = arith.mulf %45, %49 : vector<2x32xf32>
    %c1_i32 = arith.constant 1 : i32
    %51 = arith.subi %c1_i32, %arg0 : i32
    %c8_i32 = arith.constant 8 : i32
    %52 = arith.muli %51, %c8_i32 : i32
    %c7_i32 = arith.constant 7 : i32
    %53 = arith.addi %52, %c7_i32 : i32
    %c10_i32 = arith.constant 10 : i32
    %54 = arith.cmpi slt, %53, %c10_i32 : i32
    %55 = arith.extui %54 : i1 to i32
    %56 = arith.sitofp %55 : i32 to f32
    %57 = vector.broadcast %56 : f32 to vector<1x128xf32>
    %58 = arith.mulf %9, %57 : vector<1x128xf32>
    %c7 = arith.constant 7 : index
    %c0_25 = arith.constant 0 : index
    %c0_26 = arith.constant 0 : index
    %59 = vector.load %arg2[%c7, %c0_25, %c0_26] : memref<8x2x128xbf16, #tpu.memory_space<vmem>>, vector<1x2x128xbf16>
    %60 = vector.shape_cast %59 : vector<1x2x128xbf16> to vector<2x128xbf16>
    %61 = arith.extf %60 : vector<2x128xbf16> to vector<2x128xf32>
    %62 = vector.broadcast %58 : vector<1x128xf32> to vector<2x128xf32>
    %63 = arith.addf %61, %62 : vector<2x128xf32>
    %64 = arith.truncf %15 : vector<2x32xf32> to vector<2x32xbf16>
    %cst_27 = arith.constant dense<0.000000e+00> : vector<2x128xf32>
    %65 = tpu.matmul %64, %6, %cst_27 {dimension_numbers = #tpu.dot_dimension_numbers<[1], [0], [0], [1], [0, 0, 1, 1], [], []>} : vector<2x32xbf16>, vector<32x128xbf16>, vector<2x128xf32> -> vector<2x128xf32>
    %66 = arith.addf %63, %65 : vector<2x128xf32>
    %67 = vector.extract_strided_slice %66 {offsets = [0, 0], sizes = [2, 32], strides = [1, 1]} : vector<2x128xf32> to vector<2x32xf32>
    %68 = arith.negf %67 : vector<2x32xf32>
    %69 = math.exp %68 : vector<2x32xf32>
    %cst_28 = arith.constant 1.000000e+00 : f32
    %70 = vector.broadcast %cst_28 : f32 to vector<2x32xf32>
    %71 = arith.addf %70, %69 : vector<2x32xf32>
    %72 = arith.divf %70, %71 : vector<2x32xf32>
    %73 = vector.extract_strided_slice %66 {offsets = [0, 32], sizes = [2, 32], strides = [1, 1]} : vector<2x128xf32> to vector<2x32xf32>
    %74 = arith.negf %73 : vector<2x32xf32>
    %75 = math.exp %74 : vector<2x32xf32>
    %cst_29 = arith.constant 1.000000e+00 : f32
    %76 = vector.broadcast %cst_29 : f32 to vector<2x32xf32>
    %77 = arith.addf %76, %75 : vector<2x32xf32>
    %78 = arith.divf %76, %77 : vector<2x32xf32>
    %79 = vector.extract_strided_slice %66 {offsets = [0, 64], sizes = [2, 32], strides = [1, 1]} : vector<2x128xf32> to vector<2x32xf32>
    %80 = math.tanh %79 : vector<2x32xf32>
    %81 = vector.extract_strided_slice %66 {offsets = [0, 96], sizes = [2, 32], strides = [1, 1]} : vector<2x128xf32> to vector<2x32xf32>
    %82 = arith.negf %81 : vector<2x32xf32>
    %83 = math.exp %82 : vector<2x32xf32>
    %cst_30 = arith.constant 1.000000e+00 : f32
    %84 = vector.broadcast %cst_30 : f32 to vector<2x32xf32>
    %85 = arith.addf %84, %83 : vector<2x32xf32>
    %86 = arith.divf %84, %85 : vector<2x32xf32>
    %87 = arith.mulf %78, %17 : vector<2x32xf32>
    %88 = arith.mulf %72, %80 : vector<2x32xf32>
    %89 = arith.addf %87, %88 : vector<2x32xf32>
    %90 = math.tanh %89 : vector<2x32xf32>
    %91 = arith.mulf %86, %90 : vector<2x32xf32>
    %c8_i32_31 = arith.constant 8 : i32
    %92 = arith.muli %arg0, %c8_i32_31 : i32
    %c0_i32_32 = arith.constant 0 : i32
    %93 = arith.addi %92, %c0_i32_32 : i32
    %c10_i32_33 = arith.constant 10 : i32
    %94 = arith.cmpi slt, %93, %c10_i32_33 : i32
    %95 = arith.extui %94 : i1 to i32
    %96 = arith.sitofp %95 : i32 to f32
    %97 = vector.broadcast %96 : f32 to vector<2x32xf32>
    %98 = arith.mulf %50, %97 : vector<2x32xf32>
    %99 = arith.truncf %98 : vector<2x32xf32> to vector<2x32xbf16>
    %c0_34 = arith.constant 0 : index
    %c0_35 = arith.constant 0 : index
    %c0_36 = arith.constant 0 : index
    %100 = vector.load %arg5[%c0_34, %c0_35, %c0_36] : memref<8x2x32xbf16, #tpu.memory_space<vmem>>, vector<1x2x32xbf16>
    %101 = vector.shape_cast %100 : vector<1x2x32xbf16> to vector<2x32xbf16>
    %102 = vector.shape_cast %99 : vector<2x32xbf16> to vector<1x2x32xbf16>
    tpu.vector_store %arg5[%c0_34, %c0_35, %c0_36], %102 {strides = array<i32>} : memref<8x2x32xbf16, #tpu.memory_space<vmem>>, vector<1x2x32xbf16>,
    %103 = arith.truncf %91 : vector<2x32xf32> to vector<2x32xbf16>
    %c7_37 = arith.constant 7 : index
    %c0_38 = arith.constant 0 : index
    %c0_39 = arith.constant 0 : index
    %104 = vector.load %arg6[%c7_37, %c0_38, %c0_39] : memref<8x2x32xbf16, #tpu.memory_space<vmem>>, vector<1x2x32xbf16>
    %105 = vector.shape_cast %104 : vector<1x2x32xbf16> to vector<2x32xbf16>
    %106 = vector.shape_cast %103 : vector<2x32xbf16> to vector<1x2x32xbf16>
    tpu.vector_store %arg6[%c7_37, %c0_38, %c0_39], %106 {strides = array<i32>} : memref<8x2x32xbf16, #tpu.memory_space<vmem>>, vector<1x2x32xbf16>,
    %c1_40 = arith.constant 1 : index
    %c0_41 = arith.constant 0 : index
    %c0_42 = arith.constant 0 : index
    %107 = vector.load %arg1[%c1_40, %c0_41, %c0_42] : memref<8x2x128xbf16, #tpu.memory_space<vmem>>, vector<1x2x128xbf16>
    %108 = vector.shape_cast %107 : vector<1x2x128xbf16> to vector<2x128xbf16>
    %109 = arith.extf %108 : vector<2x128xbf16> to vector<2x128xf32>
    %110 = vector.broadcast %8 : vector<1x128xf32> to vector<2x128xf32>
    %111 = arith.addf %109, %110 : vector<2x128xf32>
    %112 = arith.truncf %50 : vector<2x32xf32> to vector<2x32xbf16>
    %cst_43 = arith.constant dense<0.000000e+00> : vector<2x128xf32>
    %113 = tpu.matmul %112, %4, %cst_43 {dimension_numbers = #tpu.dot_dimension_numbers<[1], [0], [0], [1], [0, 0, 1, 1], [], []>} : vector<2x32xbf16>, vector<32x128xbf16>, vector<2x128xf32> -> vector<2x128xf32>
    %114 = arith.addf %111, %113 : vector<2x128xf32>
    %115 = vector.extract_strided_slice %114 {offsets = [0, 0], sizes = [2, 32], strides = [1, 1]} : vector<2x128xf32> to vector<2x32xf32>
    %116 = arith.negf %115 : vector<2x32xf32>
    %117 = math.exp %116 : vector<2x32xf32>
    %cst_44 = arith.constant 1.000000e+00 : f32
    %118 = vector.broadcast %cst_44 : f32 to vector<2x32xf32>
    %119 = arith.addf %118, %117 : vector<2x32xf32>
    %120 = arith.divf %118, %119 : vector<2x32xf32>
    %121 = vector.extract_strided_slice %114 {offsets = [0, 32], sizes = [2, 32], strides = [1, 1]} : vector<2x128xf32> to vector<2x32xf32>
    %122 = arith.negf %121 : vector<2x32xf32>
    %123 = math.exp %122 : vector<2x32xf32>
    %cst_45 = arith.constant 1.000000e+00 : f32
    %124 = vector.broadcast %cst_45 : f32 to vector<2x32xf32>
    %125 = arith.addf %124, %123 : vector<2x32xf32>
    %126 = arith.divf %124, %125 : vector<2x32xf32>
    %127 = vector.extract_strided_slice %114 {offsets = [0, 64], sizes = [2, 32], strides = [1, 1]} : vector<2x128xf32> to vector<2x32xf32>
    %128 = math.tanh %127 : vector<2x32xf32>
    %129 = vector.extract_strided_slice %114 {offsets = [0, 96], sizes = [2, 32], strides = [1, 1]} : vector<2x128xf32> to vector<2x32xf32>
    %130 = arith.negf %129 : vector<2x32xf32>
    %131 = math.exp %130 : vector<2x32xf32>
    %cst_46 = arith.constant 1.000000e+00 : f32
    %132 = vector.broadcast %cst_46 : f32 to vector<2x32xf32>
    %133 = arith.addf %132, %131 : vector<2x32xf32>
    %134 = arith.divf %132, %133 : vector<2x32xf32>
    %135 = arith.mulf %126, %48 : vector<2x32xf32>
    %136 = arith.mulf %120, %128 : vector<2x32xf32>
    %137 = arith.addf %135, %136 : vector<2x32xf32>
    %138 = math.tanh %137 : vector<2x32xf32>
    %139 = arith.mulf %134, %138 : vector<2x32xf32>
    %c1_i32_47 = arith.constant 1 : i32
    %140 = arith.subi %c1_i32_47, %arg0 : i32
    %c8_i32_48 = arith.constant 8 : i32
    %141 = arith.muli %140, %c8_i32_48 : i32
    %c6_i32 = arith.constant 6 : i32
    %142 = arith.addi %141, %c6_i32 : i32
    %c10_i32_49 = arith.constant 10 : i32
    %143 = arith.cmpi slt, %142, %c10_i32_49 : i32
    %144 = arith.extui %143 : i1 to i32
    %145 = arith.sitofp %144 : i32 to f32
    %146 = vector.broadcast %145 : f32 to vector<1x128xf32>
    %147 = arith.mulf %9, %146 : vector<1x128xf32>
    %c6 = arith.constant 6 : index
    %c0_50 = arith.constant 0 : index
    %c0_51 = arith.constant 0 : index
    %148 = vector.load %arg2[%c6, %c0_50, %c0_51] : memref<8x2x128xbf16, #tpu.memory_space<vmem>>, vector<1x2x128xbf16>
    %149 = vector.shape_cast %148 : vector<1x2x128xbf16> to vector<2x128xbf16>
    %150 = arith.extf %149 : vector<2x128xbf16> to vector<2x128xf32>
    %151 = vector.broadcast %147 : vector<1x128xf32> to vector<2x128xf32>
    %152 = arith.addf %150, %151 : vector<2x128xf32>
    %153 = arith.truncf %91 : vector<2x32xf32> to vector<2x32xbf16>
    %cst_52 = arith.constant dense<0.000000e+00> : vector<2x128xf32>
    %154 = tpu.matmul %153, %6, %cst_52 {dimension_numbers = #tpu.dot_dimension_numbers<[1], [0], [0], [1], [0, 0, 1, 1], [], []>} : vector<2x32xbf16>, vector<32x128xbf16>, vector<2x128xf32> -> vector<2x128xf32>
    %155 = arith.addf %152, %154 : vector<2x128xf32>
    %156 = vector.extract_strided_slice %155 {offsets = [0, 0], sizes = [2, 32], strides = [1, 1]} : vector<2x128xf32> to vector<2x32xf32>
    %157 = arith.negf %156 : vector<2x32xf32>
    %158 = math.exp %157 : vector<2x32xf32>
    %cst_53 = arith.constant 1.000000e+00 : f32
    %159 = vector.broadcast %cst_53 : f32 to vector<2x32xf32>
    %160 = arith.addf %159, %158 : vector<2x32xf32>
    %161 = arith.divf %159, %160 : vector<2x32xf32>
    %162 = vector.extract_strided_slice %155 {offsets = [0, 32], sizes = [2, 32], strides = [1, 1]} : vector<2x128xf32> to vector<2x32xf32>
    %163 = arith.negf %162 : vector<2x32xf32>
    %164 = math.exp %163 : vector<2x32xf32>
    %cst_54 = arith.constant 1.000000e+00 : f32
    %165 = vector.broadcast %cst_54 : f32 to vector<2x32xf32>
    %166 = arith.addf %165, %164 : vector<2x32xf32>
    %167 = arith.divf %165, %166 : vector<2x32xf32>
    %168 = vector.extract_strided_slice %155 {offsets = [0, 64], sizes = [2, 32], strides = [1, 1]} : vector<2x128xf32> to vector<2x32xf32>
    %169 = math.tanh %168 : vector<2x32xf32>
    %170 = vector.extract_strided_slice %155 {offsets = [0, 96], sizes = [2, 32], strides = [1, 1]} : vector<2x128xf32> to vector<2x32xf32>
    %171 = arith.negf %170 : vector<2x32xf32>
    %172 = math.exp %171 : vector<2x32xf32>
    %cst_55 = arith.constant 1.000000e+00 : f32
    %173 = vector.broadcast %cst_55 : f32 to vector<2x32xf32>
    %174 = arith.addf %173, %172 : vector<2x32xf32>
    %175 = arith.divf %173, %174 : vector<2x32xf32>
    %176 = arith.mulf %167, %89 : vector<2x32xf32>
    %177 = arith.mulf %161, %169 : vector<2x32xf32>
    %178 = arith.addf %176, %177 : vector<2x32xf32>
    %179 = math.tanh %178 : vector<2x32xf32>
    %180 = arith.mulf %175, %179 : vector<2x32xf32>
    %c8_i32_56 = arith.constant 8 : i32
    %181 = arith.muli %arg0, %c8_i32_56 : i32
    %c1_i32_57 = arith.constant 1 : i32
    %182 = arith.addi %181, %c1_i32_57 : i32
    %c10_i32_58 = arith.constant 10 : i32
    %183 = arith.cmpi slt, %182, %c10_i32_58 : i32
    %184 = arith.extui %183 : i1 to i32
    %185 = arith.sitofp %184 : i32 to f32
    %186 = vector.broadcast %185 : f32 to vector<2x32xf32>
    %187 = arith.mulf %139, %186 : vector<2x32xf32>
    %188 = arith.truncf %187 : vector<2x32xf32> to vector<2x32xbf16>
    %c1_59 = arith.constant 1 : index
    %c0_60 = arith.constant 0 : index
    %c0_61 = arith.constant 0 : index
    %189 = vector.load %arg5[%c1_59, %c0_60, %c0_61] : memref<8x2x32xbf16, #tpu.memory_space<vmem>>, vector<1x2x32xbf16>
    %190 = vector.shape_cast %189 : vector<1x2x32xbf16> to vector<2x32xbf16>
    %191 = vector.shape_cast %188 : vector<2x32xbf16> to vector<1x2x32xbf16>
    tpu.vector_store %arg5[%c1_59, %c0_60, %c0_61], %191 {strides = array<i32>} : memref<8x2x32xbf16, #tpu.memory_space<vmem>>, vector<1x2x32xbf16>,
    %192 = arith.truncf %180 : vector<2x32xf32> to vector<2x32xbf16>
    %c6_62 = arith.constant 6 : index
    %c0_63 = arith.constant 0 : index
    %c0_64 = arith.constant 0 : index
    %193 = vector.load %arg6[%c6_62, %c0_63, %c0_64] : memref<8x2x32xbf16, #tpu.memory_space<vmem>>, vector<1x2x32xbf16>
    %194 = vector.shape_cast %193 : vector<1x2x32xbf16> to vector<2x32xbf16>
    %195 = vector.shape_cast %192 : vector<2x32xbf16> to vector<1x2x32xbf16>
    tpu.vector_store %arg6[%c6_62, %c0_63, %c0_64], %195 {strides = array<i32>} : memref<8x2x32xbf16, #tpu.memory_space<vmem>>, vector<1x2x32xbf16>,
    %c2 = arith.constant 2 : index
    %c0_65 = arith.constant 0 : index
    %c0_66 = arith.constant 0 : index
    %196 = vector.load %arg1[%c2, %c0_65, %c0_66] : memref<8x2x128xbf16, #tpu.memory_space<vmem>>, vector<1x2x128xbf16>
    %197 = vector.shape_cast %196 : vector<1x2x128xbf16> to vector<2x128xbf16>
    %198 = arith.extf %197 : vector<2x128xbf16> to vector<2x128xf32>
    %199 = vector.broadcast %8 : vector<1x128xf32> to vector<2x128xf32>
    %200 = arith.addf %198, %199 : vector<2x128xf32>
    %201 = arith.truncf %139 : vector<2x32xf32> to vector<2x32xbf16>
    %cst_67 = arith.constant dense<0.000000e+00> : vector<2x128xf32>
    %202 = tpu.matmul %201, %4, %cst_67 {dimension_numbers = #tpu.dot_dimension_numbers<[1], [0], [0], [1], [0, 0, 1, 1], [], []>} : vector<2x32xbf16>, vector<32x128xbf16>, vector<2x128xf32> -> vector<2x128xf32>
    %203 = arith.addf %200, %202 : vector<2x128xf32>
    %204 = vector.extract_strided_slice %203 {offsets = [0, 0], sizes = [2, 32], strides = [1, 1]} : vector<2x128xf32> to vector<2x32xf32>
    %205 = arith.negf %204 : vector<2x32xf32>
    %206 = math.exp %205 : vector<2x32xf32>
    %cst_68 = arith.constant 1.000000e+00 : f32
    %207 = vector.broadcast %cst_68 : f32 to vector<2x32xf32>
    %208 = arith.addf %207, %206 : vector<2x32xf32>
    %209 = arith.divf %207, %208 : vector<2x32xf32>
    %210 = vector.extract_strided_slice %203 {offsets = [0, 32], sizes = [2, 32], strides = [1, 1]} : vector<2x128xf32> to vector<2x32xf32>
    %211 = arith.negf %210 : vector<2x32xf32>
    %212 = math.exp %211 : vector<2x32xf32>
    %cst_69 = arith.constant 1.000000e+00 : f32
    %213 = vector.broadcast %cst_69 : f32 to vector<2x32xf32>
    %214 = arith.addf %213, %212 : vector<2x32xf32>
    %215 = arith.divf %213, %214 : vector<2x32xf32>
    %216 = vector.extract_strided_slice %203 {offsets = [0, 64], sizes = [2, 32], strides = [1, 1]} : vector<2x128xf32> to vector<2x32xf32>
    %217 = math.tanh %216 : vector<2x32xf32>
    %218 = vector.extract_strided_slice %203 {offsets = [0, 96], sizes = [2, 32], strides = [1, 1]} : vector<2x128xf32> to vector<2x32xf32>
    %219 = arith.negf %218 : vector<2x32xf32>
    %220 = math.exp %219 : vector<2x32xf32>
    %cst_70 = arith.constant 1.000000e+00 : f32
    %221 = vector.broadcast %cst_70 : f32 to vector<2x32xf32>
    %222 = arith.addf %221, %220 : vector<2x32xf32>
    %223 = arith.divf %221, %222 : vector<2x32xf32>
    %224 = arith.mulf %215, %137 : vector<2x32xf32>
    %225 = arith.mulf %209, %217 : vector<2x32xf32>
    %226 = arith.addf %224, %225 : vector<2x32xf32>
    %227 = math.tanh %226 : vector<2x32xf32>
    %228 = arith.mulf %223, %227 : vector<2x32xf32>
    %c1_i32_71 = arith.constant 1 : i32
    %229 = arith.subi %c1_i32_71, %arg0 : i32
    %c8_i32_72 = arith.constant 8 : i32
    %230 = arith.muli %229, %c8_i32_72 : i32
    %c5_i32 = arith.constant 5 : i32
    %231 = arith.addi %230, %c5_i32 : i32
    %c10_i32_73 = arith.constant 10 : i32
    %232 = arith.cmpi slt, %231, %c10_i32_73 : i32
    %233 = arith.extui %232 : i1 to i32
    %234 = arith.sitofp %233 : i32 to f32
    %235 = vector.broadcast %234 : f32 to vector<1x128xf32>
    %236 = arith.mulf %9, %235 : vector<1x128xf32>
    %c5 = arith.constant 5 : index
    %c0_74 = arith.constant 0 : index
    %c0_75 = arith.constant 0 : index
    %237 = vector.load %arg2[%c5, %c0_74, %c0_75] : memref<8x2x128xbf16, #tpu.memory_space<vmem>>, vector<1x2x128xbf16>
    %238 = vector.shape_cast %237 : vector<1x2x128xbf16> to vector<2x128xbf16>
    %239 = arith.extf %238 : vector<2x128xbf16> to vector<2x128xf32>
    %240 = vector.broadcast %236 : vector<1x128xf32> to vector<2x128xf32>
    %241 = arith.addf %239, %240 : vector<2x128xf32>
    %242 = arith.truncf %180 : vector<2x32xf32> to vector<2x32xbf16>
    %cst_76 = arith.constant dense<0.000000e+00> : vector<2x128xf32>
    %243 = tpu.matmul %242, %6, %cst_76 {dimension_numbers = #tpu.dot_dimension_numbers<[1], [0], [0], [1], [0, 0, 1, 1], [], []>} : vector<2x32xbf16>, vector<32x128xbf16>, vector<2x128xf32> -> vector<2x128xf32>
    %244 = arith.addf %241, %243 : vector<2x128xf32>
    %245 = vector.extract_strided_slice %244 {offsets = [0, 0], sizes = [2, 32], strides = [1, 1]} : vector<2x128xf32> to vector<2x32xf32>
    %246 = arith.negf %245 : vector<2x32xf32>
    %247 = math.exp %246 : vector<2x32xf32>
    %cst_77 = arith.constant 1.000000e+00 : f32
    %248 = vector.broadcast %cst_77 : f32 to vector<2x32xf32>
    %249 = arith.addf %248, %247 : vector<2x32xf32>
    %250 = arith.divf %248, %249 : vector<2x32xf32>
    %251 = vector.extract_strided_slice %244 {offsets = [0, 32], sizes = [2, 32], strides = [1, 1]} : vector<2x128xf32> to vector<2x32xf32>
    %252 = arith.negf %251 : vector<2x32xf32>
    %253 = math.exp %252 : vector<2x32xf32>
    %cst_78 = arith.constant 1.000000e+00 : f32
    %254 = vector.broadcast %cst_78 : f32 to vector<2x32xf32>
    %255 = arith.addf %254, %253 : vector<2x32xf32>
    %256 = arith.divf %254, %255 : vector<2x32xf32>
    %257 = vector.extract_strided_slice %244 {offsets = [0, 64], sizes = [2, 32], strides = [1, 1]} : vector<2x128xf32> to vector<2x32xf32>
    %258 = math.tanh %257 : vector<2x32xf32>
    %259 = vector.extract_strided_slice %244 {offsets = [0, 96], sizes = [2, 32], strides = [1, 1]} : vector<2x128xf32> to vector<2x32xf32>
    %260 = arith.negf %259 : vector<2x32xf32>
    %261 = math.exp %260 : vector<2x32xf32>
    %cst_79 = arith.constant 1.000000e+00 : f32
    %262 = vector.broadcast %cst_79 : f32 to vector<2x32xf32>
    %263 = arith.addf %262, %261 : vector<2x32xf32>
    %264 = arith.divf %262, %263 : vector<2x32xf32>
    %265 = arith.mulf %256, %178 : vector<2x32xf32>
    %266 = arith.mulf %250, %258 : vector<2x32xf32>
    %267 = arith.addf %265, %266 : vector<2x32xf32>
    %268 = math.tanh %267 : vector<2x32xf32>
    %269 = arith.mulf %264, %268 : vector<2x32xf32>
    %c8_i32_80 = arith.constant 8 : i32
    %270 = arith.muli %arg0, %c8_i32_80 : i32
    %c2_i32 = arith.constant 2 : i32
    %271 = arith.addi %270, %c2_i32 : i32
    %c10_i32_81 = arith.constant 10 : i32
    %272 = arith.cmpi slt, %271, %c10_i32_81 : i32
    %273 = arith.extui %272 : i1 to i32
    %274 = arith.sitofp %273 : i32 to f32
    %275 = vector.broadcast %274 : f32 to vector<2x32xf32>
    %276 = arith.mulf %228, %275 : vector<2x32xf32>
    %277 = arith.truncf %276 : vector<2x32xf32> to vector<2x32xbf16>
    %c2_82 = arith.constant 2 : index
    %c0_83 = arith.constant 0 : index
    %c0_84 = arith.constant 0 : index
    %278 = vector.load %arg5[%c2_82, %c0_83, %c0_84] : memref<8x2x32xbf16, #tpu.memory_space<vmem>>, vector<1x2x32xbf16>
    %279 = vector.shape_cast %278 : vector<1x2x32xbf16> to vector<2x32xbf16>
    %280 = vector.shape_cast %277 : vector<2x32xbf16> to vector<1x2x32xbf16>
    tpu.vector_store %arg5[%c2_82, %c0_83, %c0_84], %280 {strides = array<i32>} : memref<8x2x32xbf16, #tpu.memory_space<vmem>>, vector<1x2x32xbf16>,
    %281 = arith.truncf %269 : vector<2x32xf32> to vector<2x32xbf16>
    %c5_85 = arith.constant 5 : index
    %c0_86 = arith.constant 0 : index
    %c0_87 = arith.constant 0 : index
    %282 = vector.load %arg6[%c5_85, %c0_86, %c0_87] : memref<8x2x32xbf16, #tpu.memory_space<vmem>>, vector<1x2x32xbf16>
    %283 = vector.shape_cast %282 : vector<1x2x32xbf16> to vector<2x32xbf16>
    %284 = vector.shape_cast %281 : vector<2x32xbf16> to vector<1x2x32xbf16>
    tpu.vector_store %arg6[%c5_85, %c0_86, %c0_87], %284 {strides = array<i32>} : memref<8x2x32xbf16, #tpu.memory_space<vmem>>, vector<1x2x32xbf16>,
    %c3 = arith.constant 3 : index
    %c0_88 = arith.constant 0 : index
    %c0_89 = arith.constant 0 : index
    %285 = vector.load %arg1[%c3, %c0_88, %c0_89] : memref<8x2x128xbf16, #tpu.memory_space<vmem>>, vector<1x2x128xbf16>
    %286 = vector.shape_cast %285 : vector<1x2x128xbf16> to vector<2x128xbf16>
    %287 = arith.extf %286 : vector<2x128xbf16> to vector<2x128xf32>
    %288 = vector.broadcast %8 : vector<1x128xf32> to vector<2x128xf32>
    %289 = arith.addf %287, %288 : vector<2x128xf32>
    %290 = arith.truncf %228 : vector<2x32xf32> to vector<2x32xbf16>
    %cst_90 = arith.constant dense<0.000000e+00> : vector<2x128xf32>
    %291 = tpu.matmul %290, %4, %cst_90 {dimension_numbers = #tpu.dot_dimension_numbers<[1], [0], [0], [1], [0, 0, 1, 1], [], []>} : vector<2x32xbf16>, vector<32x128xbf16>, vector<2x128xf32> -> vector<2x128xf32>
    %292 = arith.addf %289, %291 : vector<2x128xf32>
    %293 = vector.extract_strided_slice %292 {offsets = [0, 0], sizes = [2, 32], strides = [1, 1]} : vector<2x128xf32> to vector<2x32xf32>
    %294 = arith.negf %293 : vector<2x32xf32>
    %295 = math.exp %294 : vector<2x32xf32>
    %cst_91 = arith.constant 1.000000e+00 : f32
    %296 = vector.broadcast %cst_91 : f32 to vector<2x32xf32>
    %297 = arith.addf %296, %295 : vector<2x32xf32>
    %298 = arith.divf %296, %297 : vector<2x32xf32>
    %299 = vector.extract_strided_slice %292 {offsets = [0, 32], sizes = [2, 32], strides = [1, 1]} : vector<2x128xf32> to vector<2x32xf32>
    %300 = arith.negf %299 : vector<2x32xf32>
    %301 = math.exp %300 : vector<2x32xf32>
    %cst_92 = arith.constant 1.000000e+00 : f32
    %302 = vector.broadcast %cst_92 : f32 to vector<2x32xf32>
    %303 = arith.addf %302, %301 : vector<2x32xf32>
    %304 = arith.divf %302, %303 : vector<2x32xf32>
    %305 = vector.extract_strided_slice %292 {offsets = [0, 64], sizes = [2, 32], strides = [1, 1]} : vector<2x128xf32> to vector<2x32xf32>
    %306 = math.tanh %305 : vector<2x32xf32>
    %307 = vector.extract_strided_slice %292 {offsets = [0, 96], sizes = [2, 32], strides = [1, 1]} : vector<2x128xf32> to vector<2x32xf32>
    %308 = arith.negf %307 : vector<2x32xf32>
    %309 = math.exp %308 : vector<2x32xf32>
    %cst_93 = arith.constant 1.000000e+00 : f32
    %310 = vector.broadcast %cst_93 : f32 to vector<2x32xf32>
    %311 = arith.addf %310, %309 : vector<2x32xf32>
    %312 = arith.divf %310, %311 : vector<2x32xf32>
    %313 = arith.mulf %304, %226 : vector<2x32xf32>
    %314 = arith.mulf %298, %306 : vector<2x32xf32>
    %315 = arith.addf %313, %314 : vector<2x32xf32>
    %316 = math.tanh %315 : vector<2x32xf32>
    %317 = arith.mulf %312, %316 : vector<2x32xf32>
    %c1_i32_94 = arith.constant 1 : i32
    %318 = arith.subi %c1_i32_94, %arg0 : i32
    %c8_i32_95 = arith.constant 8 : i32
    %319 = arith.muli %318, %c8_i32_95 : i32
    %c4_i32 = arith.constant 4 : i32
    %320 = arith.addi %319, %c4_i32 : i32
    %c10_i32_96 = arith.constant 10 : i32
    %321 = arith.cmpi slt, %320, %c10_i32_96 : i32
    %322 = arith.extui %321 : i1 to i32
    %323 = arith.sitofp %322 : i32 to f32
    %324 = vector.broadcast %323 : f32 to vector<1x128xf32>
    %325 = arith.mulf %9, %324 : vector<1x128xf32>
    %c4 = arith.constant 4 : index
    %c0_97 = arith.constant 0 : index
    %c0_98 = arith.constant 0 : index
    %326 = vector.load %arg2[%c4, %c0_97, %c0_98] : memref<8x2x128xbf16, #tpu.memory_space<vmem>>, vector<1x2x128xbf16>
    %327 = vector.shape_cast %326 : vector<1x2x128xbf16> to vector<2x128xbf16>
    %328 = arith.extf %327 : vector<2x128xbf16> to vector<2x128xf32>
    %329 = vector.broadcast %325 : vector<1x128xf32> to vector<2x128xf32>
    %330 = arith.addf %328, %329 : vector<2x128xf32>
    %331 = arith.truncf %269 : vector<2x32xf32> to vector<2x32xbf16>
    %cst_99 = arith.constant dense<0.000000e+00> : vector<2x128xf32>
    %332 = tpu.matmul %331, %6, %cst_99 {dimension_numbers = #tpu.dot_dimension_numbers<[1], [0], [0], [1], [0, 0, 1, 1], [], []>} : vector<2x32xbf16>, vector<32x128xbf16>, vector<2x128xf32> -> vector<2x128xf32>
    %333 = arith.addf %330, %332 : vector<2x128xf32>
    %334 = vector.extract_strided_slice %333 {offsets = [0, 0], sizes = [2, 32], strides = [1, 1]} : vector<2x128xf32> to vector<2x32xf32>
    %335 = arith.negf %334 : vector<2x32xf32>
    %336 = math.exp %335 : vector<2x32xf32>
    %cst_100 = arith.constant 1.000000e+00 : f32
    %337 = vector.broadcast %cst_100 : f32 to vector<2x32xf32>
    %338 = arith.addf %337, %336 : vector<2x32xf32>
    %339 = arith.divf %337, %338 : vector<2x32xf32>
    %340 = vector.extract_strided_slice %333 {offsets = [0, 32], sizes = [2, 32], strides = [1, 1]} : vector<2x128xf32> to vector<2x32xf32>
    %341 = arith.negf %340 : vector<2x32xf32>
    %342 = math.exp %341 : vector<2x32xf32>
    %cst_101 = arith.constant 1.000000e+00 : f32
    %343 = vector.broadcast %cst_101 : f32 to vector<2x32xf32>
    %344 = arith.addf %343, %342 : vector<2x32xf32>
    %345 = arith.divf %343, %344 : vector<2x32xf32>
    %346 = vector.extract_strided_slice %333 {offsets = [0, 64], sizes = [2, 32], strides = [1, 1]} : vector<2x128xf32> to vector<2x32xf32>
    %347 = math.tanh %346 : vector<2x32xf32>
    %348 = vector.extract_strided_slice %333 {offsets = [0, 96], sizes = [2, 32], strides = [1, 1]} : vector<2x128xf32> to vector<2x32xf32>
    %349 = arith.negf %348 : vector<2x32xf32>
    %350 = math.exp %349 : vector<2x32xf32>
    %cst_102 = arith.constant 1.000000e+00 : f32
    %351 = vector.broadcast %cst_102 : f32 to vector<2x32xf32>
    %352 = arith.addf %351, %350 : vector<2x32xf32>
    %353 = arith.divf %351, %352 : vector<2x32xf32>
    %354 = arith.mulf %345, %267 : vector<2x32xf32>
    %355 = arith.mulf %339, %347 : vector<2x32xf32>
    %356 = arith.addf %354, %355 : vector<2x32xf32>
    %357 = math.tanh %356 : vector<2x32xf32>
    %358 = arith.mulf %353, %357 : vector<2x32xf32>
    %c8_i32_103 = arith.constant 8 : i32
    %359 = arith.muli %arg0, %c8_i32_103 : i32
    %c3_i32 = arith.constant 3 : i32
    %360 = arith.addi %359, %c3_i32 : i32
    %c10_i32_104 = arith.constant 10 : i32
    %361 = arith.cmpi slt, %360, %c10_i32_104 : i32
    %362 = arith.extui %361 : i1 to i32
    %363 = arith.sitofp %362 : i32 to f32
    %364 = vector.broadcast %363 : f32 to vector<2x32xf32>
    %365 = arith.mulf %317, %364 : vector<2x32xf32>
    %366 = arith.truncf %365 : vector<2x32xf32> to vector<2x32xbf16>
    %c3_105 = arith.constant 3 : index
    %c0_106 = arith.constant 0 : index
    %c0_107 = arith.constant 0 : index
    %367 = vector.load %arg5[%c3_105, %c0_106, %c0_107] : memref<8x2x32xbf16, #tpu.memory_space<vmem>>, vector<1x2x32xbf16>
    %368 = vector.shape_cast %367 : vector<1x2x32xbf16> to vector<2x32xbf16>
    %369 = vector.shape_cast %366 : vector<2x32xbf16> to vector<1x2x32xbf16>
    tpu.vector_store %arg5[%c3_105, %c0_106, %c0_107], %369 {strides = array<i32>} : memref<8x2x32xbf16, #tpu.memory_space<vmem>>, vector<1x2x32xbf16>,
    %370 = arith.truncf %358 : vector<2x32xf32> to vector<2x32xbf16>
    %c4_108 = arith.constant 4 : index
    %c0_109 = arith.constant 0 : index
    %c0_110 = arith.constant 0 : index
    %371 = vector.load %arg6[%c4_108, %c0_109, %c0_110] : memref<8x2x32xbf16, #tpu.memory_space<vmem>>, vector<1x2x32xbf16>
    %372 = vector.shape_cast %371 : vector<1x2x32xbf16> to vector<2x32xbf16>
    %373 = vector.shape_cast %370 : vector<2x32xbf16> to vector<1x2x32xbf16>
    tpu.vector_store %arg6[%c4_108, %c0_109, %c0_110], %373 {strides = array<i32>} : memref<8x2x32xbf16, #tpu.memory_space<vmem>>, vector<1x2x32xbf16>,
    %c4_111 = arith.constant 4 : index
    %c0_112 = arith.constant 0 : index
    %c0_113 = arith.constant 0 : index
    %374 = vector.load %arg1[%c4_111, %c0_112, %c0_113] : memref<8x2x128xbf16, #tpu.memory_space<vmem>>, vector<1x2x128xbf16>
    %375 = vector.shape_cast %374 : vector<1x2x128xbf16> to vector<2x128xbf16>
    %376 = arith.extf %375 : vector<2x128xbf16> to vector<2x128xf32>
    %377 = vector.broadcast %8 : vector<1x128xf32> to vector<2x128xf32>
    %378 = arith.addf %376, %377 : vector<2x128xf32>
    %379 = arith.truncf %317 : vector<2x32xf32> to vector<2x32xbf16>
    %cst_114 = arith.constant dense<0.000000e+00> : vector<2x128xf32>
    %380 = tpu.matmul %379, %4, %cst_114 {dimension_numbers = #tpu.dot_dimension_numbers<[1], [0], [0], [1], [0, 0, 1, 1], [], []>} : vector<2x32xbf16>, vector<32x128xbf16>, vector<2x128xf32> -> vector<2x128xf32>
    %381 = arith.addf %378, %380 : vector<2x128xf32>
    %382 = vector.extract_strided_slice %381 {offsets = [0, 0], sizes = [2, 32], strides = [1, 1]} : vector<2x128xf32> to vector<2x32xf32>
    %383 = arith.negf %382 : vector<2x32xf32>
    %384 = math.exp %383 : vector<2x32xf32>
    %cst_115 = arith.constant 1.000000e+00 : f32
    %385 = vector.broadcast %cst_115 : f32 to vector<2x32xf32>
    %386 = arith.addf %385, %384 : vector<2x32xf32>
    %387 = arith.divf %385, %386 : vector<2x32xf32>
    %388 = vector.extract_strided_slice %381 {offsets = [0, 32], sizes = [2, 32], strides = [1, 1]} : vector<2x128xf32> to vector<2x32xf32>
    %389 = arith.negf %388 : vector<2x32xf32>
    %390 = math.exp %389 : vector<2x32xf32>
    %cst_116 = arith.constant 1.000000e+00 : f32
    %391 = vector.broadcast %cst_116 : f32 to vector<2x32xf32>
    %392 = arith.addf %391, %390 : vector<2x32xf32>
    %393 = arith.divf %391, %392 : vector<2x32xf32>
    %394 = vector.extract_strided_slice %381 {offsets = [0, 64], sizes = [2, 32], strides = [1, 1]} : vector<2x128xf32> to vector<2x32xf32>
    %395 = math.tanh %394 : vector<2x32xf32>
    %396 = vector.extract_strided_slice %381 {offsets = [0, 96], sizes = [2, 32], strides = [1, 1]} : vector<2x128xf32> to vector<2x32xf32>
    %397 = arith.negf %396 : vector<2x32xf32>
    %398 = math.exp %397 : vector<2x32xf32>
    %cst_117 = arith.constant 1.000000e+00 : f32
    %399 = vector.broadcast %cst_117 : f32 to vector<2x32xf32>
    %400 = arith.addf %399, %398 : vector<2x32xf32>
    %401 = arith.divf %399, %400 : vector<2x32xf32>
    %402 = arith.mulf %393, %315 : vector<2x32xf32>
    %403 = arith.mulf %387, %395 : vector<2x32xf32>
    %404 = arith.addf %402, %403 : vector<2x32xf32>
    %405 = math.tanh %404 : vector<2x32xf32>
    %406 = arith.mulf %401, %405 : vector<2x32xf32>
    %c1_i32_118 = arith.constant 1 : i32
    %407 = arith.subi %c1_i32_118, %arg0 : i32
    %c8_i32_119 = arith.constant 8 : i32
    %408 = arith.muli %407, %c8_i32_119 : i32
    %c3_i32_120 = arith.constant 3 : i32
    %409 = arith.addi %408, %c3_i32_120 : i32
    %c10_i32_121 = arith.constant 10 : i32
    %410 = arith.cmpi slt, %409, %c10_i32_121 : i32
    %411 = arith.extui %410 : i1 to i32
    %412 = arith.sitofp %411 : i32 to f32
    %413 = vector.broadcast %412 : f32 to vector<1x128xf32>
    %414 = arith.mulf %9, %413 : vector<1x128xf32>
    %c3_122 = arith.constant 3 : index
    %c0_123 = arith.constant 0 : index
    %c0_124 = arith.constant 0 : index
    %415 = vector.load %arg2[%c3_122, %c0_123, %c0_124] : memref<8x2x128xbf16, #tpu.memory_space<vmem>>, vector<1x2x128xbf16>
    %416 = vector.shape_cast %415 : vector<1x2x128xbf16> to vector<2x128xbf16>
    %417 = arith.extf %416 : vector<2x128xbf16> to vector<2x128xf32>
    %418 = vector.broadcast %414 : vector<1x128xf32> to vector<2x128xf32>
    %419 = arith.addf %417, %418 : vector<2x128xf32>
    %420 = arith.truncf %358 : vector<2x32xf32> to vector<2x32xbf16>
    %cst_125 = arith.constant dense<0.000000e+00> : vector<2x128xf32>
    %421 = tpu.matmul %420, %6, %cst_125 {dimension_numbers = #tpu.dot_dimension_numbers<[1], [0], [0], [1], [0, 0, 1, 1], [], []>} : vector<2x32xbf16>, vector<32x128xbf16>, vector<2x128xf32> -> vector<2x128xf32>
    %422 = arith.addf %419, %421 : vector<2x128xf32>
    %423 = vector.extract_strided_slice %422 {offsets = [0, 0], sizes = [2, 32], strides = [1, 1]} : vector<2x128xf32> to vector<2x32xf32>
    %424 = arith.negf %423 : vector<2x32xf32>
    %425 = math.exp %424 : vector<2x32xf32>
    %cst_126 = arith.constant 1.000000e+00 : f32
    %426 = vector.broadcast %cst_126 : f32 to vector<2x32xf32>
    %427 = arith.addf %426, %425 : vector<2x32xf32>
    %428 = arith.divf %426, %427 : vector<2x32xf32>
    %429 = vector.extract_strided_slice %422 {offsets = [0, 32], sizes = [2, 32], strides = [1, 1]} : vector<2x128xf32> to vector<2x32xf32>
    %430 = arith.negf %429 : vector<2x32xf32>
    %431 = math.exp %430 : vector<2x32xf32>
    %cst_127 = arith.constant 1.000000e+00 : f32
    %432 = vector.broadcast %cst_127 : f32 to vector<2x32xf32>
    %433 = arith.addf %432, %431 : vector<2x32xf32>
    %434 = arith.divf %432, %433 : vector<2x32xf32>
    %435 = vector.extract_strided_slice %422 {offsets = [0, 64], sizes = [2, 32], strides = [1, 1]} : vector<2x128xf32> to vector<2x32xf32>
    %436 = math.tanh %435 : vector<2x32xf32>
    %437 = vector.extract_strided_slice %422 {offsets = [0, 96], sizes = [2, 32], strides = [1, 1]} : vector<2x128xf32> to vector<2x32xf32>
    %438 = arith.negf %437 : vector<2x32xf32>
    %439 = math.exp %438 : vector<2x32xf32>
    %cst_128 = arith.constant 1.000000e+00 : f32
    %440 = vector.broadcast %cst_128 : f32 to vector<2x32xf32>
    %441 = arith.addf %440, %439 : vector<2x32xf32>
    %442 = arith.divf %440, %441 : vector<2x32xf32>
    %443 = arith.mulf %434, %356 : vector<2x32xf32>
    %444 = arith.mulf %428, %436 : vector<2x32xf32>
    %445 = arith.addf %443, %444 : vector<2x32xf32>
    %446 = math.tanh %445 : vector<2x32xf32>
    %447 = arith.mulf %442, %446 : vector<2x32xf32>
    %c8_i32_129 = arith.constant 8 : i32
    %448 = arith.muli %arg0, %c8_i32_129 : i32
    %c4_i32_130 = arith.constant 4 : i32
    %449 = arith.addi %448, %c4_i32_130 : i32
    %c10_i32_131 = arith.constant 10 : i32
    %450 = arith.cmpi slt, %449, %c10_i32_131 : i32
    %451 = arith.extui %450 : i1 to i32
    %452 = arith.sitofp %451 : i32 to f32
    %453 = vector.broadcast %452 : f32 to vector<2x32xf32>
    %454 = arith.mulf %406, %453 : vector<2x32xf32>
    %455 = arith.truncf %454 : vector<2x32xf32> to vector<2x32xbf16>
    %c4_132 = arith.constant 4 : index
    %c0_133 = arith.constant 0 : index
    %c0_134 = arith.constant 0 : index
    %456 = vector.load %arg5[%c4_132, %c0_133, %c0_134] : memref<8x2x32xbf16, #tpu.memory_space<vmem>>, vector<1x2x32xbf16>
    %457 = vector.shape_cast %456 : vector<1x2x32xbf16> to vector<2x32xbf16>
    %458 = vector.shape_cast %455 : vector<2x32xbf16> to vector<1x2x32xbf16>
    tpu.vector_store %arg5[%c4_132, %c0_133, %c0_134], %458 {strides = array<i32>} : memref<8x2x32xbf16, #tpu.memory_space<vmem>>, vector<1x2x32xbf16>,
    %459 = arith.truncf %447 : vector<2x32xf32> to vector<2x32xbf16>
    %c3_135 = arith.constant 3 : index
    %c0_136 = arith.constant 0 : index
    %c0_137 = arith.constant 0 : index
    %460 = vector.load %arg6[%c3_135, %c0_136, %c0_137] : memref<8x2x32xbf16, #tpu.memory_space<vmem>>, vector<1x2x32xbf16>
    %461 = vector.shape_cast %460 : vector<1x2x32xbf16> to vector<2x32xbf16>
    %462 = vector.shape_cast %459 : vector<2x32xbf16> to vector<1x2x32xbf16>
    tpu.vector_store %arg6[%c3_135, %c0_136, %c0_137], %462 {strides = array<i32>} : memref<8x2x32xbf16, #tpu.memory_space<vmem>>, vector<1x2x32xbf16>,
    %c5_138 = arith.constant 5 : index
    %c0_139 = arith.constant 0 : index
    %c0_140 = arith.constant 0 : index
    %463 = vector.load %arg1[%c5_138, %c0_139, %c0_140] : memref<8x2x128xbf16, #tpu.memory_space<vmem>>, vector<1x2x128xbf16>
    %464 = vector.shape_cast %463 : vector<1x2x128xbf16> to vector<2x128xbf16>
    %465 = arith.extf %464 : vector<2x128xbf16> to vector<2x128xf32>
    %466 = vector.broadcast %8 : vector<1x128xf32> to vector<2x128xf32>
    %467 = arith.addf %465, %466 : vector<2x128xf32>
    %468 = arith.truncf %406 : vector<2x32xf32> to vector<2x32xbf16>
    %cst_141 = arith.constant dense<0.000000e+00> : vector<2x128xf32>
    %469 = tpu.matmul %468, %4, %cst_141 {dimension_numbers = #tpu.dot_dimension_numbers<[1], [0], [0], [1], [0, 0, 1, 1], [], []>} : vector<2x32xbf16>, vector<32x128xbf16>, vector<2x128xf32> -> vector<2x128xf32>
    %470 = arith.addf %467, %469 : vector<2x128xf32>
    %471 = vector.extract_strided_slice %470 {offsets = [0, 0], sizes = [2, 32], strides = [1, 1]} : vector<2x128xf32> to vector<2x32xf32>
    %472 = arith.negf %471 : vector<2x32xf32>
    %473 = math.exp %472 : vector<2x32xf32>
    %cst_142 = arith.constant 1.000000e+00 : f32
    %474 = vector.broadcast %cst_142 : f32 to vector<2x32xf32>
    %475 = arith.addf %474, %473 : vector<2x32xf32>
    %476 = arith.divf %474, %475 : vector<2x32xf32>
    %477 = vector.extract_strided_slice %470 {offsets = [0, 32], sizes = [2, 32], strides = [1, 1]} : vector<2x128xf32> to vector<2x32xf32>
    %478 = arith.negf %477 : vector<2x32xf32>
    %479 = math.exp %478 : vector<2x32xf32>
    %cst_143 = arith.constant 1.000000e+00 : f32
    %480 = vector.broadcast %cst_143 : f32 to vector<2x32xf32>
    %481 = arith.addf %480, %479 : vector<2x32xf32>
    %482 = arith.divf %480, %481 : vector<2x32xf32>
    %483 = vector.extract_strided_slice %470 {offsets = [0, 64], sizes = [2, 32], strides = [1, 1]} : vector<2x128xf32> to vector<2x32xf32>
    %484 = math.tanh %483 : vector<2x32xf32>
    %485 = vector.extract_strided_slice %470 {offsets = [0, 96], sizes = [2, 32], strides = [1, 1]} : vector<2x128xf32> to vector<2x32xf32>
    %486 = arith.negf %485 : vector<2x32xf32>
    %487 = math.exp %486 : vector<2x32xf32>
    %cst_144 = arith.constant 1.000000e+00 : f32
    %488 = vector.broadcast %cst_144 : f32 to vector<2x32xf32>
    %489 = arith.addf %488, %487 : vector<2x32xf32>
    %490 = arith.divf %488, %489 : vector<2x32xf32>
    %491 = arith.mulf %482, %404 : vector<2x32xf32>
    %492 = arith.mulf %476, %484 : vector<2x32xf32>
    %493 = arith.addf %491, %492 : vector<2x32xf32>
    %494 = math.tanh %493 : vector<2x32xf32>
    %495 = arith.mulf %490, %494 : vector<2x32xf32>
    %c1_i32_145 = arith.constant 1 : i32
    %496 = arith.subi %c1_i32_145, %arg0 : i32
    %c8_i32_146 = arith.constant 8 : i32
    %497 = arith.muli %496, %c8_i32_146 : i32
    %c2_i32_147 = arith.constant 2 : i32
    %498 = arith.addi %497, %c2_i32_147 : i32
    %c10_i32_148 = arith.constant 10 : i32
    %499 = arith.cmpi slt, %498, %c10_i32_148 : i32
    %500 = arith.extui %499 : i1 to i32
    %501 = arith.sitofp %500 : i32 to f32
    %502 = vector.broadcast %501 : f32 to vector<1x128xf32>
    %503 = arith.mulf %9, %502 : vector<1x128xf32>
    %c2_149 = arith.constant 2 : index
    %c0_150 = arith.constant 0 : index
    %c0_151 = arith.constant 0 : index
    %504 = vector.load %arg2[%c2_149, %c0_150, %c0_151] : memref<8x2x128xbf16, #tpu.memory_space<vmem>>, vector<1x2x128xbf16>
    %505 = vector.shape_cast %504 : vector<1x2x128xbf16> to vector<2x128xbf16>
    %506 = arith.extf %505 : vector<2x128xbf16> to vector<2x128xf32>
    %507 = vector.broadcast %503 : vector<1x128xf32> to vector<2x128xf32>
    %508 = arith.addf %506, %507 : vector<2x128xf32>
    %509 = arith.truncf %447 : vector<2x32xf32> to vector<2x32xbf16>
    %cst_152 = arith.constant dense<0.000000e+00> : vector<2x128xf32>
    %510 = tpu.matmul %509, %6, %cst_152 {dimension_numbers = #tpu.dot_dimension_numbers<[1], [0], [0], [1], [0, 0, 1, 1], [], []>} : vector<2x32xbf16>, vector<32x128xbf16>, vector<2x128xf32> -> vector<2x128xf32>
    %511 = arith.addf %508, %510 : vector<2x128xf32>
    %512 = vector.extract_strided_slice %511 {offsets = [0, 0], sizes = [2, 32], strides = [1, 1]} : vector<2x128xf32> to vector<2x32xf32>
    %513 = arith.negf %512 : vector<2x32xf32>
    %514 = math.exp %513 : vector<2x32xf32>
    %cst_153 = arith.constant 1.000000e+00 : f32
    %515 = vector.broadcast %cst_153 : f32 to vector<2x32xf32>
    %516 = arith.addf %515, %514 : vector<2x32xf32>
    %517 = arith.divf %515, %516 : vector<2x32xf32>
    %518 = vector.extract_strided_slice %511 {offsets = [0, 32], sizes = [2, 32], strides = [1, 1]} : vector<2x128xf32> to vector<2x32xf32>
    %519 = arith.negf %518 : vector<2x32xf32>
    %520 = math.exp %519 : vector<2x32xf32>
    %cst_154 = arith.constant 1.000000e+00 : f32
    %521 = vector.broadcast %cst_154 : f32 to vector<2x32xf32>
    %522 = arith.addf %521, %520 : vector<2x32xf32>
    %523 = arith.divf %521, %522 : vector<2x32xf32>
    %524 = vector.extract_strided_slice %511 {offsets = [0, 64], sizes = [2, 32], strides = [1, 1]} : vector<2x128xf32> to vector<2x32xf32>
    %525 = math.tanh %524 : vector<2x32xf32>
    %526 = vector.extract_strided_slice %511 {offsets = [0, 96], sizes = [2, 32], strides = [1, 1]} : vector<2x128xf32> to vector<2x32xf32>
    %527 = arith.negf %526 : vector<2x32xf32>
    %528 = math.exp %527 : vector<2x32xf32>
    %cst_155 = arith.constant 1.000000e+00 : f32
    %529 = vector.broadcast %cst_155 : f32 to vector<2x32xf32>
    %530 = arith.addf %529, %528 : vector<2x32xf32>
    %531 = arith.divf %529, %530 : vector<2x32xf32>
    %532 = arith.mulf %523, %445 : vector<2x32xf32>
    %533 = arith.mulf %517, %525 : vector<2x32xf32>
    %534 = arith.addf %532, %533 : vector<2x32xf32>
    %535 = math.tanh %534 : vector<2x32xf32>
    %536 = arith.mulf %531, %535 : vector<2x32xf32>
    %c8_i32_156 = arith.constant 8 : i32
    %537 = arith.muli %arg0, %c8_i32_156 : i32
    %c5_i32_157 = arith.constant 5 : i32
    %538 = arith.addi %537, %c5_i32_157 : i32
    %c10_i32_158 = arith.constant 10 : i32
    %539 = arith.cmpi slt, %538, %c10_i32_158 : i32
    %540 = arith.extui %539 : i1 to i32
    %541 = arith.sitofp %540 : i32 to f32
    %542 = vector.broadcast %541 : f32 to vector<2x32xf32>
    %543 = arith.mulf %495, %542 : vector<2x32xf32>
    %544 = arith.truncf %543 : vector<2x32xf32> to vector<2x32xbf16>
    %c5_159 = arith.constant 5 : index
    %c0_160 = arith.constant 0 : index
    %c0_161 = arith.constant 0 : index
    %545 = vector.load %arg5[%c5_159, %c0_160, %c0_161] : memref<8x2x32xbf16, #tpu.memory_space<vmem>>, vector<1x2x32xbf16>
    %546 = vector.shape_cast %545 : vector<1x2x32xbf16> to vector<2x32xbf16>
    %547 = vector.shape_cast %544 : vector<2x32xbf16> to vector<1x2x32xbf16>
    tpu.vector_store %arg5[%c5_159, %c0_160, %c0_161], %547 {strides = array<i32>} : memref<8x2x32xbf16, #tpu.memory_space<vmem>>, vector<1x2x32xbf16>,
    %548 = arith.truncf %536 : vector<2x32xf32> to vector<2x32xbf16>
    %c2_162 = arith.constant 2 : index
    %c0_163 = arith.constant 0 : index
    %c0_164 = arith.constant 0 : index
    %549 = vector.load %arg6[%c2_162, %c0_163, %c0_164] : memref<8x2x32xbf16, #tpu.memory_space<vmem>>, vector<1x2x32xbf16>
    %550 = vector.shape_cast %549 : vector<1x2x32xbf16> to vector<2x32xbf16>
    %551 = vector.shape_cast %548 : vector<2x32xbf16> to vector<1x2x32xbf16>
    tpu.vector_store %arg6[%c2_162, %c0_163, %c0_164], %551 {strides = array<i32>} : memref<8x2x32xbf16, #tpu.memory_space<vmem>>, vector<1x2x32xbf16>,
    %c6_165 = arith.constant 6 : index
    %c0_166 = arith.constant 0 : index
    %c0_167 = arith.constant 0 : index
    %552 = vector.load %arg1[%c6_165, %c0_166, %c0_167] : memref<8x2x128xbf16, #tpu.memory_space<vmem>>, vector<1x2x128xbf16>
    %553 = vector.shape_cast %552 : vector<1x2x128xbf16> to vector<2x128xbf16>
    %554 = arith.extf %553 : vector<2x128xbf16> to vector<2x128xf32>
    %555 = vector.broadcast %8 : vector<1x128xf32> to vector<2x128xf32>
    %556 = arith.addf %554, %555 : vector<2x128xf32>
    %557 = arith.truncf %495 : vector<2x32xf32> to vector<2x32xbf16>
    %cst_168 = arith.constant dense<0.000000e+00> : vector<2x128xf32>
    %558 = tpu.matmul %557, %4, %cst_168 {dimension_numbers = #tpu.dot_dimension_numbers<[1], [0], [0], [1], [0, 0, 1, 1], [], []>} : vector<2x32xbf16>, vector<32x128xbf16>, vector<2x128xf32> -> vector<2x128xf32>
    %559 = arith.addf %556, %558 : vector<2x128xf32>
    %560 = vector.extract_strided_slice %559 {offsets = [0, 0], sizes = [2, 32], strides = [1, 1]} : vector<2x128xf32> to vector<2x32xf32>
    %561 = arith.negf %560 : vector<2x32xf32>
    %562 = math.exp %561 : vector<2x32xf32>
    %cst_169 = arith.constant 1.000000e+00 : f32
    %563 = vector.broadcast %cst_169 : f32 to vector<2x32xf32>
    %564 = arith.addf %563, %562 : vector<2x32xf32>
    %565 = arith.divf %563, %564 : vector<2x32xf32>
    %566 = vector.extract_strided_slice %559 {offsets = [0, 32], sizes = [2, 32], strides = [1, 1]} : vector<2x128xf32> to vector<2x32xf32>
    %567 = arith.negf %566 : vector<2x32xf32>
    %568 = math.exp %567 : vector<2x32xf32>
    %cst_170 = arith.constant 1.000000e+00 : f32
    %569 = vector.broadcast %cst_170 : f32 to vector<2x32xf32>
    %570 = arith.addf %569, %568 : vector<2x32xf32>
    %571 = arith.divf %569, %570 : vector<2x32xf32>
    %572 = vector.extract_strided_slice %559 {offsets = [0, 64], sizes = [2, 32], strides = [1, 1]} : vector<2x128xf32> to vector<2x32xf32>
    %573 = math.tanh %572 : vector<2x32xf32>
    %574 = vector.extract_strided_slice %559 {offsets = [0, 96], sizes = [2, 32], strides = [1, 1]} : vector<2x128xf32> to vector<2x32xf32>
    %575 = arith.negf %574 : vector<2x32xf32>
    %576 = math.exp %575 : vector<2x32xf32>
    %cst_171 = arith.constant 1.000000e+00 : f32
    %577 = vector.broadcast %cst_171 : f32 to vector<2x32xf32>
    %578 = arith.addf %577, %576 : vector<2x32xf32>
    %579 = arith.divf %577, %578 : vector<2x32xf32>
    %580 = arith.mulf %571, %493 : vector<2x32xf32>
    %581 = arith.mulf %565, %573 : vector<2x32xf32>
    %582 = arith.addf %580, %581 : vector<2x32xf32>
    %583 = math.tanh %582 : vector<2x32xf32>
    %584 = arith.mulf %579, %583 : vector<2x32xf32>
    %c1_i32_172 = arith.constant 1 : i32
    %585 = arith.subi %c1_i32_172, %arg0 : i32
    %c8_i32_173 = arith.constant 8 : i32
    %586 = arith.muli %585, %c8_i32_173 : i32
    %c1_i32_174 = arith.constant 1 : i32
    %587 = arith.addi %586, %c1_i32_174 : i32
    %c10_i32_175 = arith.constant 10 : i32
    %588 = arith.cmpi slt, %587, %c10_i32_175 : i32
    %589 = arith.extui %588 : i1 to i32
    %590 = arith.sitofp %589 : i32 to f32
    %591 = vector.broadcast %590 : f32 to vector<1x128xf32>
    %592 = arith.mulf %9, %591 : vector<1x128xf32>
    %c1_176 = arith.constant 1 : index
    %c0_177 = arith.constant 0 : index
    %c0_178 = arith.constant 0 : index
    %593 = vector.load %arg2[%c1_176, %c0_177, %c0_178] : memref<8x2x128xbf16, #tpu.memory_space<vmem>>, vector<1x2x128xbf16>
    %594 = vector.shape_cast %593 : vector<1x2x128xbf16> to vector<2x128xbf16>
    %595 = arith.extf %594 : vector<2x128xbf16> to vector<2x128xf32>
    %596 = vector.broadcast %592 : vector<1x128xf32> to vector<2x128xf32>
    %597 = arith.addf %595, %596 : vector<2x128xf32>
    %598 = arith.truncf %536 : vector<2x32xf32> to vector<2x32xbf16>
    %cst_179 = arith.constant dense<0.000000e+00> : vector<2x128xf32>
    %599 = tpu.matmul %598, %6, %cst_179 {dimension_numbers = #tpu.dot_dimension_numbers<[1], [0], [0], [1], [0, 0, 1, 1], [], []>} : vector<2x32xbf16>, vector<32x128xbf16>, vector<2x128xf32> -> vector<2x128xf32>
    %600 = arith.addf %597, %599 : vector<2x128xf32>
    %601 = vector.extract_strided_slice %600 {offsets = [0, 0], sizes = [2, 32], strides = [1, 1]} : vector<2x128xf32> to vector<2x32xf32>
    %602 = arith.negf %601 : vector<2x32xf32>
    %603 = math.exp %602 : vector<2x32xf32>
    %cst_180 = arith.constant 1.000000e+00 : f32
    %604 = vector.broadcast %cst_180 : f32 to vector<2x32xf32>
    %605 = arith.addf %604, %603 : vector<2x32xf32>
    %606 = arith.divf %604, %605 : vector<2x32xf32>
    %607 = vector.extract_strided_slice %600 {offsets = [0, 32], sizes = [2, 32], strides = [1, 1]} : vector<2x128xf32> to vector<2x32xf32>
    %608 = arith.negf %607 : vector<2x32xf32>
    %609 = math.exp %608 : vector<2x32xf32>
    %cst_181 = arith.constant 1.000000e+00 : f32
    %610 = vector.broadcast %cst_181 : f32 to vector<2x32xf32>
    %611 = arith.addf %610, %609 : vector<2x32xf32>
    %612 = arith.divf %610, %611 : vector<2x32xf32>
    %613 = vector.extract_strided_slice %600 {offsets = [0, 64], sizes = [2, 32], strides = [1, 1]} : vector<2x128xf32> to vector<2x32xf32>
    %614 = math.tanh %613 : vector<2x32xf32>
    %615 = vector.extract_strided_slice %600 {offsets = [0, 96], sizes = [2, 32], strides = [1, 1]} : vector<2x128xf32> to vector<2x32xf32>
    %616 = arith.negf %615 : vector<2x32xf32>
    %617 = math.exp %616 : vector<2x32xf32>
    %cst_182 = arith.constant 1.000000e+00 : f32
    %618 = vector.broadcast %cst_182 : f32 to vector<2x32xf32>
    %619 = arith.addf %618, %617 : vector<2x32xf32>
    %620 = arith.divf %618, %619 : vector<2x32xf32>
    %621 = arith.mulf %612, %534 : vector<2x32xf32>
    %622 = arith.mulf %606, %614 : vector<2x32xf32>
    %623 = arith.addf %621, %622 : vector<2x32xf32>
    %624 = math.tanh %623 : vector<2x32xf32>
    %625 = arith.mulf %620, %624 : vector<2x32xf32>
    %c8_i32_183 = arith.constant 8 : i32
    %626 = arith.muli %arg0, %c8_i32_183 : i32
    %c6_i32_184 = arith.constant 6 : i32
    %627 = arith.addi %626, %c6_i32_184 : i32
    %c10_i32_185 = arith.constant 10 : i32
    %628 = arith.cmpi slt, %627, %c10_i32_185 : i32
    %629 = arith.extui %628 : i1 to i32
    %630 = arith.sitofp %629 : i32 to f32
    %631 = vector.broadcast %630 : f32 to vector<2x32xf32>
    %632 = arith.mulf %584, %631 : vector<2x32xf32>
    %633 = arith.truncf %632 : vector<2x32xf32> to vector<2x32xbf16>
    %c6_186 = arith.constant 6 : index
    %c0_187 = arith.constant 0 : index
    %c0_188 = arith.constant 0 : index
    %634 = vector.load %arg5[%c6_186, %c0_187, %c0_188] : memref<8x2x32xbf16, #tpu.memory_space<vmem>>, vector<1x2x32xbf16>
    %635 = vector.shape_cast %634 : vector<1x2x32xbf16> to vector<2x32xbf16>
    %636 = vector.shape_cast %633 : vector<2x32xbf16> to vector<1x2x32xbf16>
    tpu.vector_store %arg5[%c6_186, %c0_187, %c0_188], %636 {strides = array<i32>} : memref<8x2x32xbf16, #tpu.memory_space<vmem>>, vector<1x2x32xbf16>,
    %637 = arith.truncf %625 : vector<2x32xf32> to vector<2x32xbf16>
    %c1_189 = arith.constant 1 : index
    %c0_190 = arith.constant 0 : index
    %c0_191 = arith.constant 0 : index
    %638 = vector.load %arg6[%c1_189, %c0_190, %c0_191] : memref<8x2x32xbf16, #tpu.memory_space<vmem>>, vector<1x2x32xbf16>
    %639 = vector.shape_cast %638 : vector<1x2x32xbf16> to vector<2x32xbf16>
    %640 = vector.shape_cast %637 : vector<2x32xbf16> to vector<1x2x32xbf16>
    tpu.vector_store %arg6[%c1_189, %c0_190, %c0_191], %640 {strides = array<i32>} : memref<8x2x32xbf16, #tpu.memory_space<vmem>>, vector<1x2x32xbf16>,
    %c7_192 = arith.constant 7 : index
    %c0_193 = arith.constant 0 : index
    %c0_194 = arith.constant 0 : index
    %641 = vector.load %arg1[%c7_192, %c0_193, %c0_194] : memref<8x2x128xbf16, #tpu.memory_space<vmem>>, vector<1x2x128xbf16>
    %642 = vector.shape_cast %641 : vector<1x2x128xbf16> to vector<2x128xbf16>
    %643 = arith.extf %642 : vector<2x128xbf16> to vector<2x128xf32>
    %644 = vector.broadcast %8 : vector<1x128xf32> to vector<2x128xf32>
    %645 = arith.addf %643, %644 : vector<2x128xf32>
    %646 = arith.truncf %584 : vector<2x32xf32> to vector<2x32xbf16>
    %cst_195 = arith.constant dense<0.000000e+00> : vector<2x128xf32>
    %647 = tpu.matmul %646, %4, %cst_195 {dimension_numbers = #tpu.dot_dimension_numbers<[1], [0], [0], [1], [0, 0, 1, 1], [], []>} : vector<2x32xbf16>, vector<32x128xbf16>, vector<2x128xf32> -> vector<2x128xf32>
    %648 = arith.addf %645, %647 : vector<2x128xf32>
    %649 = vector.extract_strided_slice %648 {offsets = [0, 0], sizes = [2, 32], strides = [1, 1]} : vector<2x128xf32> to vector<2x32xf32>
    %650 = arith.negf %649 : vector<2x32xf32>
    %651 = math.exp %650 : vector<2x32xf32>
    %cst_196 = arith.constant 1.000000e+00 : f32
    %652 = vector.broadcast %cst_196 : f32 to vector<2x32xf32>
    %653 = arith.addf %652, %651 : vector<2x32xf32>
    %654 = arith.divf %652, %653 : vector<2x32xf32>
    %655 = vector.extract_strided_slice %648 {offsets = [0, 32], sizes = [2, 32], strides = [1, 1]} : vector<2x128xf32> to vector<2x32xf32>
    %656 = arith.negf %655 : vector<2x32xf32>
    %657 = math.exp %656 : vector<2x32xf32>
    %cst_197 = arith.constant 1.000000e+00 : f32
    %658 = vector.broadcast %cst_197 : f32 to vector<2x32xf32>
    %659 = arith.addf %658, %657 : vector<2x32xf32>
    %660 = arith.divf %658, %659 : vector<2x32xf32>
    %661 = vector.extract_strided_slice %648 {offsets = [0, 64], sizes = [2, 32], strides = [1, 1]} : vector<2x128xf32> to vector<2x32xf32>
    %662 = math.tanh %661 : vector<2x32xf32>
    %663 = vector.extract_strided_slice %648 {offsets = [0, 96], sizes = [2, 32], strides = [1, 1]} : vector<2x128xf32> to vector<2x32xf32>
    %664 = arith.negf %663 : vector<2x32xf32>
    %665 = math.exp %664 : vector<2x32xf32>
    %cst_198 = arith.constant 1.000000e+00 : f32
    %666 = vector.broadcast %cst_198 : f32 to vector<2x32xf32>
    %667 = arith.addf %666, %665 : vector<2x32xf32>
    %668 = arith.divf %666, %667 : vector<2x32xf32>
    %669 = arith.mulf %660, %582 : vector<2x32xf32>
    %670 = arith.mulf %654, %662 : vector<2x32xf32>
    %671 = arith.addf %669, %670 : vector<2x32xf32>
    %672 = math.tanh %671 : vector<2x32xf32>
    %673 = arith.mulf %668, %672 : vector<2x32xf32>
    %c1_i32_199 = arith.constant 1 : i32
    %674 = arith.subi %c1_i32_199, %arg0 : i32
    %c8_i32_200 = arith.constant 8 : i32
    %675 = arith.muli %674, %c8_i32_200 : i32
    %c0_i32_201 = arith.constant 0 : i32
    %676 = arith.addi %675, %c0_i32_201 : i32
    %c10_i32_202 = arith.constant 10 : i32
    %677 = arith.cmpi slt, %676, %c10_i32_202 : i32
    %678 = arith.extui %677 : i1 to i32
    %679 = arith.sitofp %678 : i32 to f32
    %680 = vector.broadcast %679 : f32 to vector<1x128xf32>
    %681 = arith.mulf %9, %680 : vector<1x128xf32>
    %c0_203 = arith.constant 0 : index
    %c0_204 = arith.constant 0 : index
    %c0_205 = arith.constant 0 : index
    %682 = vector.load %arg2[%c0_203, %c0_204, %c0_205] : memref<8x2x128xbf16, #tpu.memory_space<vmem>>, vector<1x2x128xbf16>
    %683 = vector.shape_cast %682 : vector<1x2x128xbf16> to vector<2x128xbf16>
    %684 = arith.extf %683 : vector<2x128xbf16> to vector<2x128xf32>
    %685 = vector.broadcast %681 : vector<1x128xf32> to vector<2x128xf32>
    %686 = arith.addf %684, %685 : vector<2x128xf32>
    %687 = arith.truncf %625 : vector<2x32xf32> to vector<2x32xbf16>
    %cst_206 = arith.constant dense<0.000000e+00> : vector<2x128xf32>
    %688 = tpu.matmul %687, %6, %cst_206 {dimension_numbers = #tpu.dot_dimension_numbers<[1], [0], [0], [1], [0, 0, 1, 1], [], []>} : vector<2x32xbf16>, vector<32x128xbf16>, vector<2x128xf32> -> vector<2x128xf32>
    %689 = arith.addf %686, %688 : vector<2x128xf32>
    %690 = vector.extract_strided_slice %689 {offsets = [0, 0], sizes = [2, 32], strides = [1, 1]} : vector<2x128xf32> to vector<2x32xf32>
    %691 = arith.negf %690 : vector<2x32xf32>
    %692 = math.exp %691 : vector<2x32xf32>
    %cst_207 = arith.constant 1.000000e+00 : f32
    %693 = vector.broadcast %cst_207 : f32 to vector<2x32xf32>
    %694 = arith.addf %693, %692 : vector<2x32xf32>
    %695 = arith.divf %693, %694 : vector<2x32xf32>
    %696 = vector.extract_strided_slice %689 {offsets = [0, 32], sizes = [2, 32], strides = [1, 1]} : vector<2x128xf32> to vector<2x32xf32>
    %697 = arith.negf %696 : vector<2x32xf32>
    %698 = math.exp %697 : vector<2x32xf32>
    %cst_208 = arith.constant 1.000000e+00 : f32
    %699 = vector.broadcast %cst_208 : f32 to vector<2x32xf32>
    %700 = arith.addf %699, %698 : vector<2x32xf32>
    %701 = arith.divf %699, %700 : vector<2x32xf32>
    %702 = vector.extract_strided_slice %689 {offsets = [0, 64], sizes = [2, 32], strides = [1, 1]} : vector<2x128xf32> to vector<2x32xf32>
    %703 = math.tanh %702 : vector<2x32xf32>
    %704 = vector.extract_strided_slice %689 {offsets = [0, 96], sizes = [2, 32], strides = [1, 1]} : vector<2x128xf32> to vector<2x32xf32>
    %705 = arith.negf %704 : vector<2x32xf32>
    %706 = math.exp %705 : vector<2x32xf32>
    %cst_209 = arith.constant 1.000000e+00 : f32
    %707 = vector.broadcast %cst_209 : f32 to vector<2x32xf32>
    %708 = arith.addf %707, %706 : vector<2x32xf32>
    %709 = arith.divf %707, %708 : vector<2x32xf32>
    %710 = arith.mulf %701, %623 : vector<2x32xf32>
    %711 = arith.mulf %695, %703 : vector<2x32xf32>
    %712 = arith.addf %710, %711 : vector<2x32xf32>
    %713 = math.tanh %712 : vector<2x32xf32>
    %714 = arith.mulf %709, %713 : vector<2x32xf32>
    %c8_i32_210 = arith.constant 8 : i32
    %715 = arith.muli %arg0, %c8_i32_210 : i32
    %c7_i32_211 = arith.constant 7 : i32
    %716 = arith.addi %715, %c7_i32_211 : i32
    %c10_i32_212 = arith.constant 10 : i32
    %717 = arith.cmpi slt, %716, %c10_i32_212 : i32
    %718 = arith.extui %717 : i1 to i32
    %719 = arith.sitofp %718 : i32 to f32
    %720 = vector.broadcast %719 : f32 to vector<2x32xf32>
    %721 = arith.mulf %673, %720 : vector<2x32xf32>
    %722 = arith.truncf %721 : vector<2x32xf32> to vector<2x32xbf16>
    %c7_213 = arith.constant 7 : index
    %c0_214 = arith.constant 0 : index
    %c0_215 = arith.constant 0 : index
    %723 = vector.load %arg5[%c7_213, %c0_214, %c0_215] : memref<8x2x32xbf16, #tpu.memory_space<vmem>>, vector<1x2x32xbf16>
    %724 = vector.shape_cast %723 : vector<1x2x32xbf16> to vector<2x32xbf16>
    %725 = vector.shape_cast %722 : vector<2x32xbf16> to vector<1x2x32xbf16>
    tpu.vector_store %arg5[%c7_213, %c0_214, %c0_215], %725 {strides = array<i32>} : memref<8x2x32xbf16, #tpu.memory_space<vmem>>, vector<1x2x32xbf16>,
    %726 = arith.truncf %714 : vector<2x32xf32> to vector<2x32xbf16>
    %c0_216 = arith.constant 0 : index
    %c0_217 = arith.constant 0 : index
    %c0_218 = arith.constant 0 : index
    %727 = vector.load %arg6[%c0_216, %c0_217, %c0_218] : memref<8x2x32xbf16, #tpu.memory_space<vmem>>, vector<1x2x32xbf16>
    %728 = vector.shape_cast %727 : vector<1x2x32xbf16> to vector<2x32xbf16>
    %729 = vector.shape_cast %726 : vector<2x32xbf16> to vector<1x2x32xbf16>
    tpu.vector_store %arg6[%c0_216, %c0_217, %c0_218], %729 {strides = array<i32>} : memref<8x2x32xbf16, #tpu.memory_space<vmem>>, vector<1x2x32xbf16>,
    %c0_219 = arith.constant 0 : index
    %c0_220 = arith.constant 0 : index
    %c0_221 = arith.constant 0 : index
    %730 = vector.load %arg7[%c0_219, %c0_220, %c0_221] : memref<2x2x32xf32, #tpu.memory_space<vmem>>, vector<1x2x32xf32>
    %731 = vector.shape_cast %730 : vector<1x2x32xf32> to vector<2x32xf32>
    %732 = vector.shape_cast %673 : vector<2x32xf32> to vector<1x2x32xf32>
    tpu.vector_store %arg7[%c0_219, %c0_220, %c0_221], %732 {strides = array<i32>} : memref<2x2x32xf32, #tpu.memory_space<vmem>>, vector<1x2x32xf32>,
    %c0_222 = arith.constant 0 : index
    %c0_223 = arith.constant 0 : index
    %c0_224 = arith.constant 0 : index
    %733 = vector.load %arg8[%c0_222, %c0_223, %c0_224] : memref<2x2x32xf32, #tpu.memory_space<vmem>>, vector<1x2x32xf32>
    %734 = vector.shape_cast %733 : vector<1x2x32xf32> to vector<2x32xf32>
    %735 = vector.shape_cast %671 : vector<2x32xf32> to vector<1x2x32xf32>
    tpu.vector_store %arg8[%c0_222, %c0_223, %c0_224], %735 {strides = array<i32>} : memref<2x2x32xf32, #tpu.memory_space<vmem>>, vector<1x2x32xf32>,
    %c1_225 = arith.constant 1 : index
    %c0_226 = arith.constant 0 : index
    %c0_227 = arith.constant 0 : index
    %736 = vector.load %arg7[%c1_225, %c0_226, %c0_227] : memref<2x2x32xf32, #tpu.memory_space<vmem>>, vector<1x2x32xf32>
    %737 = vector.shape_cast %736 : vector<1x2x32xf32> to vector<2x32xf32>
    %738 = vector.shape_cast %714 : vector<2x32xf32> to vector<1x2x32xf32>
    tpu.vector_store %arg7[%c1_225, %c0_226, %c0_227], %738 {strides = array<i32>} : memref<2x2x32xf32, #tpu.memory_space<vmem>>, vector<1x2x32xf32>,
    %c1_228 = arith.constant 1 : index
    %c0_229 = arith.constant 0 : index
    %c0_230 = arith.constant 0 : index
    %739 = vector.load %arg8[%c1_228, %c0_229, %c0_230] : memref<2x2x32xf32, #tpu.memory_space<vmem>>, vector<1x2x32xf32>
    %740 = vector.shape_cast %739 : vector<1x2x32xf32> to vector<2x32xf32>
    %741 = vector.shape_cast %712 : vector<2x32xf32> to vector<1x2x32xf32>
    tpu.vector_store %arg8[%c1_228, %c0_229, %c0_230], %741 {strides = array<i32>} : memref<2x2x32xf32, #tpu.memory_space<vmem>>, vector<1x2x32xf32>,
    return
  }
  func.func @transform_0(%arg0: i32) -> (i32, i32, i32) {
    %c0_i32 = arith.constant 0 : i32
    %c0_i32_0 = arith.constant 0 : i32
    %c0_i32_1 = arith.constant 0 : i32
    return %arg0, %c0_i32, %c0_i32_0 : i32, i32, i32
  }
  func.func @transform_1(%arg0: i32) -> (i32, i32, i32) {
    %c1_i32 = arith.constant 1 : i32
    %0 = arith.subi %c1_i32, %arg0 : i32
    %c0_i32 = arith.constant 0 : i32
    %c1_i32_0 = arith.constant 1 : i32
    %c0_i32_1 = arith.constant 0 : i32
    return %0, %c0_i32, %c1_i32_0 : i32, i32, i32
  }
  func.func @transform_2(%arg0: i32) -> (i32, i32, i32) {
    %c0_i32 = arith.constant 0 : i32
    %c0_i32_0 = arith.constant 0 : i32
    %c0_i32_1 = arith.constant 0 : i32
    %c0_i32_2 = arith.constant 0 : i32
    return %c0_i32, %c0_i32_0, %c0_i32_1 : i32, i32, i32
  }
  func.func @transform_3(%arg0: i32) -> (i32, i32) {
    %c0_i32 = arith.constant 0 : i32
    %c0_i32_0 = arith.constant 0 : i32
    %c0_i32_1 = arith.constant 0 : i32
    return %c0_i32, %c0_i32_0 : i32, i32
  }
  func.func @transform_4(%arg0: i32) -> (i32, i32, i32) {
    %c0_i32 = arith.constant 0 : i32
    %c0_i32_0 = arith.constant 0 : i32
    %c0_i32_1 = arith.constant 0 : i32
    return %arg0, %c0_i32, %c0_i32_0 : i32, i32, i32
  }
  func.func @transform_5(%arg0: i32) -> (i32, i32, i32) {
    %c1_i32 = arith.constant 1 : i32
    %0 = arith.subi %c1_i32, %arg0 : i32
    %c0_i32 = arith.constant 0 : i32
    %c0_i32_0 = arith.constant 0 : i32
    %c0_i32_1 = arith.constant 0 : i32
    return %0, %c0_i32, %c0_i32_0 : i32, i32, i32
  }
}

module attributes {stable_mosaic.version = 11 : i64} {
  func.func @linear2_logsoftmax_kernel(%arg0: i32, %arg1: memref<32x32xbf16, #tpu.memory_space<vmem>>, %arg2: memref<32x32xbf16, #tpu.memory_space<vmem>>, %arg3: memref<32x128xbf16, #tpu.memory_space<vmem>>, %arg4: memref<32x128xbf16, #tpu.memory_space<vmem>>, %arg5: memref<1x128xf32, #tpu.memory_space<vmem>>, %arg6: memref<32x128xf32, #tpu.memory_space<vmem>>) attributes {dimension_semantics = [#tpu.dimension_semantics<parallel>], iteration_bounds = array<i64: 1>, scalar_prefetch = 0 : i64, scratch_operands = 0 : i64, tpu.core_type = #tpu.core_type<tc>, window_params = [{transform_indices = @transform_0, window_bounds = array<i64: 32, 32>}, {transform_indices = @transform_1, window_bounds = array<i64: 32, 32>}, {pipeline_mode = #tpu.pipeline_mode<synchronous>, transform_indices = @transform_2, window_bounds = array<i64: 32, 128>}, {pipeline_mode = #tpu.pipeline_mode<synchronous>, transform_indices = @transform_3, window_bounds = array<i64: 32, 128>}, {pipeline_mode = #tpu.pipeline_mode<synchronous>, transform_indices = @transform_4, window_bounds = array<i64: 1, 128>}, {transform_indices = @transform_5, window_bounds = array<i64: 32, 128>}]} {
    %c0 = arith.constant 0 : index
    %c0_0 = arith.constant 0 : index
    %0 = vector.load %arg1[%c0, %c0_0] : memref<32x32xbf16, #tpu.memory_space<vmem>>, vector<32x32xbf16>
    %c0_1 = arith.constant 0 : index
    %c0_2 = arith.constant 0 : index
    %1 = vector.load %arg3[%c0_1, %c0_2] : memref<32x128xbf16, #tpu.memory_space<vmem>>, vector<32x128xbf16>
    %cst = arith.constant dense<0.000000e+00> : vector<32x128xf32>
    %2 = tpu.matmul %0, %1, %cst {dimension_numbers = #tpu.dot_dimension_numbers<[1], [0], [0], [1], [0, 0, 1, 1], [], []>} : vector<32x32xbf16>, vector<32x128xbf16>, vector<32x128xf32> -> vector<32x128xf32>
    %c0_3 = arith.constant 0 : index
    %c0_4 = arith.constant 0 : index
    %3 = vector.load %arg2[%c0_3, %c0_4] : memref<32x32xbf16, #tpu.memory_space<vmem>>, vector<32x32xbf16>
    %c0_5 = arith.constant 0 : index
    %c0_6 = arith.constant 0 : index
    %4 = vector.load %arg4[%c0_5, %c0_6] : memref<32x128xbf16, #tpu.memory_space<vmem>>, vector<32x128xbf16>
    %cst_7 = arith.constant dense<0.000000e+00> : vector<32x128xf32>
    %5 = tpu.matmul %3, %4, %cst_7 {dimension_numbers = #tpu.dot_dimension_numbers<[1], [0], [0], [1], [0, 0, 1, 1], [], []>} : vector<32x32xbf16>, vector<32x128xbf16>, vector<32x128xf32> -> vector<32x128xf32>
    %6 = arith.addf %2, %5 : vector<32x128xf32>
    %c0_8 = arith.constant 0 : index
    %c0_9 = arith.constant 0 : index
    %7 = vector.load %arg5[%c0_8, %c0_9] : memref<1x128xf32, #tpu.memory_space<vmem>>, vector<1x128xf32>
    %8 = vector.broadcast %7 : vector<1x128xf32> to vector<32x128xf32>
    %9 = arith.addf %6, %8 : vector<32x128xf32>
    %cst_10 = arith.constant dense<0xFF800000> : vector<32xf32>
    %10 = vector.multi_reduction <maximumf>, %9, %cst_10 [1] : vector<32x128xf32> to vector<32xf32>
    %11 = vector.shape_cast %10 : vector<32xf32> to vector<32x1xf32>
    %12 = vector.broadcast %11 : vector<32x1xf32> to vector<32x128xf32>
    %13 = arith.subf %9, %12 : vector<32x128xf32>
    %14 = vector.broadcast %11 : vector<32x1xf32> to vector<32x128xf32>
    %15 = arith.subf %9, %14 : vector<32x128xf32>
    %16 = math.exp %15 : vector<32x128xf32>
    %cst_11 = arith.constant dense<0.000000e+00> : vector<32xf32>
    %17 = vector.multi_reduction <add>, %16, %cst_11 [1] : vector<32x128xf32> to vector<32xf32>
    %18 = vector.shape_cast %17 : vector<32xf32> to vector<32x1xf32>
    %19 = math.log %18 : vector<32x1xf32>
    %20 = vector.broadcast %19 : vector<32x1xf32> to vector<32x128xf32>
    %21 = arith.subf %13, %20 : vector<32x128xf32>
    %c0_12 = arith.constant 0 : index
    %c0_13 = arith.constant 0 : index
    %22 = vector.load %arg6[%c0_12, %c0_13] : memref<32x128xf32, #tpu.memory_space<vmem>>, vector<32x128xf32>
    tpu.vector_store %arg6[%c0_12, %c0_13], %21 {strides = array<i32>} : memref<32x128xf32, #tpu.memory_space<vmem>>, vector<32x128xf32>,
    return
  }
  func.func @transform_0(%arg0: i32) -> (i32, i32) {
    %c0_i32 = arith.constant 0 : i32
    %c0_i32_0 = arith.constant 0 : i32
    return %arg0, %c0_i32 : i32, i32
  }
  func.func @transform_1(%arg0: i32) -> (i32, i32) {
    %c0_i32 = arith.constant 0 : i32
    %c0_i32_0 = arith.constant 0 : i32
    return %arg0, %c0_i32 : i32, i32
  }
  func.func @transform_2(%arg0: i32) -> (i32, i32) {
    %c0_i32 = arith.constant 0 : i32
    %c0_i32_0 = arith.constant 0 : i32
    %c0_i32_1 = arith.constant 0 : i32
    return %c0_i32, %c0_i32_0 : i32, i32
  }
  func.func @transform_3(%arg0: i32) -> (i32, i32) {
    %c0_i32 = arith.constant 0 : i32
    %c0_i32_0 = arith.constant 0 : i32
    %c0_i32_1 = arith.constant 0 : i32
    return %c0_i32, %c0_i32_0 : i32, i32
  }
  func.func @transform_4(%arg0: i32) -> (i32, i32) {
    %c0_i32 = arith.constant 0 : i32
    %c0_i32_0 = arith.constant 0 : i32
    %c0_i32_1 = arith.constant 0 : i32
    return %c0_i32, %c0_i32_0 : i32, i32
  }
  func.func @transform_5(%arg0: i32) -> (i32, i32) {
    %c0_i32 = arith.constant 0 : i32
    %c0_i32_0 = arith.constant 0 : i32
    return %arg0, %c0_i32 : i32, i32
  }
}

</mosaic_0001>

<bundles_post_ra>
// kernel: asr_ctc_forward.9
= control target key start
LH: loop header
LB: loop body
LE: loop exit
PB: predicated region body
PF: predicated region fallthrough
CT: control target
= control target key end

     0   :  { %vm83_vm0 = vcmask 1043456   ;;  %vm84_vm1 = vcmask 1044480   ;;  %v294_v2 = vmov 65535   ;;  %v295_v4 = vmov 0   ;;  %s421_s0 = inlined_call_operand.vmem [shape: bf16[9,384], index: 0, kind: input, shape index: {}]   ;;  %s422_s2 = inlined_call_operand.vmem [shape: f32[32,1], index: 2, kind: input, shape index: {}]   ;;  %s423_s1 = inlined_call_operand.vmem [shape: bf16[32,9], index: 1, kind: input, shape index: {}]   ;;  %s424_s3 = inlined_call_operand.vmem [shape: f32[32,1], index: 3, kind: input, shape index: {}]   ;;  %s425_s4 = inlined_call_operand.vmem [shape: f32[32,1], index: 4, kind: input, shape index: {}]   ;;  %s426_s5 = inlined_call_operand.vmem [shape: bf16[32,384], index: 5, kind: output, shape index: {}]  }
   0x1   :  { %v267_v0 = vld [vmem:[%s421_s0] sm:$0xf]  ;;  %v286_v1 = vld [vmem:[%s421_s0 + $0x8] sm:$0x10]  ;;  %v85_v3 = vsel %vm83_vm0, 4294967295, %v294_v2  ;;  %292 = vset.pattern.permute.xlu1 %v295_v4  ;;  %291 = vset.pattern.permute.xlu0 %v295_v4  ;;  %v31_v5 = vld [vmem:[%s422_s2 + $0x10] sm:$0xff] }
   0x2   :  { %v268_v6 = vor.u32 %v286_v1, %v267_v0  ;;  %v86_v7 = vsel %vm84_vm1, %v85_v3, 0  ;;  %v285_v8 = vld [vmem:[%s421_s0 + $0x4] sm:$0xf]  ;;  %v269_v9 = vld [vmem:[%s421_s0 + $0xc] sm:$0x10]  ;;  %45 = vperm.xlu1 %292, %v31_v5   ;;  %293 = vset.pattern.permute.xlu2 %v295_v4  ;;  %v284_v18 = vld [vmem:[%s423_s1 + $0x8] sm:$0xff] }
   0x3   :  { %v29_v10 = vld [vmem:[%s422_s2] sm:$0xff]  ;;  %v272_v11 = vor.u32 %v285_v8, %v269_v9  ;;  %v275_v12 = vld [vmem:[%s421_s0 + $0x8] sm:$0xf]  ;;  %v287_v13 = vld [vmem:[%s421_s0 + $0x10] sm:$0x10]  ;;  %vm76_vm2 = vcmask 72704  }
   0x4   :  { %35 = vperm.xlu0 %291, %v29_v10   ;;  %v88_v14 = vand.u32 %v268_v6, %v86_v7  ;;  %v276_v15 = vor.u32 %v287_v13, %v275_v12  ;;  %v283_v17 = vld [vmem:[%s423_s1] sm:$0xff]  ;;  %v32_v21 = vld [vmem:[%s422_s2 + $0x18] sm:$0xff]  ;;  %v30_v22 = vld [vmem:[%s422_s2 + $0x8] sm:$0xff] }
   0x5   :  { %v91_v16 = vand.u32 %v272_v11, %v86_v7  ;;  %v165_v19 = vld [vmem:[%s424_s3] sm:$0xff]  ;;  %v166_v23 = vld [vmem:[%s424_s3 + $0x8] sm:$0xff]  ;;  %v168_v24 = vld [vmem:[%s424_s3 + $0x18] sm:$0xff] }
   0x6   :  { %103 = vmatpush.bf16.msra.mxu0 %v88_v14  ;;  %288 = vmatpush.bf16.msra.mxu3 %v88_v14  ;;  %v94_v20 = vand.u32 %v276_v15, %v86_v7  ;;  %v167_v25 = vld [vmem:[%s424_s3 + $0x10] sm:$0xff]  ;;  %v201_v26 = vld [vmem:[%s425_s4] sm:$0xff]  ;;  %v202_v28 = vld [vmem:[%s425_s4 + $0x8] sm:$0xff] }
   0x7   :  { %122 = vmatpush.bf16.msra.mxu1 %v91_v16  ;;  %171 = vperm.xlu2 %293, %v165_v19   ;;  %v203_v27 = vld [vmem:[%s425_s4 + $0x10] sm:$0xff]  ;;  %v204_v29 = vld [vmem:[%s425_s4 + $0x18] sm:$0xff] }
   0x8   :  { %141 = vmatpush.bf16.msra.mxu2 %v94_v20 }
   0x9   :  { %277 = vmatmul.msk.bf16.vlgmr.msra.gmra.mxu0 %vm76_vm2, %v283_v17  ;;  %278 = vmatmul.msk.bf16.vlgmr.msra.gmra.mxu3 %vm76_vm2, %v284_v18 }
   0xa   :  { %279 = vmatmul.msk.bf16.vlgmr.msra.gmra.mxu1 %vm76_vm2, %v283_v17  ;;  %50 = vperm.xlu1 %292, %v32_v21  }
   0xb   :  { %281 = vmatmul.msk.bf16.vlgmr.msra.gmra.mxu2 %vm76_vm2, %v283_v17 }
   0xc   :  { %40 = vperm.xlu0 %291, %v30_v22  }
   0xf   :  { %176 = vperm.xlu2 %293, %v166_v23  }
  0x12   :  { %186 = vperm.xlu1 %292, %v168_v24  }
  0x14   :  { %181 = vperm.xlu0 %291, %v167_v25  }
  0x17   :  { %207 = vperm.xlu2 %293, %v201_v26  }
  0x1a   :  { %280 = vmatmul.msk.bf16.gmra.mxu1 %vm76_vm2, %v284_v18  ;;  %217 = vperm.xlu1 %292, %v203_v27  }
  0x1b   :  { %282 = vmatmul.msk.bf16.gmra.mxu2 %vm76_vm2, %v284_v18 }
  0x1c   :  { %212 = vperm.xlu0 %291, %v202_v28  }
  0x1f   :  { %222 = vperm.xlu2 %293, %v204_v29  }
  0x61   :  { %v172_v31 = vpop.permute.xlu2 %171 }
  0x69   :  { %v177_v34 = vpop.permute.xlu2 %176 }
  0x71   :  { %v208_v45 = vpop.permute.xlu2 %207 }
  0x74   :  { %v46_v32 = vpop.permute.xlu1 %45 }
  0x76   :  { %v36_v30 = vpop.permute.xlu0 %35 }
  0x7c   :  { %v392_v36 = vpop.permute.xlu1 %50 }
  0x7e   :  { %v41_v33 = vpop.permute.xlu0 %40 }
  0x84   :  { %v187_v56 = vpop.permute.xlu1 %186 }
  0x86   :  { %v105_v35 = vpop.f32.mrf.mxu0  ;;  %v182_v42 = vpop.permute.xlu0 %181 }
  0x87   :  { %v106_v37 = vadd.f32 %v105_v35, %v36_v30  ;;  %v124_v38 = vpop.f32.mrf.mxu1  ;;  %v223_v35 = vpop.permute.xlu2 %222 }
  0x88   :  { %v125_v39 = vadd.f32 %v124_v38, %v36_v30 }
  0x89   :  { %v153_v40 = vmax.f32 %v106_v37, 0.0 }
  0x8a   :  { %v154_v41 = vmax.f32 %v125_v39, 0.0 }
  0x8b   :  { %v189_v43 = vmul.f32 %v172_v31, %v153_v40 }
  0x8c   :  { %v190_v44 = vmul.f32 %v172_v31, %v154_v41  ;;  %v110_v47 = vpop.f32.mrf.mxu3  ;;  %v218_v16 = vpop.permute.xlu1 %217 }
  0x8d   :  { %v225_v46 = vadd.f32 %v208_v45, %v189_v43  ;;  %v111_v59 = vadd.f32 %v110_v47, %v46_v32 }
  0x8e   :  { %v226_v48 = vadd.f32 %v208_v45, %v190_v44  ;;  %v143_v49 = vpop.f32.mrf.mxu2  ;;  %v107_v50 = vpop.f32.mrf.mxu0 }
  0x8f   :  { %v144_v51 = vadd.f32 %v143_v49, %v36_v30  ;;  %v108_v52 = vadd.f32 %v107_v50, %v41_v33  ;;  %v126_v53 = vpop.f32.mrf.mxu1  ;;  %v213_v0 = vpop.permute.xlu0 %212  ;;  %v159_v3 = vmax.f32 %v111_v59, 0.0 }
  0x90   :  { %v237_v54 = vpack.c.bf16 %v226_v48, %v225_v46  ;;  %v127_v55 = vadd.f32 %v126_v53, %v41_v33 }
  0x91   :  { %v155_v57 = vmax.f32 %v144_v51, 0.0  ;;  %v156_v58 = vmax.f32 %v108_v52, 0.0  ;;  %v195_v13 = vmul.f32 %v182_v42, %v159_v3 }
  0x92   :  { %245 = vst [vmem:[%s426_s5] sm:$0xff] %v237_v54  ;;  %v157_v60 = vmax.f32 %v127_v55, 0.0 }
  0x93   :  { %v191_v61 = vmul.f32 %v172_v31, %v155_v57  ;;  %v192_v62 = vmul.f32 %v177_v34, %v156_v58  ;;  %v231_v20 = vadd.f32 %v218_v16, %v195_v13 }
  0x94   :  { %v193_v63 = vmul.f32 %v177_v34, %v157_v60  ;;  %v112_v7 = vpop.f32.mrf.mxu3 }
  0x95   :  { %v227_v1 = vadd.f32 %v208_v45, %v191_v61  ;;  %v228_v2 = vadd.f32 %v213_v0, %v192_v62  ;;  %v113_v14 = vadd.f32 %v112_v7, %v392_v36 }
  0x96   :  { %v229_v4 = vadd.f32 %v213_v0, %v193_v63  ;;  %v145_v5 = vpop.f32.mrf.mxu2 }
  0x97   :  { %v238_v6 = vpack.c.bf16 %v227_v1, %v227_v1  ;;  %v146_v8 = vadd.f32 %v145_v5, %v41_v33  ;;  %v129_v9 = vpop.f32.mrf.mxu1  ;;  %v162_v21 = vmax.f32 %v113_v14, 0.0 }
  0x98   :  { %v239_v10 = vpack.c.bf16 %v229_v4, %v228_v2  ;;  %v130_v11 = vadd.f32 %v129_v9, %v46_v32 }
  0x99   :  { %246 = vst [vmem:[%s426_s5 + $0x8] sm:$0xf] %v238_v6  ;;  %v158_v12 = vmax.f32 %v146_v8, 0.0  ;;  %v198_v30 = vmul.f32 %v187_v56, %v162_v21 }
  0x9a   :  { %247 = vst [vmem:[%s426_s5 + $0xc] sm:$0xff] %v239_v10  ;;  %v160_v15 = vmax.f32 %v130_v11, 0.0 }
  0x9b   :  { %v194_v17 = vmul.f32 %v177_v34, %v158_v12 }
  0x9c   :  { %v196_v18 = vmul.f32 %v182_v42, %v160_v15 }
  0x9d   :  { %v230_v19 = vadd.f32 %v213_v0, %v194_v17 }
  0x9e   :  { %v232_v22 = vadd.f32 %v218_v16, %v196_v18  ;;  %v148_v23 = vpop.f32.mrf.mxu2 }
  0x9f   :  { %v240_v24 = vpack.c.bf16 %v230_v19, %v230_v19  ;;  %v149_v25 = vadd.f32 %v148_v23, %v46_v32  ;;  %v131_v26 = vpop.f32.mrf.mxu1  ;;  %v234_v32 = vadd.f32 %v223_v35, %v198_v30 }
  0xa0   :  { %v241_v27 = vpack.c.bf16 %v232_v22, %v231_v20  ;;  %v132_v28 = vadd.f32 %v131_v26, %v392_v36 }
  0xa1   :  { %248 = vst [vmem:[%s426_s5 + $0x14] sm:$0xf] %v240_v24  ;;  %v161_v29 = vmax.f32 %v149_v25, 0.0 }
  0xa2   :  { %249 = vst [vmem:[%s426_s5 + $0x18] sm:$0xff] %v241_v27  ;;  %v163_v31 = vmax.f32 %v132_v28, 0.0 }
  0xa3   :  { %v197_v33 = vmul.f32 %v182_v42, %v161_v29 }
  0xa4   :  { %v199_v34 = vmul.f32 %v187_v56, %v163_v31 }
  0xa5   :  { %v233_v37 = vadd.f32 %v218_v16, %v197_v33 }
  0xa6   :  { %v235_v38 = vadd.f32 %v223_v35, %v199_v34  ;;  %v150_v39 = vpop.f32.mrf.mxu2 }
  0xa7   :  { %v242_v40 = vpack.c.bf16 %v233_v37, %v233_v37  ;;  %v151_v41 = vadd.f32 %v150_v39, %v392_v36 }
  0xa8   :  { %v243_v43 = vpack.c.bf16 %v235_v38, %v234_v32 }
  0xa9   :  { %250 = vst [vmem:[%s426_s5 + $0x20] sm:$0xf] %v242_v40  ;;  %v164_v44 = vmax.f32 %v151_v41, 0.0 }
  0xaa   :  { %251 = vst [vmem:[%s426_s5 + $0x24] sm:$0xff] %v243_v43 }
  0xab   :  { %v200_v42 = vmul.f32 %v187_v56, %v164_v44 }
  0xad   :  { %v236_v45 = vadd.f32 %v223_v35, %v200_v42 }
  0xaf   :  { %v244_v46 = vpack.c.bf16 %v236_v45, %v236_v45 }
  0xb1   :  { %252 = vst [vmem:[%s426_s5 + $0x2c] sm:$0xf] %v244_v46 }

// kernel: asr_ctc_forward.10
= control target key start
LH: loop header
LB: loop body
LE: loop exit
PB: predicated region body
PF: predicated region fallthrough
CT: control target
= control target key end

     0   :  { %v508_v2 = vmov 0   ;;  %vm227_vm0 = vcmask 261120   ;;  %s673_s0 = inlined_call_operand.vmem [shape: bf16[288,128], index: 0, kind: input, shape index: {}]   ;;  %s674_s1 = inlined_call_operand.vmem [shape: bf16[32,288], index: 1, kind: input, shape index: {}]   ;;  %s675_s2 = inlined_call_operand.vmem [shape: f32[32,1], index: 2, kind: input, shape index: {}]   ;;  %s676_s3 = inlined_call_operand.vmem [shape: f32[32,1], index: 3, kind: input, shape index: {}]   ;;  %s677_s4 = inlined_call_operand.vmem [shape: f32[32,1], index: 4, kind: input, shape index: {}]   ;;  %s678_s5 = inlined_call_operand.vmem [shape: bf16[32,128], index: 5, kind: output, shape index: {}]  }
   0x1   :  { %v474_v0 = vld [vmem:[%s673_s0 + $0x38] sm:$0xff]  ;;  %506 = vset.pattern.permute.xlu1 %v508_v2  ;;  %505 = vset.pattern.permute.xlu0 %v508_v2  ;;  %v473_v3 = vld [vmem:[%s673_s0 + $0x30] sm:$0xff]  ;;  %v484_v4 = vld [vmem:[%s673_s0 + $0x88] sm:$0xff] }
   0x2   :  { %v482_v1 = vld [vmem:[%s673_s0 + $0x78] sm:$0xff]  ;;  %507 = vset.pattern.permute.xlu2 %v508_v2  ;;  %234 = vmatpush.bf16.msra.mxu0 %v474_v0  ;;  %v481_v5 = vld [vmem:[%s673_s0 + $0x70] sm:$0xff]  ;;  %v483_v6 = vld [vmem:[%s673_s0 + $0x80] sm:$0xff] }
   0x3   :  { %496 = vmatpush.bf16.msra.mxu3 %v474_v0  ;;  %253 = vmatpush.bf16.msra.mxu1 %v482_v1  ;;  %v373_v7 = vld [vmem:[%s674_s1 + $0x8] sm:$0xf]  ;;  %v463_v8 = vld [vmem:[%s674_s1 + $0x10] sm:$0xf0]  ;;  %v65_v11 = vld [vmem:[%s675_s2] sm:$0xff] }
   0x4   :  { %278 = vmatpush.bf16.msra.mxu2 %v484_v4  ;;  %v472_v9 = vld [vmem:[%s673_s0 + $0x28] sm:$0xff]  ;;  %v67_v10 = vld [vmem:[%s675_s2 + $0x10] sm:$0xff]  ;;  %v374_v13 = vor.u32 %v463_v8, %v373_v7  ;;  %71 = vperm.xlu0 %505, %v65_v11   ;;  %v471_v14 = vld [vmem:[%s673_s0 + $0x20] sm:$0xff] }
   0x5   :  { %v480_v12 = vld [vmem:[%s673_s0 + $0x68] sm:$0xff]  ;;  %81 = vperm.xlu1 %506, %v67_v10   ;;  %v479_v15 = vld [vmem:[%s673_s0 + $0x60] sm:$0xff]  ;;  %v68_v16 = vld [vmem:[%s675_s2 + $0x18] sm:$0xff] }
   0x6   :  { %235 = vmatpush.bf16.msra.mxu0 %v473_v3  ;;  %v66_v17 = vld [vmem:[%s675_s2 + $0x8] sm:$0xff]  ;;  %v470_v18 = vld [vmem:[%s673_s0 + $0x18] sm:$0xff]  ;;  %v469_v20 = vld [vmem:[%s673_s0 + $0x10] sm:$0xff] }
   0x7   :  { %497 = vmatpush.bf16.msra.mxu3 %v473_v3  ;;  %254 = vmatpush.bf16.msra.mxu1 %v481_v5  ;;  %v478_v19 = vld [vmem:[%s673_s0 + $0x58] sm:$0xff]  ;;  %v295_v21 = vld [vmem:[%s676_s3] sm:$0xff]  ;;  %v477_v22 = vld [vmem:[%s673_s0 + $0x50] sm:$0xff] }
   0x8   :  { %279 = vmatpush.bf16.msra.mxu2 %v483_v6  ;;  %301 = vperm.xlu2 %507, %v295_v21   ;;  %v385_v23 = vld [vmem:[%s674_s1 + $0x20] sm:$0xf]  ;;  %v466_v24 = vld [vmem:[%s674_s1 + $0x28] sm:$0xf0]  ;;  %v298_v25 = vld [vmem:[%s676_s3 + $0x18] sm:$0xff] }
   0x9   :  { %v297_v26 = vld [vmem:[%s676_s3 + $0x10] sm:$0xff]  ;;  %v468_v27 = vld [vmem:[%s673_s0 + $0x8] sm:$0xff]  ;;  %v386_v29 = vor.u32 %v466_v24, %v385_v23  ;;  %v467_v30 = vld [vmem:[%s673_s0] sm:$0xff] }
   0xa   :  { %236 = vmatpush.bf16.msra.mxu0 %v472_v9  ;;  %v476_v28 = vld [vmem:[%s673_s0 + $0x48] sm:$0xff]  ;;  %v365_v31 = vld [vmem:[%s674_s1] sm:$0xf]  ;;  %v377_v34 = vld [vmem:[%s674_s1 + $0x18] sm:$0xf] }
   0xb   :  { %498 = vmatpush.bf16.msra.mxu3 %v472_v9  ;;  %255 = vmatpush.bf16.msra.mxu1 %v480_v12  ;;  %v296_v32 = vld [vmem:[%s676_s3 + $0x8] sm:$0xff]  ;;  %v465_v35 = vld [vmem:[%s674_s1 + $0x20] sm:$0xf0]  ;;  %v367_v38 = vld [vmem:[%s674_s1 + $0xc] sm:$0xf0] }
   0xc   :  { %459 = vmatmul.msk.bf16.vlgmr.msra.gmra.mxu2 %vm227_vm0, %v374_v13  ;;  %76 = vperm.xlu0 %505, %v66_v17   ;;  %v462_v33 = vld [vmem:[%s674_s1 + $0x8] sm:$0xf0]  ;;  %v475_v36 = vld [vmem:[%s673_s0 + $0x40] sm:$0xff]  ;;  %v325_v39 = vld [vmem:[%s677_s4 + $0x10] sm:$0xff]  ;;  %v378_v41 = vor.u32 %v465_v35, %v377_v34 }
   0xd   :  { %86 = vperm.xlu1 %506, %v68_v16   ;;  %v461_v37 = vld [vmem:[%s674_s1 + $0x4] sm:$0xf]  ;;  %v366_v40 = vor.u32 %v462_v33, %v365_v31  ;;  %v324_v42 = vld [vmem:[%s677_s4 + $0x8] sm:$0xff]  ;;  %v326_v45 = vld [vmem:[%s677_s4 + $0x18] sm:$0xff] }
   0xe   :  { %237 = vmatpush.bf16.msra.mxu0 %v471_v14  ;;  %v370_v43 = vor.u32 %v461_v37, %v367_v38  ;;  %v323_v44 = vld [vmem:[%s677_s4] sm:$0xff]  ;;  %v464_v46 = vld [vmem:[%s674_s1 + $0x1c] sm:$0xf]  ;;  %v379_v47 = vld [vmem:[%s674_s1 + $0x24] sm:$0xf0] }
   0xf   :  { %499 = vmatpush.bf16.msra.mxu3 %v471_v14  ;;  %256 = vmatpush.bf16.msra.mxu1 %v479_v15  ;;  %v382_v48 = vor.u32 %v464_v46, %v379_v47 }
  0x10   :  { %306 = vperm.xlu2 %507, %v296_v32  }
  0x12   :  { %238 = vmatpush.bf16.msra.mxu0 %v470_v18 }
  0x13   :  { %500 = vmatpush.bf16.msra.mxu3 %v470_v18  ;;  %257 = vmatpush.bf16.msra.mxu1 %v478_v19 }
  0x14   :  { %311 = vperm.xlu0 %505, %v297_v26  }
  0x15   :  { %316 = vperm.xlu1 %506, %v298_v25  }
  0x16   :  { %239 = vmatpush.bf16.msra.mxu0 %v469_v20 }
  0x17   :  { %501 = vmatpush.bf16.msra.mxu3 %v469_v20  ;;  %258 = vmatpush.bf16.msra.mxu1 %v477_v22 }
  0x18   :  { %329 = vperm.xlu2 %507, %v323_v44  }
  0x1a   :  { %240 = vmatpush.bf16.msra.mxu0 %v468_v27 }
  0x1b   :  { %502 = vmatpush.bf16.msra.mxu3 %v468_v27  ;;  %259 = vmatpush.bf16.msra.mxu1 %v476_v28 }
  0x1c   :  { %460 = vmatmul.msk.bf16.gmra.mxu2 %vm227_vm0, %v386_v29  ;;  %334 = vperm.xlu0 %505, %v324_v42  }
  0x1d   :  { %339 = vperm.xlu1 %506, %v325_v39  }
  0x1e   :  { %241 = vmatpush.bf16.msra.mxu0 %v467_v30 }
  0x1f   :  { %503 = vmatpush.bf16.msra.mxu3 %v467_v30  ;;  %260 = vmatpush.bf16.msra.mxu1 %v475_v36 }
  0x20   :  { %344 = vperm.xlu2 %507, %v326_v45  }
  0x21   :  { %242 = vmatmul.bf16.vlgmr.msra.gmra.mxu0 %v366_v40 }
  0x22   :  { %247 = vmatmul.bf16.vlgmr.msra.gmra.mxu3 %v378_v41  ;;  %261 = vmatmul.bf16.vlgmr.msra.gmra.mxu1 %v370_v43 }
  0x32   :  { %266 = vmatmul.bf16.gmra.mxu1 %v382_v48 }
  0x62   :  { %v302_v50 = vpop.permute.xlu2 %301 }
  0x6a   :  { %v307_v58 = vpop.permute.xlu2 %306 }
  0x72   :  { %v330_v12 = vpop.permute.xlu2 %329 }
  0x76   :  { %v72_v49 = vpop.permute.xlu0 %71 }
  0x77   :  { %v82_v56 = vpop.permute.xlu1 %81 }
  0x7a   :  { %v345_v30 = vpop.permute.xlu2 %344 }
  0x7e   :  { %v77_v52 = vpop.permute.xlu0 %76 }
  0x7f   :  { %v87_v4 = vpop.permute.xlu1 %86 }
  0x86   :  { %v312_v61 = vpop.permute.xlu0 %311 }
  0x87   :  { %v317_v20 = vpop.permute.xlu1 %316 }
  0x8e   :  { %v335_v13 = vpop.permute.xlu0 %334 }
  0x8f   :  { %v281_v51 = vpop.f32.mrf.mxu2  ;;  %v340_v31 = vpop.permute.xlu1 %339 }
  0x97   :  { %v283_v60 = vpop.f32.mrf.mxu2 }
  0x9e   :  { %v243_v53 = vpop.f32.mrf.mxu0 }
  0x9f   :  { %v244_v54 = vadd.f32 %v243_v53, %v72_v49  ;;  %v262_v55 = vpop.f32.mrf.mxu1  ;;  %v286_v10 = vpop.f32.mrf.mxu2 }
  0xa1   :  { %v263_v57 = vadd.f32 %v262_v55, %v244_v54 }
  0xa3   :  { %v282_v59 = vadd.f32 %v281_v51, %v263_v57 }
  0xa5   :  { %v291_v1 = vmax.f32 %v282_v59, 0.0  ;;  %v248_v2 = vpop.f32.mrf.mxu3 }
  0xa6   :  { %v245_v62 = vpop.f32.mrf.mxu0  ;;  %v249_v8 = vadd.f32 %v248_v2, %v82_v56 }
  0xa7   :  { %v246_v63 = vadd.f32 %v245_v62, %v77_v52  ;;  %v264_v0 = vpop.f32.mrf.mxu1  ;;  %v319_v6 = vmul.f32 %v302_v50, %v291_v1  ;;  %v288_v25 = vpop.f32.mrf.mxu2 }
  0xa9   :  { %v265_v3 = vadd.f32 %v264_v0, %v246_v63  ;;  %v347_v15 = vadd.f32 %v330_v12, %v319_v6 }
  0xab   :  { %v284_v5 = vadd.f32 %v283_v60, %v265_v3 }
  0xad   :  { %v292_v7 = vmax.f32 %v284_v5, 0.0  ;;  %v250_v18 = vpop.f32.mrf.mxu3 }
  0xae   :  { %v251_v21 = vadd.f32 %v250_v18, %v87_v4 }
  0xaf   :  { %v320_v9 = vmul.f32 %v307_v58, %v292_v7  ;;  %v267_v11 = vpop.f32.mrf.mxu1 }
  0xb0   :  { %v268_v14 = vadd.f32 %v267_v11, %v249_v8 }
  0xb1   :  { %v348_v16 = vadd.f32 %v335_v13, %v320_v9 }
  0xb2   :  { %v287_v19 = vadd.f32 %v286_v10, %v268_v14 }
  0xb3   :  { %v488_v17 = vpack.c.bf16 %v348_v16, %v347_v15 }
  0xb4   :  { %v293_v23 = vmax.f32 %v287_v19, 0.0 }
  0xb5   :  { %489 = vst [vmem:[%s678_s5] sm:$0xff] %v488_v17  }
  0xb6   :  { %v321_v27 = vmul.f32 %v312_v61, %v293_v23 }
  0xb7   :  { %v269_v22 = vpop.f32.mrf.mxu1 }
  0xb8   :  { %v270_v24 = vadd.f32 %v269_v22, %v251_v21  ;;  %v349_v32 = vadd.f32 %v340_v31, %v321_v27 }
  0xba   :  { %v289_v26 = vadd.f32 %v288_v25, %v270_v24 }
  0xbc   :  { %v294_v28 = vmax.f32 %v289_v26, 0.0 }
  0xbe   :  { %v322_v29 = vmul.f32 %v317_v20, %v294_v28 }
  0xc0   :  { %v350_v33 = vadd.f32 %v345_v30, %v322_v29 }
  0xc2   :  { %v493_v34 = vpack.c.bf16 %v350_v33, %v349_v32 }
  0xc4   :  { %495 = vst [vmem:[%s678_s5 + $0x8] sm:$0xff] %v493_v34  }

// kernel: asr_ctc_forward.13
= control target key start
LH: loop header
LB: loop body
LE: loop exit
PB: predicated region body
PF: predicated region fallthrough
CT: control target
= control target key end

     0   :  { %vm64_vm0 = vcmask 261120   ;;  %s360_s3 = inlined_call_operand.vmem [shape: bf16[32,256], index: 3, kind: input, shape index: {}]   ;;  %s361_s2 = inlined_call_operand.vmem [shape: bf16[32,256], index: 2, kind: input, shape index: {}]   ;;  %s362_s1 = inlined_call_operand.vmem [shape: bf16[32,32], index: 1, kind: input, shape index: {}]   ;;  %s363_s0 = inlined_call_operand.vmem [shape: bf16[32,32], index: 0, kind: input, shape index: {}]   ;;  %s364_s4 = inlined_call_operand.vmem [shape: bf16[32,256], index: 4, kind: output, shape index: {}]  }
   0x1   :  { %v213_v0 = vld [vmem:[%s360_s3 + $0x10] sm:$0xf]  ;;  %v262_v1 = vld [vmem:[%s360_s3 + $0x14] sm:$0xf0]  ;;  %v261_v2 = vld [vmem:[%s360_s3 + $0x14] sm:$0xf] }
   0x2   :  { %v214_v3 = vor.u32 %v262_v1, %v213_v0  ;;  %v215_v4 = vld [vmem:[%s360_s3 + $0x18] sm:$0xf0]  ;;  %v241_v5 = vld [vmem:[%s361_s2 + $0x10] sm:$0xf]  ;;  %v256_v6 = vld [vmem:[%s361_s2 + $0x14] sm:$0xf0] }
   0x3   :  { %v218_v7 = vor.u32 %v261_v2, %v215_v4  ;;  %v242_v8 = vor.u32 %v256_v6, %v241_v5  ;;  %v255_v9 = vld [vmem:[%s361_s2 + $0x14] sm:$0xf]  ;;  %v243_v10 = vld [vmem:[%s361_s2 + $0x18] sm:$0xf0]  ;;  %v205_v11 = vld [vmem:[%s360_s3] sm:$0xf] }
   0x4   :  { %77 = vmatpush.bf16.msra.mxu0 %v214_v3  ;;  %v246_v12 = vor.u32 %v255_v9, %v243_v10  ;;  %v260_v13 = vld [vmem:[%s360_s3 + $0x4] sm:$0xf0]  ;;  %v259_v14 = vld [vmem:[%s360_s3 + $0x4] sm:$0xf]  ;;  %v207_v15 = vld [vmem:[%s360_s3 + $0x8] sm:$0xf0] }
   0x5   :  { %96 = vmatpush.bf16.msra.mxu1 %v218_v7  ;;  %151 = vmatpush.bf16.msra.mxu2 %v242_v8  ;;  %v206_v16 = vor.u32 %v260_v13, %v205_v11  ;;  %v210_v17 = vor.u32 %v259_v14, %v207_v15  ;;  %v233_v18 = vld [vmem:[%s361_s2] sm:$0xf]  ;;  %v254_v19 = vld [vmem:[%s361_s2 + $0x4] sm:$0xf0]  ;;  %v253_v20 = vld [vmem:[%s361_s2 + $0x4] sm:$0xf] }
   0x6   :  { %170 = vmatpush.bf16.msra.mxu3 %v246_v12  ;;  %v234_v21 = vor.u32 %v254_v19, %v233_v18  ;;  %v235_v22 = vld [vmem:[%s361_s2 + $0x8] sm:$0xf0]  ;;  %v257_v24 = vld [vmem:[%s362_s1] sm:$0xff] }
   0x7   :  { %v238_v23 = vor.u32 %v253_v20, %v235_v22  ;;  %v251_v25 = vld [vmem:[%s363_s0] sm:$0xff]  ;;  %v258_v26 = vld [vmem:[%s362_s1 + $0x8] sm:$0xff] }
   0x8   :  { %78 = vmatpush.bf16.msra.mxu0 %v206_v16  ;;  %v252_v27 = vld [vmem:[%s363_s0 + $0x8] sm:$0xff] }
   0x9   :  { %97 = vmatpush.bf16.msra.mxu1 %v210_v17  ;;  %152 = vmatpush.bf16.msra.mxu2 %v234_v21 }
   0xa   :  { %171 = vmatpush.bf16.msra.mxu3 %v238_v23 }
   0xb   :  { %219 = vmatmul.msk.bf16.vlgmr.msra.gmra.mxu0 %vm64_vm0, %v257_v24 }
   0xc   :  { %221 = vmatmul.msk.bf16.vlgmr.msra.gmra.mxu1 %vm64_vm0, %v257_v24  ;;  %247 = vmatmul.msk.bf16.vlgmr.msra.gmra.mxu2 %vm64_vm0, %v251_v25 }
   0xd   :  { %249 = vmatmul.msk.bf16.vlgmr.msra.gmra.mxu3 %vm64_vm0, %v251_v25 }
  0x1b   :  { %220 = vmatmul.msk.bf16.gmra.mxu0 %vm64_vm0, %v258_v26 }
  0x1c   :  { %222 = vmatmul.msk.bf16.gmra.mxu1 %vm64_vm0, %v258_v26  ;;  %248 = vmatmul.msk.bf16.gmra.mxu2 %vm64_vm0, %v252_v27 }
  0x1d   :  { %250 = vmatmul.msk.bf16.gmra.mxu3 %vm64_vm0, %v252_v27 }
  0x88   :  { %v80_v28 = vpop.f32.mrf.mxu0 }
  0x89   :  { %v99_v29 = vpop.f32.mrf.mxu1 }
  0x8f   :  { %v154_v30 = vpop.f32.mrf.mxu2 }
  0x90   :  { %v155_v31 = vadd.f32 %v154_v30, %v80_v28  ;;  %v173_v32 = vpop.f32.mrf.mxu3  ;;  %v82_v35 = vpop.f32.mrf.mxu0 }
  0x91   :  { %v174_v33 = vadd.f32 %v173_v32, %v99_v29  ;;  %v101_v36 = vpop.f32.mrf.mxu1 }
  0x93   :  { %v183_v34 = vpack.c.bf16 %v174_v33, %v155_v31 }
  0x95   :  { %187 = vst [vmem:[%s364_s4] sm:$0xff] %v183_v34 }
  0x97   :  { %v156_v37 = vpop.f32.mrf.mxu2 }
  0x98   :  { %v157_v38 = vadd.f32 %v156_v37, %v82_v35  ;;  %v175_v39 = vpop.f32.mrf.mxu3  ;;  %v85_v42 = vpop.f32.mrf.mxu0 }
  0x99   :  { %v176_v40 = vadd.f32 %v175_v39, %v101_v36  ;;  %v104_v43 = vpop.f32.mrf.mxu1 }
  0x9b   :  { %v184_v41 = vpack.c.bf16 %v176_v40, %v157_v38 }
  0x9d   :  { %188 = vst [vmem:[%s364_s4 + $0x8] sm:$0xff] %v184_v41 }
  0x9f   :  { %v159_v44 = vpop.f32.mrf.mxu2 }
  0xa0   :  { %v160_v45 = vadd.f32 %v159_v44, %v85_v42  ;;  %v178_v46 = vpop.f32.mrf.mxu3  ;;  %v87_v49 = vpop.f32.mrf.mxu0 }
  0xa1   :  { %v179_v47 = vadd.f32 %v178_v46, %v104_v43  ;;  %v106_v51 = vpop.f32.mrf.mxu1 }
  0xa3   :  { %v185_v48 = vpack.c.bf16 %v179_v47, %v160_v45 }
  0xa5   :  { %189 = vst [vmem:[%s364_s4 + $0x10] sm:$0xff] %v185_v48 }
  0xa7   :  { %v161_v50 = vpop.f32.mrf.mxu2 }
  0xa8   :  { %v162_v52 = vadd.f32 %v161_v50, %v87_v49  ;;  %v180_v53 = vpop.f32.mrf.mxu3 }
  0xa9   :  { %v181_v54 = vadd.f32 %v180_v53, %v106_v51 }
  0xab   :  { %v186_v55 = vpack.c.bf16 %v181_v54, %v162_v52 }
  0xad   :  { %190 = vst [vmem:[%s364_s4 + $0x18] sm:$0xff] %v186_v55 }

// kernel: asr_ctc_forward.11
= control target key start
LH: loop header
LB: loop body
LE: loop exit
PB: predicated region body
PF: predicated region fallthrough
CT: control target
= control target key end

     0   :  { %s408_s1 = inlined_call_operand.vmem [shape: bf16[128,256], index: 1, kind: input, shape index: {}]   ;;  %s409_s0 = inlined_call_operand.vmem [shape: bf16[32,128], index: 0, kind: input, shape index: {}]   ;;  %s410_s2 = inlined_call_operand.vmem [shape: bf16[32,256], index: 2, kind: output, shape index: {}]  }
   0x1   :  { %v239_v0 = vld [vmem:[%s408_s1 + $0x70] sm:$0xf]  ;;  %v262_v1 = vld [vmem:[%s408_s1 + $0x74] sm:$0xf0]  ;;  %v261_v2 = vld [vmem:[%s408_s1 + $0x74] sm:$0xf] }
   0x2   :  { %v240_v3 = vor.u32 %v262_v1, %v239_v0  ;;  %v241_v4 = vld [vmem:[%s408_s1 + $0x78] sm:$0xf0]  ;;  %v231_v5 = vld [vmem:[%s408_s1 + $0x60] sm:$0xf]  ;;  %v260_v6 = vld [vmem:[%s408_s1 + $0x64] sm:$0xf0] }
   0x3   :  { %v244_v7 = vor.u32 %v261_v2, %v241_v4  ;;  %v259_v8 = vld [vmem:[%s408_s1 + $0x64] sm:$0xf]  ;;  %v233_v9 = vld [vmem:[%s408_s1 + $0x68] sm:$0xf0]  ;;  %v232_v10 = vor.u32 %v260_v6, %v231_v5  ;;  %v223_v12 = vld [vmem:[%s408_s1 + $0x50] sm:$0xf] }
   0x4   :  { %123 = vmatpush.bf16.msra.mxu0 %v240_v3  ;;  %263 = vmatpush.bf16.msra.mxu2 %v240_v3  ;;  %v236_v11 = vor.u32 %v259_v8, %v233_v9  ;;  %v258_v13 = vld [vmem:[%s408_s1 + $0x54] sm:$0xf0]  ;;  %v257_v14 = vld [vmem:[%s408_s1 + $0x54] sm:$0xf]  ;;  %v225_v15 = vld [vmem:[%s408_s1 + $0x58] sm:$0xf0] }
   0x5   :  { %142 = vmatpush.bf16.msra.mxu1 %v244_v7  ;;  %271 = vmatpush.bf16.msra.mxu3 %v244_v7  ;;  %v224_v16 = vor.u32 %v258_v13, %v223_v12  ;;  %v228_v17 = vor.u32 %v257_v14, %v225_v15  ;;  %v215_v18 = vld [vmem:[%s408_s1 + $0x40] sm:$0xf]  ;;  %v256_v19 = vld [vmem:[%s408_s1 + $0x44] sm:$0xf0]  ;;  %v255_v20 = vld [vmem:[%s408_s1 + $0x44] sm:$0xf] }
   0x6   :  { %v217_v21 = vld [vmem:[%s408_s1 + $0x48] sm:$0xf0]  ;;  %v216_v22 = vor.u32 %v256_v19, %v215_v18  ;;  %v207_v24 = vld [vmem:[%s408_s1 + $0x30] sm:$0xf]  ;;  %v254_v25 = vld [vmem:[%s408_s1 + $0x34] sm:$0xf0] }
   0x7   :  { %v220_v23 = vor.u32 %v255_v20, %v217_v21  ;;  %v253_v26 = vld [vmem:[%s408_s1 + $0x34] sm:$0xf]  ;;  %v209_v27 = vld [vmem:[%s408_s1 + $0x38] sm:$0xf0]  ;;  %v208_v28 = vor.u32 %v254_v25, %v207_v24  ;;  %v199_v30 = vld [vmem:[%s408_s1 + $0x20] sm:$0xf] }
   0x8   :  { %124 = vmatpush.bf16.msra.mxu0 %v232_v10  ;;  %264 = vmatpush.bf16.msra.mxu2 %v232_v10  ;;  %v212_v29 = vor.u32 %v253_v26, %v209_v27  ;;  %v252_v31 = vld [vmem:[%s408_s1 + $0x24] sm:$0xf0]  ;;  %v251_v32 = vld [vmem:[%s408_s1 + $0x24] sm:$0xf]  ;;  %v201_v33 = vld [vmem:[%s408_s1 + $0x28] sm:$0xf0] }
   0x9   :  { %143 = vmatpush.bf16.msra.mxu1 %v236_v11  ;;  %272 = vmatpush.bf16.msra.mxu3 %v236_v11  ;;  %v200_v34 = vor.u32 %v252_v31, %v199_v30  ;;  %v204_v35 = vor.u32 %v251_v32, %v201_v33  ;;  %v191_v36 = vld [vmem:[%s408_s1 + $0x10] sm:$0xf]  ;;  %v250_v37 = vld [vmem:[%s408_s1 + $0x14] sm:$0xf0]  ;;  %v249_v38 = vld [vmem:[%s408_s1 + $0x14] sm:$0xf] }
   0xa   :  { %v193_v39 = vld [vmem:[%s408_s1 + $0x18] sm:$0xf0]  ;;  %v192_v40 = vor.u32 %v250_v37, %v191_v36  ;;  %v183_v42 = vld [vmem:[%s408_s1] sm:$0xf]  ;;  %v248_v43 = vld [vmem:[%s408_s1 + $0x4] sm:$0xf0] }
   0xb   :  { %v196_v41 = vor.u32 %v249_v38, %v193_v39  ;;  %v247_v44 = vld [vmem:[%s408_s1 + $0x4] sm:$0xf]  ;;  %v185_v45 = vld [vmem:[%s408_s1 + $0x8] sm:$0xf0]  ;;  %v184_v46 = vor.u32 %v248_v43, %v183_v42 }
   0xc   :  { %125 = vmatpush.bf16.msra.mxu0 %v224_v16  ;;  %265 = vmatpush.bf16.msra.mxu2 %v224_v16  ;;  %v188_v47 = vor.u32 %v247_v44, %v185_v45  ;;  %v245_v48 = vld [vmem:[%s409_s0] sm:$0xff]  ;;  %v246_v49 = vld [vmem:[%s409_s0 + $0x8] sm:$0xff] }
   0xd   :  { %144 = vmatpush.bf16.msra.mxu1 %v228_v17  ;;  %273 = vmatpush.bf16.msra.mxu3 %v228_v17 }
  0x10   :  { %126 = vmatpush.bf16.msra.mxu0 %v216_v22  ;;  %266 = vmatpush.bf16.msra.mxu2 %v216_v22 }
  0x11   :  { %145 = vmatpush.bf16.msra.mxu1 %v220_v23  ;;  %274 = vmatpush.bf16.msra.mxu3 %v220_v23 }
  0x14   :  { %127 = vmatpush.bf16.msra.mxu0 %v208_v28  ;;  %267 = vmatpush.bf16.msra.mxu2 %v208_v28 }
  0x15   :  { %146 = vmatpush.bf16.msra.mxu1 %v212_v29  ;;  %275 = vmatpush.bf16.msra.mxu3 %v212_v29 }
  0x18   :  { %128 = vmatpush.bf16.msra.mxu0 %v200_v34  ;;  %268 = vmatpush.bf16.msra.mxu2 %v200_v34 }
  0x19   :  { %147 = vmatpush.bf16.msra.mxu1 %v204_v35  ;;  %276 = vmatpush.bf16.msra.mxu3 %v204_v35 }
  0x1c   :  { %129 = vmatpush.bf16.msra.mxu0 %v192_v40  ;;  %269 = vmatpush.bf16.msra.mxu2 %v192_v40 }
  0x1d   :  { %148 = vmatpush.bf16.msra.mxu1 %v196_v41  ;;  %277 = vmatpush.bf16.msra.mxu3 %v196_v41 }
  0x20   :  { %130 = vmatpush.bf16.msra.mxu0 %v184_v46  ;;  %270 = vmatpush.bf16.msra.mxu2 %v184_v46 }
  0x21   :  { %149 = vmatpush.bf16.msra.mxu1 %v188_v47  ;;  %278 = vmatpush.bf16.msra.mxu3 %v188_v47 }
  0x23   :  { %131 = vmatmul.bf16.vlgmr.msra.gmra.mxu0 %v245_v48  ;;  %136 = vmatmul.bf16.vlgmr.msra.gmra.mxu2 %v246_v49 }
  0x24   :  { %150 = vmatmul.bf16.vlgmr.msra.gmra.mxu1 %v245_v48  ;;  %155 = vmatmul.bf16.vlgmr.msra.gmra.mxu3 %v246_v49 }
  0xa0   :  { %v132_v50 = vpop.f32.mrf.mxu0 }
  0xa1   :  { %v151_v51 = vpop.f32.mrf.mxu1 }
  0xa2   :  { %v161_v52 = vpack.c.bf16 %v151_v51, %v132_v50 }
  0xa4   :  { %165 = vst [vmem:[%s410_s2] sm:$0xff] %v161_v52 }
  0xa6   :  { %v137_v53 = vpop.f32.mrf.mxu2 }
  0xa7   :  { %v156_v54 = vpop.f32.mrf.mxu3 }
  0xa8   :  { %v163_v55 = vpack.c.bf16 %v156_v54, %v137_v53  ;;  %v134_v56 = vpop.f32.mrf.mxu0 }
  0xa9   :  { %v153_v57 = vpop.f32.mrf.mxu1 }
  0xaa   :  { %167 = vst [vmem:[%s410_s2 + $0x10] sm:$0xff] %v163_v55  ;;  %v162_v58 = vpack.c.bf16 %v153_v57, %v134_v56 }
  0xac   :  { %166 = vst [vmem:[%s410_s2 + $0x8] sm:$0xff] %v162_v58 }
  0xae   :  { %v139_v59 = vpop.f32.mrf.mxu2 }
  0xaf   :  { %v158_v60 = vpop.f32.mrf.mxu3 }
  0xb0   :  { %v164_v61 = vpack.c.bf16 %v158_v60, %v139_v59 }
  0xb2   :  { %168 = vst [vmem:[%s410_s2 + $0x18] sm:$0xff] %v164_v61 }

// kernel: asr_ctc_forward.17
= control target key start
LH: loop header
LB: loop body
LE: loop exit
PB: predicated region body
PF: predicated region fallthrough
CT: control target
= control target key end

     0   :  { %vm59_vm0 = vcmask 261120   ;;  %s322_s3 = inlined_call_operand.vmem [shape: bf16[32,128], index: 3, kind: input, shape index: {}]   ;;  %s323_s2 = inlined_call_operand.vmem [shape: bf16[32,128], index: 2, kind: input, shape index: {}]   ;;  %s324_s1 = inlined_call_operand.vmem [shape: bf16[32,32], index: 1, kind: input, shape index: {}]   ;;  %s325_s0 = inlined_call_operand.vmem [shape: bf16[32,32], index: 0, kind: input, shape index: {}]   ;;  %s326_s4 = inlined_call_operand.vmem [shape: f32[1,128], index: 4, kind: input, shape index: {}]   ;;  %s327_s5 = inlined_call_operand.vmem [shape: f32[32,128], index: 5, kind: output, shape index: {}]  }
   0x1   :  { %v231_v0 = vld [vmem:[%s322_s3 + $0x8] sm:$0xff]  ;;  %v230_v2 = vld [vmem:[%s322_s3] sm:$0xff] }
   0x2   :  { %v227_v1 = vld [vmem:[%s323_s2 + $0x8] sm:$0xff]  ;;  %72 = vmatpush.bf16.msra.mxu0 %v231_v0  ;;  %232 = vmatpush.bf16.msra.mxu2 %v231_v0  ;;  %v226_v3 = vld [vmem:[%s323_s2] sm:$0xff] }
   0x3   :  { %119 = vmatpush.bf16.msra.mxu1 %v227_v1  ;;  %234 = vmatpush.bf16.msra.mxu3 %v227_v1  ;;  %v228_v4 = vld [vmem:[%s324_s1] sm:$0xff]  ;;  %v229_v5 = vld [vmem:[%s324_s1 + $0x8] sm:$0xff] }
   0x4   :  { %v224_v6 = vld [vmem:[%s325_s0] sm:$0xff]  ;;  %v225_v7 = vld [vmem:[%s325_s0 + $0x8] sm:$0xff] }
   0x5   :  { %v236_v9 = vld [vmem:[%s326_s4] ss:$0 sm:$0xff] }
   0x6   :  { %73 = vmatpush.bf16.msra.mxu0 %v230_v2  ;;  %233 = vmatpush.bf16.msra.mxu2 %v230_v2 }
   0x7   :  { %120 = vmatpush.bf16.msra.mxu1 %v226_v3  ;;  %235 = vmatpush.bf16.msra.mxu3 %v226_v3 }
   0x9   :  { %204 = vmatmul.msk.bf16.vlgmr.msra.gmra.mxu0 %vm59_vm0, %v228_v4  ;;  %205 = vmatmul.msk.bf16.vlgmr.msra.gmra.mxu2 %vm59_vm0, %v229_v5 }
   0xa   :  { %222 = vmatmul.msk.bf16.vlgmr.msra.gmra.mxu1 %vm59_vm0, %v224_v6  ;;  %223 = vmatmul.msk.bf16.vlgmr.msra.gmra.mxu3 %vm59_vm0, %v225_v7 }
  0x86   :  { %v75_v8 = vpop.f32.mrf.mxu0 }
  0x87   :  { %v122_v10 = vpop.f32.mrf.mxu1 }
  0x88   :  { %v123_v11 = vadd.f32 %v122_v10, %v75_v8 }
  0x8a   :  { %v136_v12 = vadd.f32 %v236_v9, %v123_v11 }
  0x8c   :  { %140 = vmax.xlane.f32.xlu0 %v136_v12  ;;  %v80_v13 = vpop.f32.mrf.mxu2 }
  0x8d   :  { %v127_v14 = vpop.f32.mrf.mxu3 }
  0x8e   :  { %v128_v15 = vadd.f32 %v127_v14, %v80_v13  ;;  %v77_v16 = vpop.f32.mrf.mxu0 }
  0x8f   :  { %v124_v17 = vpop.f32.mrf.mxu1 }
  0x90   :  { %v125_v18 = vadd.f32 %v124_v17, %v77_v16  ;;  %v138_v19 = vadd.f32 %v236_v9, %v128_v15 }
  0x92   :  { %144 = vmax.xlane.f32.xlu1 %v138_v19  ;;  %v137_v20 = vadd.f32 %v236_v9, %v125_v18 }
  0x94   :  { %142 = vmax.xlane.f32.xlu0 %v137_v20  ;;  %v82_v21 = vpop.f32.mrf.mxu2 }
  0x95   :  { %v129_v22 = vpop.f32.mrf.mxu3 }
  0x96   :  { %v130_v23 = vadd.f32 %v129_v22, %v82_v21 }
  0x98   :  { %v139_v24 = vadd.f32 %v236_v9, %v130_v23 }
  0x9a   :  { %146 = vmax.xlane.f32.xlu1 %v139_v24 }
  0xff   :  { %v141_v25 = vpop.xlane.xlu0 %140 }
 0x100   :  { %v148_v26 = vsub.f32 %v136_v12, %v141_v25 }
 0x102   :  { %v152_v27 = vmul.f32 1.442695, %v148_v26 }
 0x104   :  { %237 = vpow2.f32 %v152_v27 }
 0x105   :  { %v145_v28 = vpop.xlane.xlu1 %144 }
 0x106   :  { %v150_v29 = vsub.f32 %v138_v19, %v145_v28 }
 0x107   :  { %v143_v30 = vpop.xlane.xlu0 %142 }
 0x108   :  { %v156_v31 = vmul.f32 1.442695, %v150_v29  ;;  %v149_v32 = vsub.f32 %v137_v20, %v143_v30 }
 0x10a   :  { %v238_v33 = vpop.eup %237  ;;  %239 = vpow2.f32 %v156_v31  ;;  %v154_v34 = vmul.f32 1.442695, %v149_v32 }
 0x10b   :  { %160 = vadd.xlane.f32.xlu2 %v238_v33 }
 0x10c   :  { %241 = vpow2.f32 %v154_v34 }
 0x10d   :  { %v147_v35 = vpop.xlane.xlu1 %146 }
 0x10e   :  { %v151_v36 = vsub.f32 %v139_v24, %v147_v35 }
 0x110   :  { %v240_v37 = vpop.eup %239  ;;  %v158_v38 = vmul.f32 1.442695, %v151_v36 }
 0x111   :  { %164 = vadd.xlane.f32.xlu0 %v240_v37 }
 0x112   :  { %v242_v39 = vpop.eup %241  ;;  %243 = vpow2.f32 %v158_v38 }
 0x113   :  { %162 = vadd.xlane.f32.xlu2 %v242_v39 }
 0x118   :  { %v244_v40 = vpop.eup %243 }
 0x119   :  { %166 = vadd.xlane.f32.xlu1 %v244_v40 }
 0x17e   :  { %v161_v41 = vpop.xlane.xlu2 %160 }
 0x17f   :  { %245 = vlog2.f32 %v161_v41 }
 0x184   :  { %v165_v42 = vpop.xlane.xlu0 %164 }
 0x185   :  { %v246_v43 = vpop.eup %245  ;;  %247 = vlog2.f32 %v165_v42 }
 0x186   :  { %v169_v44 = vmul.f32 0.6931472, %v246_v43  ;;  %v163_v45 = vpop.xlane.xlu2 %162 }
 0x187   :  { %249 = vlog2.f32 %v163_v45 }
 0x188   :  { %v176_v46 = vsub.f32 %v148_v26, %v169_v44 }
 0x18a   :  { %180 = vst [vmem:[%s327_s5] sm:$0xff] %v176_v46 }
 0x18b   :  { %v248_v47 = vpop.eup %247 }
 0x18c   :  { %v173_v48 = vmul.f32 0.6931472, %v248_v47  ;;  %v167_v49 = vpop.xlane.xlu1 %166 }
 0x18d   :  { %v250_v50 = vpop.eup %249  ;;  %251 = vlog2.f32 %v167_v49 }
 0x18e   :  { %v178_v51 = vsub.f32 %v150_v29, %v173_v48  ;;  %v171_v52 = vmul.f32 0.6931472, %v250_v50 }
 0x190   :  { %182 = vst [vmem:[%s327_s5 + $0x10] sm:$0xff] %v178_v51  ;;  %v177_v53 = vsub.f32 %v149_v32, %v171_v52 }
 0x192   :  { %181 = vst [vmem:[%s327_s5 + $0x8] sm:$0xff] %v177_v53 }
 0x193   :  { %v252_v54 = vpop.eup %251 }
 0x194   :  { %v175_v55 = vmul.f32 0.6931472, %v252_v54 }
 0x196   :  { %v179_v56 = vsub.f32 %v151_v36, %v175_v55 }
 0x198   :  { %183 = vst [vmem:[%s327_s5 + $0x18] sm:$0xff] %v179_v56 }

// kernel: asr_ctc_forward.12
= control target key start
LH: loop header
LB: loop body
LE: loop exit
PB: predicated region body
PF: predicated region fallthrough
CT: control target
= control target key end

     0   :  { %s2266_s18 = smov 0   ;;  %s2268_s19 = smov 0   ;;  %s2776_s0 = inlined_call_operand.vmem [shape: bf16[16,2,256], index: 0, kind: input, shape index: {}, may-alias: {0,1}]   ;;  %s2777_s1 = inlined_call_operand.vmem [shape: bf16[16,2,256], index: 1, kind: input, shape index: {}, may-alias: {0,1}]   ;;  %s2778_s2 = inlined_call_operand.vmem [shape: bf16[2,32,128], index: 2, kind: input, shape index: {}]   ;;  %s2779_s3 = inlined_call_operand.vmem [shape: f32[1,256], index: 3, kind: input, shape index: {}]   ;;  %s2780_s4 = inlined_call_operand.vmem [shape: bf16[16,2,32], index: 4, kind: output, shape index: {0}]   ;;  %s2781_s5 = inlined_call_operand.vmem [shape: bf16[16,2,32], index: 5, kind: output, shape index: {1}]  }
   0x1   :  { %s2270_s20 = smov 0   ;;  %s2272_s21 = smov 0  }
   0x2   :  { %s2274_s22 = smov 0  }
   0x3 LB: > { %s2292_s23 = sadd.s32 4294967295, %s2230_s22   ;;  %s2295_s24 = sadd.s32 1, %s2230_s22   ;;  %s2230_s22 = sphi %s2274_s22, %s2787_s22   ;;  %s2226_s21 = sphi %s2272_s21, %s2786_s21   ;;  %s2222_s20 = sphi %s2270_s20, %s2785_s20   ;;  %s2218_s19 = sphi %s2268_s19, %s2784_s19   ;;  %s2214_s18 = sphi %s2266_s18, %s2783_s18  }
   0x4   : > { %s20_s25 = ssub.s32 %s2230_s22, %s2295_s24  ;;  %s23_s26 = sadd.s32 1, %s2226_s21 }
   0x5   : > { %p21_p0 = scmp.eq.s32.totalorder %s20_s25, 0  ;;  %p30_p1 = scmp.ne.s32.totalorder %s2226_s21, %s2222_s20 }
   0x6   : > { %p31_p2 = scmp.eq.s32.totalorder %s2230_s22, 0  ;;  %s46_s27 = ssub.s32 1, %s2230_s22 }
   0x7   : > { %s2305_s28 = scalar_select %p21_p0, %s2226_s21, %s23_s26  }
   0x8   : > { %p32_p3 = por %p31_p2, %p30_p1  ;;  %s47_s29 = ssub.s32 1, %s2295_s24 }
   0x9   : > { %s48_s30 = ssub.s32 %s46_s27, %s47_s29  ;;  %s51_s6 = sadd.s32 1, %s2218_s19 }
   0xa   : > { %p49_p4 = scmp.eq.s32.totalorder %s48_s30, 0  ;;  %p58_p5 = scmp.ne.s32.totalorder %s2218_s19, %s2214_s18 }
   0xb   : > { %p1911_p7 = scmp.ge.s32.totalorder %s2230_s22, 2 }
   0xc   : > { %s2314_s7 = scalar_select %p49_p4, %s2218_s19, %s51_s6  }
   0xd   : > { %p2316_p6 = por %p58_p5, %p31_p2  ;;  %186 = sbr.rel (%p1911_p7) target bundleno = 42 (0x2a), region = 24 }
  0x12   : > { %189 = sbr.rel (!%p32_p3) target bundleno = 30 (0x1e), region = 28  ;;  %s191_s9 = sand.u32 (%p32_p3), 1, %s2226_s21  }
  0x13   : > { %s2015_s10 = sshll.u32 (%p32_p3), %s2230_s22, 4  ;;  %s1912_s11 = sshll.u32 (%p32_p3), %s191_s9, 3 }
  0x14   : > { %s196_s14 = scalar_lea.vmem (%p32_p3), %s2776_s0, %s2015_s10  ;;  %s193_s15 = scalar_lea.vmem (%p32_p3), [#allocation4], %s1912_s11 }
  0x15   : > { %v213_v0 = vld [vmem:[%s196_s14] sm:$0x1] (%p32_p3)  ;;  %v215_v1 = vld [vmem:[%s196_s14 + $0x2] sm:$0x1] (%p32_p3)  ;;  %v217_v2 = vld [vmem:[%s196_s14 + $0x4] sm:$0x1] (%p32_p3) }
  0x16   : > { %214 = vst [vmem:[%s193_s15] sm:$0x1] (%p32_p3), %v213_v0  ;;  %v219_v3 = vld [vmem:[%s196_s14 + $0x6] sm:$0x1] (%p32_p3)  ;;  %v221_v4 = vld [vmem:[%s196_s14 + $0x8] sm:$0x1] (%p32_p3) }
  0x17   : > { %216 = vst [vmem:[%s193_s15 + $0x1] sm:$0x1] %v215_v1  ;;  %v223_v5 = vld [vmem:[%s196_s14 + $0xa] sm:$0x1]  ;;  %v225_v6 = vld [vmem:[%s196_s14 + $0xc] sm:$0x1] }
  0x18   : > { %218 = vst [vmem:[%s193_s15 + $0x2] sm:$0x1] %v217_v2  ;;  %v227_v7 = vld [vmem:[%s196_s14 + $0xe] sm:$0x1] }
  0x19   : > { %220 = vst [vmem:[%s193_s15 + $0x3] sm:$0x1] %v219_v3 }
  0x1a   : > { %222 = vst [vmem:[%s193_s15 + $0x4] sm:$0x1] %v221_v4 }
  0x1b   : > { %224 = vst [vmem:[%s193_s15 + $0x5] sm:$0x1] %v223_v5 }
  0x1c   : > { %226 = vst [vmem:[%s193_s15 + $0x6] sm:$0x1] %v225_v6 }
  0x1d   : > { %228 = vst [vmem:[%s193_s15 + $0x7] sm:$0x1] %v227_v7 }
  0x1e PF: > { %268 = sbr.rel (!%p2316_p6) target bundleno = 42 (0x2a), region = 69  ;;  %s270_s16 = sand.u32 (%p2316_p6), 1, %s2218_s19  }
  0x1f   : > { %s1916_s17 = sshll.u32 (%p2316_p6), %s46_s27, 4  ;;  %s1915_s25 = sshll.u32 (%p2316_p6), %s270_s16, 3 }
  0x20   : > { %s1847_s30 = scalar_lea.vmem (%p2316_p6), %s2777_s1, %s1916_s17  ;;  %s272_s6 = scalar_lea.vmem (%p2316_p6), [#allocation5], %s1915_s25 }
  0x21   : > { %v1917_v8 = vld [vmem:[%s1847_s30 + $0x1] sm:$0x1] (%p2316_p6)  ;;  %v1918_v9 = vld [vmem:[%s1847_s30 + $0x3] sm:$0x1] (%p2316_p6)  ;;  %v1919_v10 = vld [vmem:[%s1847_s30 + $0x5] sm:$0x1] (%p2316_p6) }
  0x22   : > { %295 = vst [vmem:[%s272_s6] sm:$0x1] (%p2316_p6), %v1917_v8  ;;  %v1920_v11 = vld [vmem:[%s1847_s30 + $0x7] sm:$0x1] (%p2316_p6)  ;;  %v1921_v12 = vld [vmem:[%s1847_s30 + $0x9] sm:$0x1] (%p2316_p6) }
  0x23   : > { %297 = vst [vmem:[%s272_s6 + $0x1] sm:$0x1] %v1918_v9  ;;  %v1922_v13 = vld [vmem:[%s1847_s30 + $0xb] sm:$0x1]  ;;  %v1923_v14 = vld [vmem:[%s1847_s30 + $0xd] sm:$0x1] }
  0x24   : > { %299 = vst [vmem:[%s272_s6 + $0x2] sm:$0x1] %v1919_v10  ;;  %v1924_v15 = vld [vmem:[%s1847_s30 + $0xf] sm:$0x1] }
  0x25   : > { %301 = vst [vmem:[%s272_s6 + $0x3] sm:$0x1] %v1920_v11 }
  0x26   : > { %303 = vst [vmem:[%s272_s6 + $0x4] sm:$0x1] %v1921_v12 }
  0x27   : > { %305 = vst [vmem:[%s272_s6 + $0x5] sm:$0x1] %v1922_v13 }
  0x28   : > { %307 = vst [vmem:[%s272_s6 + $0x6] sm:$0x1] %v1923_v14 }
  0x29   : > { %309 = vst [vmem:[%s272_s6 + $0x7] sm:$0x1] %v1924_v15 }
  0x2a PF: > { %p1925_p8 = scmp.ge.s32.totalorder %s2230_s22, 1  ;;  %p348_p9 = scmp.lt.s32.totalorder %s2230_s22, 3 }
  0x2c   : > { %p349_p10 = pnand %p1925_p8, %p348_p9 }
  0x2d   : > { %s355_s27 = sand.u32 (!%p349_p10), 1, %s2222_s20   ;;  %s362_s8 = sand.u32 (!%p349_p10), 1, %s2214_s18  }
  0x2e   : > { %352 = sbr.rel (%p349_p10) target bundleno = 4801 (0x12c1), region = 110  ;;  %s1926_s9 = sshll.u32 (!%p349_p10), %s355_s27, 3 }
  0x2f   : > { %s1927_s10 = sshll.u32 (!%p349_p10), %s362_s8, 3  ;;  %s2339_s11 = sshll.u32 (!%p349_p10), %s2292_s23, 3 }
  0x30   : > { %s405_s12 = ssub.s32 (!%p349_p10), 1, %s2292_s23  ;;  %p401_p11 = scmp.lt.s32.totalorder (!%p349_p10), %s2339_s11, 15 }
  0x31   : > { %s2343_s13 = sshll.u32 (!%p349_p10), %s405_s12, 3  ;;  %s2358_s26 = scalar_lea.vmem (!%p349_p10), [#allocation4], %s1926_s9 }
  0x32   : > { %p407_p12 = scmp.lt.s32.totalorder (!%p349_p10), %s2343_s13, 15  ;;  %s2360_s29 = scalar_lea.vmem (!%p349_p10), [#allocation5], %s1927_s10 }
  0x33   : > { %s402_s22 = scalar_select %p401_p11, %s2339_s11, 15 }
  0x34   : > { %s408_s14 = scalar_select %p407_p12, %s2343_s13, 15 }
  0x35   : > { %s2351_s20 = scalar_lea.vmem %s2780_s4, %s402_s22  ;;  %p1930_p13 = scmp.ne.s32.totalorder %s2292_s23, 0 }
  0x36   : > { %s2356_s25 = scalar_lea.vmem %s2781_s5, %s408_s14 }
  0x37   : > { %416 = sbr.rel (%p1930_p13) target bundleno = 65 (0x41), region = 122 }
  0x3c   : > { %vm417_vm0 = vcmask 254976   ;;  %v2232_v16 = vmov 0.0  }
  0x3d   : > { %418 = vst.msk [vmem:[#allocation2] sm:$0x3] %vm417_vm0, %v2232_v16 }
  0x3e   : > { %419 = vst.msk [vmem:[#allocation2 + $0x2] sm:$0x3] %vm417_vm0, %v2232_v16 }
  0x3f   : > { %420 = vst.msk [vmem:[#allocation3] sm:$0x3] %vm417_vm0, %v2232_v16 }
  0x40   : > { %421 = vst.msk [vmem:[#allocation3 + $0x2] sm:$0x3] %vm417_vm0, %v2232_v16 }
  0x41 PF: > { %v2366_v17 = vld [vmem:[%s2778_s2 + $0x18] sm:$0xff]  ;;  %v2371_v18 = vld [vmem:[%s2778_s2 + $0x10] sm:$0xff]  ;;  %v2376_v19 = vld [vmem:[%s2778_s2 + $0x8] sm:$0xff]  ;;  %s2233_s22 = smov 32   ;;  %vm457_vm1 = vcmask 261120   ;;  %s518_s14 = sadd.s32 7, %s2343_s13 }
  0x42   : > { %555 = vmatpush.bf16.msra.mxu1 %v2366_v17  ;;  %723 = vmatpush.bf16.msra.mxu3 %v2366_v17  ;;  %v2384_v23 = vld [vmem:[%s2778_s2] sm:$0xff]  ;;  %p519_p0 = scmp.lt.s32.totalorder %s518_s14, 10  ;;  %v438_v34 = vld [vmem:[%s2358_s26] sm:$0x1]  ;;  %s2234_s30 = smov 64  }
  0x43   : > { %467 = vmatpush.bf16.msra.mxu0 %v2376_v19  ;;  %652 = vmatpush.bf16.msra.mxu2 %v2376_v19  ;;  %v431_v27 = vld [vmem:[%s2779_s3] sm:$0x3]  ;;  %v1946_v31 = vld [vmem:[%s2360_s29 + $0x7] sm:$0x1]  ;;  %v439_v36 = vunpack.c.l.bf16 %v438_v34  ;;  %s697_s6 = sadd.s32 6, %s2343_s13  ;;  %s860_s9 = sadd.s32 5, %s2343_s13 }
  0x44   : > { %v432_v24 = vld [vmem:[#allocation2] sm:$0x3]  ;;  %s520_s15 = scalar_select %p519_p0, 1, 0  ;;  %v2411_v28 = vrot.slane %v431_v27, 1  ;;  %v528_v32 = vunpack.c.l.bf16 %v1946_v31  ;;  %v2416_v37 = vperm.slane %v431_v27, 0 }
  0x45   : > { %v435_v20 = vld [vmem:[#allocation2 + $0x2] sm:$0x3]  ;;  %v444_v26 = vpack.c.bf16 %v432_v24, %v432_v24  ;;  %p698_p1 = scmp.lt.s32.totalorder %s697_s6, 10  ;;  %p861_p2 = scmp.lt.s32.totalorder %s860_s9, 10 }
  0x46   : > { %v433_v22 = vld [vmem:[#allocation3] sm:$0x3]  ;;  %v533_v25 = vpack.c.bf16 %v435_v20, %v435_v20  ;;  %556 = vmatpush.bf16.msra.mxu1 %v2371_v18  ;;  %724 = vmatpush.bf16.msra.mxu3 %v2371_v18  ;;  %s521_s17 = scvt.s32.f32 %s520_s15  ;;  %v443_v40 = vadd.f32 %v2416_v37, %v439_v36  ;;  %s1023_s12 = sadd.s32 4, %s2343_s13 }
  0x47   : > { %v437_v21 = vld [vmem:[#allocation3 + $0x2] sm:$0x3]  ;;  %496 = vrot.lane.b32.xlu2 %v433_v22, %s2233_s22  ;;  %468 = vmatpush.bf16.msra.mxu0 %v2384_v23  ;;  %s699_s27 = scalar_select %p698_p1, 1, 0 }
  0x48   : > { %584 = vrot.lane.b32.xlu1 %v437_v21, %s2233_s22  ;;  %653 = vmatpush.bf16.msra.mxu2 %v2384_v23  ;;  %v522_v29 = vstv %s521_s17  ;;  %s862_s23 = scalar_select %p861_p2, 1, 0 }
  0x49   : > { %1955 = vmatmul.msk.bf16.vlgmr.msra.gmra.mxu1 %vm457_vm1, %v533_v25  ;;  %v525_v30 = vmul.f32 %v2411_v28, %v522_v29  ;;  %s700_s8 = scvt.s32.f32 %s699_s27  ;;  %p1024_p3 = scmp.lt.s32.totalorder %s1023_s12, 10 }
  0x4a   : > { %886 = vmatpush.bf16.msrb.mxu1 %v2366_v17  ;;  %1943 = vmatmul.msk.bf16.vlgmr.msra.gmra.mxu0 %vm457_vm1, %v444_v26  ;;  %s863_s10 = scvt.s32.f32 %s862_s23  ;;  %s1186_s16 = sadd.s32 3, %s2343_s13 }
  0x4b   : > { %815 = vmatpush.bf16.msrb.mxu0 %v2376_v19  ;;  %1049 = vmatpush.bf16.msrb.mxu3 %v2366_v17  ;;  %v530_v33 = vperm.slane %v525_v30, 0  ;;  %s1025_s14 = scalar_select %p1024_p3, 1, 0 }
  0x4c   : > { %978 = vmatpush.bf16.msrb.mxu2 %v2376_v19  ;;  %p1187_p4 = scmp.lt.s32.totalorder %s1186_s16, 10  ;;  %s1349_s6 = sadd.s32 2, %s2343_s13 }
  0x4d   : > { %v532_v35 = vadd.f32 %v530_v33, %v528_v32  ;;  %s1026_s15 = scvt.s32.f32 %s1025_s14  ;;  %p1350_p5 = scmp.lt.s32.totalorder %s1349_s6, 10 }
  0x4e   : > { %887 = vmatpush.bf16.msrb.mxu1 %v2371_v18  ;;  %s1188_s18 = scalar_select %p1187_p4, 1, 0 }
  0x4f   : > { %816 = vmatpush.bf16.msrb.mxu0 %v2384_v23  ;;  %1050 = vmatpush.bf16.msrb.mxu3 %v2371_v18  ;;  %s1351_s27 = scalar_select %p1350_p5, 1, 0 }
  0x50   : > { %979 = vmatpush.bf16.msrb.mxu2 %v2384_v23  ;;  %s1189_s17 = scvt.s32.f32 %s1188_s18  ;;  %s1512_s9 = sadd.s32 1, %s2343_s13 }
  0x51   : > { %p1513_p6 = scmp.lt.s32.totalorder %s1512_s9, 10  ;;  %p1675_p7 = scmp.lt.s32.totalorder %s2343_s13, 10 }
  0x52   : > { %1212 = vmatpush.bf16.msra.mxu1 %v2366_v17  ;;  %p605_p8 = scmp.lt.s32.totalorder %s2339_s11, 10  ;;  %s1583_s18 = sadd.s32 6, %s2339_s11 }
  0x53   : > { %1141 = vmatpush.bf16.msra.mxu0 %v2376_v19  ;;  %s1514_s23 = scalar_select %p1513_p6, 1, 0 }
  0x54   : > { %s1676_s12 = scalar_select %p1675_p7, 1, 0 }
  0x55   : > { %s606_s13 = scalar_select %p605_p8, 1, 0 }
  0x56   : > { %1213 = vmatpush.bf16.msra.mxu1 %v2371_v18  ;;  %s1677_s14 = scvt.s32.f32 %s1676_s12  ;;  %p1584_p10 = scmp.lt.s32.totalorder %s1583_s18, 10 }
  0x57   : > { %1142 = vmatpush.bf16.msra.mxu0 %v2384_v23 }
  0xa1   : > { %v497_v13 = vpop.permute.xlu2 %496 }
  0xba   : > { %v585_v20 = vpop.permute.xlu1 %584 }
  0xc6   : > { %v558_v38 = vpop.f32.mrf.mxu1 }
  0xc7   : > { %v562_v39 = vadd.f32 %v558_v38, %v532_v35  ;;  %v470_v41 = vpop.f32.mrf.mxu0 }
  0xc8   : > { %v474_v42 = vadd.f32 %v470_v41, %v443_v40  ;;  %v1962_v41 = vld [vmem:[%s2360_s29 + $0x6] sm:$0x1] }
  0xc9   : > { %2064 = vtanh.f32 %v562_v39  ;;  %v1956_v47 = vmul.f32 -1.442695, %v562_v39  ;;  %v701_v39 = vstv %s700_s8  ;;  %s1352_s8 = scvt.s32.f32 %s1351_s27  ;;  %s931_s27 = sadd.s32 2, %s2339_s11 }
  0xca   : > { %2066 = vtanh.f32 %v474_v42  ;;  %v1944_v48 = vmul.f32 -1.442695, %v474_v42  ;;  %v702_v40 = vmul.f32 %v701_v39, %v2411_v28  ;;  %v705_v42 = vunpack.c.l.bf16 %v1962_v41  ;;  %p932_p11 = scmp.lt.s32.totalorder %s931_s27, 10 }
  0xcb   : > { %2068 = vpow2.f32 %v1956_v47 }
  0xcc   : > { %2070 = vpow2.f32 %v1944_v48 }
  0xce   : > { %v560_v43 = vpop.f32.mrf.mxu1 }
  0xcf   : > { %v2065_v44 = vpop.eup %2064  ;;  %v472_v45 = vpop.f32.mrf.mxu0  ;;  %v707_v43 = vperm.slane %v702_v40, 0 }
  0xd0   : > { %589 = vrot.lane.b32.xlu0 %v2065_v44, %s2234_s30  ;;  %v2067_v46 = vpop.eup %2066  ;;  %v1959_v44 = vld [vmem:[%s2358_s26 + $0x1] sm:$0x1] }
  0xd1   : > { %v2069_v49 = vpop.eup %2068  ;;  %v709_v45 = vadd.f32 %v707_v43, %v705_v42 }
  0xd2   : > { %v566_v50 = vadd.f32 1.0, %v2069_v49  ;;  %v2071_v51 = vpop.eup %2070 }
  0xd3   : > { %v478_v52 = vadd.f32 1.0, %v2071_v51 }
  0xd4   : > { %2072 = vrcp.f32 %v566_v50  ;;  %v578_v61 = vand.u32 2147483648, %v566_v50  ;;  %vm572_vm3 = vweird.f32 %v566_v50  ;;  %v576_v62 = vand.u32 2147483647, %v566_v50 }
  0xd5   : > { %2074 = vrcp.f32 %v478_v52  ;;  %vm484_vm6 = vweird.f32 %v478_v52  ;;  %v490_v3 = vand.u32 2147483648, %v478_v52  ;;  %v488_v6 = vand.u32 2147483647, %v478_v52 }
  0xd6   : > { %v579_v1 = vor.u32 1.1754944e-38, %v578_v61  ;;  %vm577_vm5 = vcmp.eq.f32.partialorder %v576_v62, 8.507059e+37 }
  0xd7   : > { %v491_v8 = vor.u32 1.1754944e-38, %v490_v3  ;;  %vm489_vm9 = vcmp.eq.f32.partialorder %v488_v6, 8.507059e+37 }
  0xd8   : > { %501 = vrot.lane.b32.xlu0 %v2067_v46, %s2234_s30  ;;  %v637_v46 = vunpack.c.l.bf16 %v1959_v44 }
  0xda   : > { %v2073_v53 = vpop.eup %2072  ;;  %v638_v49 = vadd.f32 %v637_v46, %v2416_v37 }
  0xdb   : > { %v568_v54 = vmul.f32 %v2073_v53, %v566_v50  ;;  %v2075_v56 = vpop.eup %2074  ;;  %vm573_vm2 = vweird.f32 %v2073_v53 }
  0xdc   : > { %v480_v58 = vmul.f32 %v2075_v56, %v478_v52  ;;  %vm574_vm4 = vmor %vm572_vm3, %vm573_vm2  ;;  %vm485_vm7 = vweird.f32 %v2075_v56 }
  0xdd   : > { %v569_v55 = vsub.f32 1.0, %v568_v54  ;;  %vm486_vm8 = vmor %vm484_vm6, %vm485_vm7 }
  0xde   : > { %v481_v60 = vsub.f32 1.0, %v480_v58 }
  0xdf   : > { %v570_v57 = vmul.f32 %v2073_v53, %v569_v55 }
  0xe0   : > { %v482_v0 = vmul.f32 %v2075_v56, %v481_v60 }
  0xe1   : > { %v571_v59 = vadd.f32 %v2073_v53, %v570_v57 }
  0xe2   : > { %v483_v5 = vadd.f32 %v2075_v56, %v482_v0 }
  0xe3   : > { %v575_v63 = vsel %vm574_vm4, %v2073_v53, %v571_v59 }
  0xe4   : > { %v580_v2 = vsel %vm577_vm5, %v579_v1, %v575_v63  ;;  %v487_v9 = vsel %vm486_vm8, %v2075_v56, %v483_v5 }
  0xe5   : > { %v492_v10 = vsel %vm489_vm9, %v491_v8, %v487_v9  ;;  %v587_v22 = vmul.f32 %v585_v20, %v580_v2 }
  0xe6   : > { %v499_v14 = vmul.f32 %v497_v13, %v492_v10 }
 0x142   : > { %v590_v4 = vpop.permute.xlu0 %589 }
 0x143   : > { %v592_v7 = vmul.f32 %v590_v4, %v580_v2 }
 0x145   : > { %594 = vrot.lane.b32.xlu1 %v592_v7, %s2233_s22 }
 0x14a   : > { %v502_v11 = vpop.permute.xlu0 %501 }
 0x14b   : > { %v504_v12 = vmul.f32 %v502_v11, %v492_v10 }
 0x14d   : > { %506 = vrot.lane.b32.xlu2 %v504_v12, %s2233_s22 }
 0x1a7   : > { %v507_v15 = vpop.permute.xlu2 %506 }
 0x1a8   : > { %v2423_v16 = vadd.f32 %v507_v15, %v499_v14 }
 0x1aa   : > { %2076 = vtanh.f32 %v2423_v16 }
 0x1b0   : > { %v2077_v21 = vpop.eup %2076 }
 0x1b1   : > { %512 = vrot.lane.b32.xlu1 %v2077_v21, %s2234_s30 }
 0x1b7   : > { %v595_v24 = vpop.permute.xlu1 %594 }
 0x1b8   : > { %v2427_v25 = vadd.f32 %v595_v24, %v587_v22 }
 0x1ba   : > { %2078 = vtanh.f32 %v2427_v25 }
 0x1c0   : > { %v2079_v26 = vpop.eup %2078 }
 0x1c1   : > { %600 = vrot.lane.b32.xlu0 %v2079_v26, %s2234_s30 }
 0x223   : > { %v513_v27 = vpop.permute.xlu1 %512 }
 0x224   : > { %v2431_v29 = vmul.f32 %v513_v27, %v492_v10 }
 0x226   : > { %v639_v30 = vpack.c.bf16 %v2431_v29, %v2431_v29 }
 0x228   : > { %641 = vrot.lane.b32.xlu0 %v639_v30, %s2233_s22 }
 0x233   : > { %v601_v31 = vpop.permute.xlu0 %600 }
 0x234   : > { %v603_v32 = vmul.f32 %v601_v31, %v580_v2 }
 0x236   : > { %v2436_v33 = vpack.c.bf16 %v603_v32, %v603_v32 }
 0x238   : > { %v710_v34 = vunpack.c.l.b16 %v2436_v33 }
 0x23a   : > { %v711_v35 = vpack.c.b16 %v710_v34, %v710_v34 }
 0x23c   : > { %712 = vrot.lane.b32.xlu2 %v711_v35, %s2233_s22 }
 0x296   : > { %v713_v36 = vpop.permute.xlu2 %712 }
 0x297   : > { %1963 = vmatmul.msk.bf16.vlgmr.msra.gmra.mxu3 %vm457_vm1, %v713_v36 }
 0x298   : > { %1375 = vmatpush.bf16.msra.mxu3 %v2366_v17 }
 0x29a   : > { %v642_v38 = vpop.permute.xlu0 %641 }
 0x29b   : > { %1960 = vmatmul.msk.bf16.vlgmr.msra.gmra.mxu2 %vm457_vm1, %v642_v38 }
 0x29c   : > { %1304 = vmatpush.bf16.msra.mxu2 %v2376_v19  ;;  %1376 = vmatpush.bf16.msra.mxu3 %v2371_v18 }
 0x2a0   : > { %1305 = vmatpush.bf16.msra.mxu2 %v2384_v23 }
 0x31a   : > { %v726_v47 = vpop.f32.mrf.mxu3 }
 0x31b   : > { %v730_v48 = vadd.f32 %v726_v47, %v709_v45 }
 0x31d   : > { %2080 = vtanh.f32 %v730_v48  ;;  %v1964_v59 = vmul.f32 -1.442695, %v730_v48  ;;  %v1967_v48 = vld [vmem:[%s2358_s26 + $0x2] sm:$0x1] }
 0x31e   : > { %v655_v50 = vpop.f32.mrf.mxu2 }
 0x31f   : > { %v659_v51 = vadd.f32 %v655_v50, %v638_v49  ;;  %v800_v49 = vunpack.c.l.bf16 %v1967_v48 }
 0x321   : > { %2082 = vtanh.f32 %v659_v51  ;;  %v1961_v56 = vmul.f32 -1.442695, %v659_v51  ;;  %v801_v50 = vadd.f32 %v800_v49, %v2416_v37 }
 0x322   : > { %v728_v52 = vpop.f32.mrf.mxu3 }
 0x323   : > { %v2081_v53 = vpop.eup %2080  ;;  %2084 = vpow2.f32 %v1961_v56 }
 0x324   : > { %753 = vrot.lane.b32.xlu1 %v2081_v53, %s2234_s30 }
 0x326   : > { %v657_v54 = vpop.f32.mrf.mxu2 }
 0x327   : > { %v2083_v55 = vpop.eup %2082 }
 0x328   : > { %682 = vrot.lane.b32.xlu2 %v2083_v55, %s2234_s30  ;;  %v864_v55 = vstv %s863_s10  ;;  %s1515_s10 = scvt.s32.f32 %s1514_s23  ;;  %s1420_s23 = sadd.s32 5, %s2339_s11 }
 0x329   : > { %v2085_v57 = vpop.eup %2084  ;;  %v865_v56 = vmul.f32 %v864_v55, %v2411_v28  ;;  %p1421_p12 = scmp.lt.s32.totalorder %s1420_s23, 10 }
 0x32a   : > { %v663_v58 = vadd.f32 1.0, %v2085_v57  ;;  %v1970_v57 = vld [vmem:[%s2360_s29 + $0x5] sm:$0x1] }
 0x32c   : > { %2086 = vrcp.f32 %v663_v58  ;;  %v675_v3 = vand.u32 2147483648, %v663_v58  ;;  %vm669_vm11 = vweird.f32 %v663_v58  ;;  %v673_v4 = vand.u32 2147483647, %v663_v58 }
 0x32d   : > { %2088 = vpow2.f32 %v1964_v59  ;;  %v870_v59 = vperm.slane %v865_v56, 0 }
 0x32e   : > { %v676_v7 = vor.u32 1.1754944e-38, %v675_v3  ;;  %vm674_vm13 = vcmp.eq.f32.partialorder %v673_v4, 8.507059e+37 }
 0x332   : > { %v2087_v60 = vpop.eup %2086 }
 0x333   : > { %v665_v61 = vmul.f32 %v2087_v60, %v663_v58  ;;  %v2089_v62 = vpop.eup %2088  ;;  %vm670_vm10 = vweird.f32 %v2087_v60  ;;  %v868_v58 = vunpack.c.l.bf16 %v1970_v57 }
 0x334   : > { %v734_v0 = vadd.f32 1.0, %v2089_v62  ;;  %vm671_vm12 = vmor %vm669_vm11, %vm670_vm10 }
 0x335   : > { %v666_v63 = vsub.f32 1.0, %v665_v61 }
 0x336   : > { %2090 = vrcp.f32 %v734_v0  ;;  %v746_v15 = vand.u32 2147483648, %v734_v0  ;;  %vm740_vm15 = vweird.f32 %v734_v0  ;;  %v744_v20 = vand.u32 2147483647, %v734_v0 }
 0x337   : > { %v667_v1 = vmul.f32 %v2087_v60, %v666_v63 }
 0x338   : > { %v747_v22 = vor.u32 1.1754944e-38, %v746_v15  ;;  %vm745_vm2 = vcmp.eq.f32.partialorder %v744_v20, 8.507059e+37 }
 0x339   : > { %v668_v2 = vadd.f32 %v2087_v60, %v667_v1 }
 0x33b   : > { %v672_v5 = vsel %vm671_vm12, %v2087_v60, %v668_v2  ;;  %v872_v60 = vadd.f32 %v870_v59, %v868_v58  ;;  %v1975_v59 = vld [vmem:[%s2358_s26 + $0x3] sm:$0x1] }
 0x33c   : > { %v2091_v6 = vpop.eup %2090  ;;  %v677_v9 = vsel %vm674_vm13, %v676_v7, %v672_v5 }
 0x33d   : > { %v736_v11 = vmul.f32 %v2091_v6, %v734_v0  ;;  %vm741_vm14 = vweird.f32 %v2091_v6  ;;  %v680_v30 = vmul.f32 %v677_v9, %v2423_v16 }
 0x33e   : > { %vm742_vm0 = vmor %vm740_vm15, %vm741_vm14 }
 0x33f   : > { %v737_v12 = vsub.f32 1.0, %v736_v11 }
 0x341   : > { %v738_v13 = vmul.f32 %v2091_v6, %v737_v12 }
 0x343   : > { %v739_v14 = vadd.f32 %v2091_v6, %v738_v13 }
 0x345   : > { %v743_v21 = vsel %vm742_vm0, %v2091_v6, %v739_v14 }
 0x346   : > { %v748_v24 = vsel %vm745_vm2, %v747_v22, %v743_v21 }
 0x347   : > { %v751_v35 = vmul.f32 %v748_v24, %v2427_v25 }
 0x382   : > { %v683_v8 = vpop.permute.xlu2 %682 }
 0x383   : > { %v685_v10 = vmul.f32 %v683_v8, %v677_v9 }
 0x385   : > { %687 = vrot.lane.b32.xlu1 %v685_v10, %s2233_s22 }
 0x396   : > { %v754_v26 = vpop.permute.xlu1 %753 }
 0x397   : > { %v756_v27 = vmul.f32 %v754_v26, %v748_v24 }
 0x399   : > { %758 = vrot.lane.b32.xlu0 %v756_v27, %s2233_s22 }
 0x3f7   : > { %v688_v31 = vpop.permute.xlu1 %687 }
 0x3f8   : > { %v2456_v32 = vadd.f32 %v688_v31, %v680_v30 }
 0x3fa   : > { %2092 = vtanh.f32 %v2456_v32 }
 0x400   : > { %v2093_v34 = vpop.eup %2092 }
 0x401   : > { %693 = vrot.lane.b32.xlu0 %v2093_v34, %s2234_s30 }
 0x40b   : > { %v759_v36 = vpop.permute.xlu0 %758 }
 0x40c   : > { %v2461_v38 = vadd.f32 %v759_v36, %v751_v35 }
 0x40e   : > { %2094 = vtanh.f32 %v2461_v38 }
 0x414   : > { %v2095_v39 = vpop.eup %2094 }
 0x415   : > { %764 = vrot.lane.b32.xlu2 %v2095_v39, %s2234_s30 }
 0x46f   : > { %v765_v40 = vpop.permute.xlu2 %764 }
 0x470   : > { %v767_v16 = vmul.f32 %v765_v40, %v748_v24 }
 0x472   : > { %v2465_v41 = vpack.c.bf16 %v767_v16, %v767_v16 }
 0x473   : > { %v694_v42 = vpop.permute.xlu0 %693 }
 0x474   : > { %v2467_v43 = vmul.f32 %v694_v42, %v677_v9  ;;  %v873_v44 = vunpack.c.l.b16 %v2465_v41 }
 0x476   : > { %v802_v25 = vpack.c.bf16 %v2467_v43, %v2467_v43  ;;  %v874_v45 = vpack.c.b16 %v873_v44, %v873_v44 }
 0x478   : > { %875 = vrot.lane.b32.xlu1 %v874_v45, %s2233_s22  ;;  %804 = vrot.lane.b32.xlu2 %v802_v25, %s2233_s22 }
 0x4d2   : > { %v805_v46 = vpop.permute.xlu2 %804 }
 0x4d3   : > { %1968 = vmatmul.msk.bf16.vlgmr.msrb.gmra.mxu0 %vm457_vm1, %v805_v46 }
 0x4d4   : > { %1467 = vmatpush.bf16.msrb.mxu0 %v2376_v19 }
 0x4d8   : > { %1468 = vmatpush.bf16.msrb.mxu0 %v2384_v23 }
 0x4ea   : > { %v876_v47 = vpop.permute.xlu1 %875 }
 0x4eb   : > { %1971 = vmatmul.msk.bf16.vlgmr.msrb.gmra.mxu1 %vm457_vm1, %v876_v47 }
 0x4ec   : > { %1538 = vmatpush.bf16.msrb.mxu1 %v2366_v17 }
 0x4f0   : > { %1539 = vmatpush.bf16.msrb.mxu1 %v2371_v18 }
 0x550   : > { %v818_v51 = vpop.f32.mrf.mxu0 }
 0x551   : > { %v822_v52 = vadd.f32 %v818_v51, %v801_v50 }
 0x553   : > { %2096 = vtanh.f32 %v822_v52  ;;  %v1969_v1 = vmul.f32 -1.442695, %v822_v52 }
 0x558   : > { %v820_v53 = vpop.f32.mrf.mxu0 }
 0x559   : > { %v2097_v54 = vpop.eup %2096 }
 0x55a   : > { %845 = vrot.lane.b32.xlu1 %v2097_v54, %s2234_s30 }
 0x568   : > { %v889_v61 = vpop.f32.mrf.mxu1 }
 0x569   : > { %v893_v62 = vadd.f32 %v889_v61, %v872_v60  ;;  %v963_v60 = vunpack.c.l.bf16 %v1975_v59 }
 0x56b   : > { %2098 = vtanh.f32 %v893_v62  ;;  %v1972_v5 = vmul.f32 -1.442695, %v893_v62  ;;  %v964_v61 = vadd.f32 %v963_v60, %v2416_v37 }
 0x56c   : > { %2100 = vpow2.f32 %v1969_v1 }
 0x570   : > { %v891_v63 = vpop.f32.mrf.mxu1 }
 0x571   : > { %v2099_v0 = vpop.eup %2098 }
 0x572   : > { %916 = vrot.lane.b32.xlu0 %v2099_v0, %s2234_s30  ;;  %v2101_v2 = vpop.eup %2100  ;;  %v1027_v0 = vstv %s1026_s15 }
 0x573   : > { %v826_v3 = vadd.f32 1.0, %v2101_v2 }
 0x575   : > { %2102 = vrcp.f32 %v826_v3  ;;  %v838_v12 = vand.u32 2147483648, %v826_v3  ;;  %vm832_vm4 = vweird.f32 %v826_v3  ;;  %v836_v13 = vand.u32 2147483647, %v826_v3 }
 0x576   : > { %2104 = vpow2.f32 %v1972_v5 }
 0x577   : > { %v839_v15 = vor.u32 1.1754944e-38, %v838_v12  ;;  %vm837_vm6 = vcmp.eq.f32.partialorder %v836_v13, 8.507059e+37 }
 0x57b   : > { %v2103_v4 = vpop.eup %2102 }
 0x57c   : > { %v828_v6 = vmul.f32 %v2103_v4, %v826_v3  ;;  %v2105_v8 = vpop.eup %2104  ;;  %vm833_vm3 = vweird.f32 %v2103_v4 }
 0x57d   : > { %v897_v10 = vadd.f32 1.0, %v2105_v8  ;;  %vm834_vm5 = vmor %vm832_vm4, %vm833_vm3 }
 0x57e   : > { %v829_v7 = vsub.f32 1.0, %v828_v6 }
 0x57f   : > { %2106 = vrcp.f32 %v897_v10  ;;  %v909_v34 = vand.u32 2147483648, %v897_v10  ;;  %vm903_vm8 = vweird.f32 %v897_v10  ;;  %v907_v35 = vand.u32 2147483647, %v897_v10 }
 0x580   : > { %v830_v9 = vmul.f32 %v2103_v4, %v829_v7 }
 0x581   : > { %v910_v39 = vor.u32 1.1754944e-38, %v909_v34  ;;  %vm908_vm10 = vcmp.eq.f32.partialorder %v907_v35, 8.507059e+37 }
 0x582   : > { %v831_v11 = vadd.f32 %v2103_v4, %v830_v9 }
 0x584   : > { %v835_v14 = vsel %vm834_vm5, %v2103_v4, %v831_v11 }
 0x585   : > { %v840_v21 = vsel %vm837_vm6, %v839_v15, %v835_v14  ;;  %v2107_v24 = vpop.eup %2106 }
 0x586   : > { %v899_v26 = vmul.f32 %v2107_v24, %v897_v10  ;;  %vm904_vm7 = vweird.f32 %v2107_v24  ;;  %v843_v25 = vmul.f32 %v840_v21, %v2456_v32 }
 0x587   : > { %vm905_vm9 = vmor %vm903_vm8, %vm904_vm7 }
 0x588   : > { %v900_v27 = vsub.f32 1.0, %v899_v26 }
 0x58a   : > { %v901_v30 = vmul.f32 %v2107_v24, %v900_v27 }
 0x58c   : > { %v902_v31 = vadd.f32 %v2107_v24, %v901_v30 }
 0x58e   : > { %v906_v36 = vsel %vm905_vm9, %v2107_v24, %v902_v31 }
 0x58f   : > { %v911_v16 = vsel %vm908_vm10, %v910_v39, %v906_v36 }
 0x590   : > { %v914_v44 = vmul.f32 %v911_v16, %v2461_v38 }
 0x5cc   : > { %v846_v20 = vpop.permute.xlu1 %845 }
 0x5cd   : > { %v848_v22 = vmul.f32 %v846_v20, %v840_v21 }
 0x5cf   : > { %850 = vrot.lane.b32.xlu0 %v848_v22, %s2233_s22 }
 0x5e4   : > { %v917_v40 = vpop.permute.xlu0 %916 }
 0x5e5   : > { %v919_v42 = vmul.f32 %v917_v40, %v911_v16 }
 0x5e7   : > { %921 = vrot.lane.b32.xlu2 %v919_v42, %s2233_s22 }
 0x641   : > { %v922_v45 = vpop.permute.xlu2 %921  ;;  %v851_v46 = vpop.permute.xlu0 %850 }
 0x642   : > { %v2491_v47 = vadd.f32 %v922_v45, %v914_v44  ;;  %v2493_v48 = vadd.f32 %v851_v46, %v843_v25 }
 0x644   : > { %2108 = vtanh.f32 %v2491_v47 }
 0x645   : > { %2110 = vtanh.f32 %v2493_v48 }
 0x64a   : > { %v2109_v49 = vpop.eup %2108 }
 0x64b   : > { %v2111_v50 = vpop.eup %2110  ;;  %927 = vrot.lane.b32.xlu1 %v2109_v49, %s2234_s30 }
 0x64c   : > { %856 = vrot.lane.b32.xlu2 %v2111_v50, %s2234_s30 }
 0x6a6   : > { %v857_v51 = vpop.permute.xlu2 %856 }
 0x6a7   : > { %v2499_v38 = vmul.f32 %v857_v51, %v840_v21 }
 0x6a9   : > { %v965_v32 = vpack.c.bf16 %v2499_v38, %v2499_v38 }
 0x6ab   : > { %967 = vrot.lane.b32.xlu0 %v965_v32, %s2233_s22 }
 0x6bd   : > { %v928_v52 = vpop.permute.xlu1 %927 }
 0x6be   : > { %v930_v53 = vmul.f32 %v928_v52, %v911_v16 }
 0x6c0   : > { %v2504_v54 = vpack.c.bf16 %v930_v53, %v930_v53 }
 0x6c2   : > { %v1036_v55 = vunpack.c.l.b16 %v2504_v54 }
 0x6c4   : > { %v1037_v56 = vpack.c.b16 %v1036_v55, %v1036_v55 }
 0x6c6   : > { %1038 = vrot.lane.b32.xlu1 %v1037_v56, %s2233_s22 }
 0x71d   : > { %v968_v57 = vpop.permute.xlu0 %967 }
 0x71e   : > { %1976 = vmatmul.msk.bf16.vlgmr.msrb.gmra.mxu2 %vm457_vm1, %v968_v57 }
 0x71f   : > { %1630 = vmatpush.bf16.msrb.mxu2 %v2376_v19 }
 0x723   : > { %1631 = vmatpush.bf16.msrb.mxu2 %v2384_v23 }
 0x738   : > { %v1039_v58 = vpop.permute.xlu1 %1038 }
 0x739   : > { %1979 = vmatmul.msk.bf16.vlgmr.msrb.gmra.mxu3 %vm457_vm1, %v1039_v58 }
 0x73a   : > { %1699 = vmatpush.bf16.msrb.mxu3 %v2366_v17  ;;  %v1028_v17 = vmul.f32 %v1027_v0, %v2411_v28 }
 0x73c   : > { %v1033_v2 = vperm.slane %v1028_v17, 0 }
 0x73e   : > { %1700 = vmatpush.bf16.msrb.mxu3 %v2371_v18  ;;  %v1978_v18 = vld [vmem:[%s2360_s29 + $0x4] sm:$0x1] }
 0x73f   : > { %v1031_v1 = vunpack.c.l.bf16 %v1978_v18  ;;  %v1983_v18 = vld [vmem:[%s2358_s26 + $0x4] sm:$0x1] }
 0x741   : > { %v1035_v3 = vadd.f32 %v1033_v2, %v1031_v1  ;;  %v1126_v1 = vunpack.c.l.bf16 %v1983_v18 }
 0x743   : > { %v1127_v2 = vadd.f32 %v1126_v1, %v2416_v37 }
 0x7a1   : > { %v981_v62 = vpop.f32.mrf.mxu2 }
 0x7a2   : > { %v985_v63 = vadd.f32 %v981_v62, %v964_v61 }
 0x7a4   : > { %2112 = vtanh.f32 %v985_v63  ;;  %v1977_v8 = vmul.f32 -1.442695, %v985_v63 }
 0x7a9   : > { %v983_v19 = vpop.f32.mrf.mxu2 }
 0x7aa   : > { %v2113_v23 = vpop.eup %2112 }
 0x7ab   : > { %1008 = vrot.lane.b32.xlu2 %v2113_v23, %s2234_s30 }
 0x7bc   : > { %v1052_v4 = vpop.f32.mrf.mxu3 }
 0x7bd   : > { %v1056_v5 = vadd.f32 %v1052_v4, %v1035_v3 }
 0x7bf   : > { %2114 = vtanh.f32 %v1056_v5  ;;  %v1980_v31 = vmul.f32 -1.442695, %v1056_v5 }
 0x7c0   : > { %2116 = vpow2.f32 %v1977_v8 }
 0x7c4   : > { %v1054_v6 = vpop.f32.mrf.mxu3 }
 0x7c5   : > { %v2115_v7 = vpop.eup %2114 }
 0x7c6   : > { %1079 = vrot.lane.b32.xlu0 %v2115_v7, %s2234_s30  ;;  %v2117_v9 = vpop.eup %2116  ;;  %v1190_v7 = vstv %s1189_s17  ;;  %s1585_s17 = scalar_select %p1584_p10, 1, 0 }
 0x7c7   : > { %v989_v10 = vadd.f32 1.0, %v2117_v9  ;;  %v1191_v8 = vmul.f32 %v1190_v7, %v2411_v28  ;;  %v1986_v9 = vld [vmem:[%s2360_s29 + $0x3] sm:$0x1] }
 0x7c8   : > { %s1586_s6 = scvt.s32.f32 %s1585_s17 }
 0x7c9   : > { %2118 = vrcp.f32 %v989_v10  ;;  %v1001_v20 = vand.u32 2147483648, %v989_v10  ;;  %vm995_vm12 = vweird.f32 %v989_v10  ;;  %v999_v21 = vand.u32 2147483647, %v989_v10 }
 0x7ca   : > { %2120 = vpow2.f32 %v1980_v31 }
 0x7cb   : > { %v1002_v24 = vor.u32 1.1754944e-38, %v1001_v20  ;;  %vm1000_vm14 = vcmp.eq.f32.partialorder %v999_v21, 8.507059e+37 }
 0x7cf   : > { %v2119_v11 = vpop.eup %2118 }
 0x7d0   : > { %v991_v12 = vmul.f32 %v2119_v11, %v989_v10  ;;  %vm996_vm11 = vweird.f32 %v2119_v11  ;;  %v2121_v34 = vpop.eup %2120  ;;  %v1194_v10 = vunpack.c.l.bf16 %v1986_v9 }
 0x7d1   : > { %vm997_vm13 = vmor %vm995_vm12, %vm996_vm11  ;;  %v1060_v35 = vadd.f32 1.0, %v2121_v34 }
 0x7d2   : > { %v992_v13 = vsub.f32 1.0, %v991_v12 }
 0x7d3   : > { %2122 = vrcp.f32 %v1060_v35  ;;  %v1072_v44 = vand.u32 2147483648, %v1060_v35  ;;  %vm1066_vm0 = vweird.f32 %v1060_v35  ;;  %v1070_v25 = vand.u32 2147483647, %v1060_v35 }
 0x7d4   : > { %v993_v14 = vmul.f32 %v2119_v11, %v992_v13 }
 0x7d5   : > { %v1073_v46 = vor.u32 1.1754944e-38, %v1072_v44  ;;  %vm1071_vm3 = vcmp.eq.f32.partialorder %v1070_v25, 8.507059e+37 }
 0x7d6   : > { %v994_v15 = vadd.f32 %v2119_v11, %v993_v14 }
 0x7d8   : > { %v998_v22 = vsel %vm997_vm13, %v2119_v11, %v994_v15  ;;  %v1196_v11 = vperm.slane %v1191_v8, 0 }
 0x7d9   : > { %v1003_v27 = vsel %vm1000_vm14, %v1002_v24, %v998_v22  ;;  %v2123_v36 = vpop.eup %2122 }
 0x7da   : > { %v1062_v39 = vmul.f32 %v2123_v36, %v1060_v35  ;;  %vm1067_vm15 = vweird.f32 %v2123_v36  ;;  %v1006_v32 = vmul.f32 %v1003_v27, %v2493_v48  ;;  %v1198_v12 = vadd.f32 %v1196_v11, %v1194_v10  ;;  %v1991_v11 = vld [vmem:[%s2358_s26 + $0x5] sm:$0x1] }
 0x7db   : > { %vm1068_vm2 = vmor %vm1066_vm0, %vm1067_vm15 }
 0x7dc   : > { %v1063_v40 = vsub.f32 1.0, %v1062_v39 }
 0x7de   : > { %v1064_v16 = vmul.f32 %v2123_v36, %v1063_v40 }
 0x7e0   : > { %v1065_v42 = vadd.f32 %v2123_v36, %v1064_v16 }
 0x7e2   : > { %v1069_v45 = vsel %vm1068_vm2, %v2123_v36, %v1065_v42 }
 0x7e3   : > { %v1074_v49 = vsel %vm1071_vm3, %v1073_v46, %v1069_v45 }
 0x7e4   : > { %v1077_v56 = vmul.f32 %v1074_v49, %v2491_v47 }
 0x805   : > { %v1009_v26 = vpop.permute.xlu2 %1008 }
 0x806   : > { %v1011_v30 = vmul.f32 %v1009_v26, %v1003_v27 }
 0x808   : > { %1013 = vrot.lane.b32.xlu1 %v1011_v30, %s2233_s22 }
 0x838   : > { %v1080_v50 = vpop.permute.xlu0 %1079 }
 0x839   : > { %v1082_v51 = vmul.f32 %v1080_v50, %v1074_v49 }
 0x83b   : > { %1084 = vrot.lane.b32.xlu2 %v1082_v51, %s2233_s22 }
 0x87a   : > { %v1014_v52 = vpop.permute.xlu1 %1013 }
 0x87b   : > { %v2524_v53 = vadd.f32 %v1014_v52, %v1006_v32 }
 0x87d   : > { %2124 = vtanh.f32 %v2524_v53 }
 0x883   : > { %v2125_v55 = vpop.eup %2124 }
 0x884   : > { %1019 = vrot.lane.b32.xlu0 %v2125_v55, %s2234_s30 }
 0x895   : > { %v1085_v57 = vpop.permute.xlu2 %1084 }
 0x896   : > { %v2529_v58 = vadd.f32 %v1085_v57, %v1077_v56 }
 0x898   : > { %2126 = vtanh.f32 %v2529_v58 }
 0x89e   : > { %v2127_v59 = vpop.eup %2126 }
 0x89f   : > { %1090 = vrot.lane.b32.xlu1 %v2127_v59, %s2234_s30 }
 0x8f6   : > { %v1020_v48 = vpop.permute.xlu0 %1019 }
 0x8f7   : > { %v2533_v60 = vmul.f32 %v1020_v48, %v1003_v27 }
 0x8f9   : > { %v1128_v61 = vpack.c.bf16 %v2533_v60, %v2533_v60 }
 0x8fb   : > { %1130 = vrot.lane.b32.xlu2 %v1128_v61, %s2233_s22 }
 0x911   : > { %v1091_v62 = vpop.permute.xlu1 %1090 }
 0x912   : > { %v1093_v63 = vmul.f32 %v1091_v62, %v1074_v49 }
 0x914   : > { %v2538_v47 = vpack.c.bf16 %v1093_v63, %v1093_v63 }
 0x916   : > { %v1199_v19 = vunpack.c.l.b16 %v2538_v47 }
 0x918   : > { %v1200_v23 = vpack.c.b16 %v1199_v19, %v1199_v19 }
 0x91a   : > { %1201 = vrot.lane.b32.xlu0 %v1200_v23, %s2233_s22 }
 0x955   : > { %v1131_v0 = vpop.permute.xlu2 %1130 }
 0x956   : > { %1984 = vmatmul.msk.bf16.vlgmr.msra.gmra.mxu0 %vm457_vm1, %v1131_v0 }
 0x98c   : > { %v1202_v17 = vpop.permute.xlu0 %1201 }
 0x98d   : > { %1987 = vmatmul.msk.bf16.vlgmr.msra.gmra.mxu1 %vm457_vm1, %v1202_v17 }
 0x9d3   : > { %v1144_v3 = vpop.f32.mrf.mxu0 }
 0x9d4   : > { %v1148_v4 = vadd.f32 %v1144_v3, %v1127_v2 }
 0x9d6   : > { %2128 = vtanh.f32 %v1148_v4  ;;  %v1985_v21 = vmul.f32 -1.442695, %v1148_v4 }
 0x9db   : > { %v1146_v5 = vpop.f32.mrf.mxu0 }
 0x9dc   : > { %v2129_v6 = vpop.eup %2128 }
 0x9dd   : > { %1171 = vrot.lane.b32.xlu1 %v2129_v6, %s2234_s30 }
 0xa0a   : > { %v1215_v13 = vpop.f32.mrf.mxu1 }
 0xa0b   : > { %v1219_v14 = vadd.f32 %v1215_v13, %v1198_v12  ;;  %v1289_v12 = vunpack.c.l.bf16 %v1991_v11 }
 0xa0d   : > { %2130 = vtanh.f32 %v1219_v14  ;;  %v1988_v31 = vmul.f32 -1.442695, %v1219_v14  ;;  %v1290_v13 = vadd.f32 %v1289_v12, %v2416_v37 }
 0xa0e   : > { %2132 = vpow2.f32 %v1985_v21 }
 0xa12   : > { %v1217_v15 = vpop.f32.mrf.mxu1 }
 0xa13   : > { %v2131_v20 = vpop.eup %2130 }
 0xa14   : > { %1242 = vrot.lane.b32.xlu2 %v2131_v20, %s2234_s30  ;;  %v2133_v22 = vpop.eup %2132 }
 0xa15   : > { %v1152_v24 = vadd.f32 1.0, %v2133_v22  ;;  %v1353_v22 = vstv %s1352_s8  ;;  %s933_s8 = scalar_select %p932_p11, 1, 0 }
 0xa17   : > { %2134 = vrcp.f32 %v1152_v24  ;;  %v1164_v36 = vand.u32 2147483648, %v1152_v24  ;;  %vm1158_vm5 = vweird.f32 %v1152_v24  ;;  %v1162_v39 = vand.u32 2147483647, %v1152_v24  ;;  %s934_s9 = scvt.s32.f32 %s933_s8 }
 0xa18   : > { %2136 = vpow2.f32 %v1988_v31 }
 0xa19   : > { %v1165_v42 = vor.u32 1.1754944e-38, %v1164_v36  ;;  %vm1163_vm7 = vcmp.eq.f32.partialorder %v1162_v39, 8.507059e+37 }
 0xa1d   : > { %v2135_v26 = vpop.eup %2134 }
 0xa1e   : > { %v1154_v27 = vmul.f32 %v2135_v26, %v1152_v24  ;;  %vm1159_vm4 = vweird.f32 %v2135_v26  ;;  %v2137_v40 = vpop.eup %2136  ;;  %v1354_v24 = vmul.f32 %v1353_v22, %v2411_v28 }
 0xa1f   : > { %vm1160_vm6 = vmor %vm1158_vm5, %vm1159_vm4  ;;  %v1223_v44 = vadd.f32 1.0, %v2137_v40 }
 0xa20   : > { %v1155_v30 = vsub.f32 1.0, %v1154_v27 }
 0xa21   : > { %2138 = vrcp.f32 %v1223_v44  ;;  %v1235_v55 = vand.u32 2147483648, %v1223_v44  ;;  %vm1229_vm9 = vweird.f32 %v1223_v44  ;;  %v1233_v56 = vand.u32 2147483647, %v1223_v44 }
 0xa22   : > { %v1156_v34 = vmul.f32 %v2135_v26, %v1155_v30  ;;  %v1359_v30 = vperm.slane %v1354_v24, 0 }
 0xa23   : > { %v1236_v59 = vor.u32 1.1754944e-38, %v1235_v55  ;;  %vm1234_vm11 = vcmp.eq.f32.partialorder %v1233_v56, 8.507059e+37 }
 0xa24   : > { %v1157_v35 = vadd.f32 %v2135_v26, %v1156_v34 }
 0xa26   : > { %v1161_v16 = vsel %vm1160_vm6, %v2135_v26, %v1157_v35  ;;  %v1994_v26 = vld [vmem:[%s2360_s29 + $0x2] sm:$0x1] }
 0xa27   : > { %v1166_v45 = vsel %vm1163_vm7, %v1165_v42, %v1161_v16  ;;  %v2139_v49 = vpop.eup %2138  ;;  %v1357_v27 = vunpack.c.l.bf16 %v1994_v26 }
 0xa28   : > { %v1225_v50 = vmul.f32 %v2139_v49, %v1223_v44  ;;  %vm1230_vm8 = vweird.f32 %v2139_v49  ;;  %v1169_v63 = vmul.f32 %v1166_v45, %v2524_v53 }
 0xa29   : > { %vm1231_vm10 = vmor %vm1229_vm9, %vm1230_vm8  ;;  %v1361_v31 = vadd.f32 %v1359_v30, %v1357_v27 }
 0xa2a   : > { %v1226_v51 = vsub.f32 1.0, %v1225_v50 }
 0xa2c   : > { %v1227_v32 = vmul.f32 %v2139_v49, %v1226_v51 }
 0xa2e   : > { %v1228_v52 = vadd.f32 %v2139_v49, %v1227_v32 }
 0xa30   : > { %v1232_v57 = vsel %vm1231_vm10, %v2139_v49, %v1228_v52 }
 0xa31   : > { %v1237_v61 = vsel %vm1234_vm11, %v1236_v59, %v1232_v57 }
 0xa32   : > { %v1240_v17 = vmul.f32 %v1237_v61, %v2529_v58 }
 0xa4f   : > { %v1172_v25 = vpop.permute.xlu1 %1171 }
 0xa50   : > { %v1174_v46 = vmul.f32 %v1172_v25, %v1166_v45 }
 0xa52   : > { %1176 = vrot.lane.b32.xlu0 %v1174_v46, %s2233_s22 }
 0xa6e   : > { %v1243_v48 = vpop.permute.xlu2 %1242 }
 0xa6f   : > { %v1245_v62 = vmul.f32 %v1243_v48, %v1237_v61 }
 0xa71   : > { %1247 = vrot.lane.b32.xlu1 %v1245_v62, %s2233_s22 }
 0xac4   : > { %v1177_v19 = vpop.permute.xlu0 %1176 }
 0xac5   : > { %v2554_v23 = vadd.f32 %v1177_v19, %v1169_v63 }
 0xac7   : > { %2140 = vtanh.f32 %v2554_v23 }
 0xacd   : > { %v2141_v0 = vpop.eup %2140 }
 0xace   : > { %1182 = vrot.lane.b32.xlu2 %v2141_v0, %s2234_s30 }
 0xae3   : > { %v1248_v18 = vpop.permute.xlu1 %1247 }
 0xae4   : > { %v2559_v1 = vadd.f32 %v1248_v18, %v1240_v17 }
 0xae6   : > { %2142 = vtanh.f32 %v2559_v1 }
 0xaec   : > { %v2143_v2 = vpop.eup %2142 }
 0xaed   : > { %1253 = vrot.lane.b32.xlu0 %v2143_v2, %s2234_s30 }
 0xb28   : > { %v1183_v53 = vpop.permute.xlu2 %1182 }
 0xb29   : > { %v2563_v3 = vmul.f32 %v1183_v53, %v1166_v45 }
 0xb2b   : > { %v1291_v4 = vpack.c.bf16 %v2563_v3, %v2563_v3 }
 0xb2d   : > { %1293 = vrot.lane.b32.xlu1 %v1291_v4, %s2233_s22 }
 0xb5f   : > { %v1254_v5 = vpop.permute.xlu0 %1253 }
 0xb60   : > { %v1256_v58 = vmul.f32 %v1254_v5, %v1237_v61 }
 0xb62   : > { %v2568_v6 = vpack.c.bf16 %v1256_v58, %v1256_v58 }
 0xb64   : > { %v1362_v7 = vunpack.c.l.b16 %v2568_v6 }
 0xb66   : > { %v1363_v8 = vpack.c.b16 %v1362_v7, %v1362_v7 }
 0xb68   : > { %1364 = vrot.lane.b32.xlu2 %v1363_v8, %s2233_s22 }
 0xb9f   : > { %v1294_v9 = vpop.permute.xlu1 %1293 }
 0xba0   : > { %1992 = vmatmul.msk.bf16.vlgmr.msra.gmra.mxu2 %vm457_vm1, %v1294_v9 }
 0xbc2   : > { %v1365_v10 = vpop.permute.xlu2 %1364 }
 0xbc3   : > { %1995 = vmatmul.msk.bf16.vlgmr.msra.gmra.mxu3 %vm457_vm1, %v1365_v10 }
 0xc23   : > { %v1307_v14 = vpop.f32.mrf.mxu2 }
 0xc24   : > { %v1311_v15 = vadd.f32 %v1307_v14, %v1290_v13 }
 0xc26   : > { %2144 = vtanh.f32 %v1311_v15  ;;  %v1993_v40 = vmul.f32 -1.442695, %v1311_v15 }
 0xc2b   : > { %v1309_v20 = vpop.f32.mrf.mxu2 }
 0xc2c   : > { %v2145_v21 = vpop.eup %2144 }
 0xc2d   : > { %1334 = vrot.lane.b32.xlu0 %v2145_v21, %s2234_s30 }
 0xc46   : > { %v1378_v34 = vpop.f32.mrf.mxu3 }
 0xc47   : > { %v1382_v35 = vadd.f32 %v1378_v34, %v1361_v31  ;;  %v1999_v34 = vld [vmem:[%s2358_s26 + $0x6] sm:$0x1] }
 0xc49   : > { %2146 = vtanh.f32 %v1382_v35  ;;  %v1996_v49 = vmul.f32 -1.442695, %v1382_v35  ;;  %v1452_v35 = vunpack.c.l.bf16 %v1999_v34 }
 0xc4a   : > { %2148 = vpow2.f32 %v1993_v40 }
 0xc4e   : > { %v1380_v36 = vpop.f32.mrf.mxu3 }
 0xc4f   : > { %v2147_v39 = vpop.eup %2146  ;;  %v1453_v36 = vadd.f32 %v1452_v35, %v2416_v37 }
 0xc50   : > { %1405 = vrot.lane.b32.xlu1 %v2147_v39, %s2234_s30  ;;  %v2149_v16 = vpop.eup %2148 }
 0xc51   : > { %v1315_v42 = vadd.f32 1.0, %v2149_v16 }
 0xc53   : > { %2150 = vrcp.f32 %v1315_v42  ;;  %v1327_v51 = vand.u32 2147483648, %v1315_v42  ;;  %vm1321_vm13 = vweird.f32 %v1315_v42  ;;  %v1325_v32 = vand.u32 2147483647, %v1315_v42 }
 0xc54   : > { %2152 = vpow2.f32 %v1996_v49 }
 0xc55   : > { %v1328_v55 = vor.u32 1.1754944e-38, %v1327_v51  ;;  %vm1326_vm15 = vcmp.eq.f32.partialorder %v1325_v32, 8.507059e+37 }
 0xc59   : > { %v2151_v44 = vpop.eup %2150 }
 0xc5a   : > { %v1317_v25 = vmul.f32 %v2151_v44, %v1315_v42  ;;  %vm1322_vm12 = vweird.f32 %v2151_v44  ;;  %v2153_v56 = vpop.eup %2152 }
 0xc5b   : > { %vm1323_vm14 = vmor %vm1321_vm13, %vm1322_vm12  ;;  %v1386_v61 = vadd.f32 1.0, %v2153_v56 }
 0xc5c   : > { %v1318_v45 = vsub.f32 1.0, %v1317_v25 }
 0xc5d   : > { %2154 = vrcp.f32 %v1386_v61  ;;  %v1398_v18 = vand.u32 2147483648, %v1386_v61  ;;  %vm1392_vm2 = vweird.f32 %v1386_v61  ;;  %v1396_v2 = vand.u32 2147483647, %v1386_v61 }
 0xc5e   : > { %v1319_v46 = vmul.f32 %v2151_v44, %v1318_v45  ;;  %v2002_v45 = vld [vmem:[%s2360_s29 + $0x1] sm:$0x1] }
 0xc5f   : > { %v1399_v4 = vor.u32 1.1754944e-38, %v1398_v18  ;;  %vm1397_vm4 = vcmp.eq.f32.partialorder %v1396_v2, 8.507059e+37 }
 0xc60   : > { %v1320_v50 = vadd.f32 %v2151_v44, %v1319_v46  ;;  %v1520_v46 = vunpack.c.l.bf16 %v2002_v45 }
 0xc62   : > { %v1324_v52 = vsel %vm1323_vm14, %v2151_v44, %v1320_v50  ;;  %v1516_v44 = vstv %s1515_s10  ;;  %s1422_s10 = scalar_select %p1421_p12, 1, 0 }
 0xc63   : > { %v1329_v59 = vsel %vm1326_vm15, %v1328_v55, %v1324_v52  ;;  %v2155_v62 = vpop.eup %2154  ;;  %v1517_v25 = vmul.f32 %v1516_v44, %v2411_v28 }
 0xc64   : > { %v1388_v63 = vmul.f32 %v2155_v62, %v1386_v61  ;;  %vm1393_vm0 = vweird.f32 %v2155_v62  ;;  %v1332_v8 = vmul.f32 %v1329_v59, %v2554_v23  ;;  %s1423_s12 = scvt.s32.f32 %s1422_s10 }
 0xc65   : > { %vm1394_vm3 = vmor %vm1392_vm2, %vm1393_vm0  ;;  %v1522_v49 = vperm.slane %v1517_v25, 0 }
 0xc66   : > { %v1389_v19 = vsub.f32 1.0, %v1388_v63 }
 0xc67   : > { %v1524_v50 = vadd.f32 %v1522_v49, %v1520_v46 }
 0xc68   : > { %v1390_v0 = vmul.f32 %v2155_v62, %v1389_v19 }
 0xc6a   : > { %v1391_v17 = vadd.f32 %v2155_v62, %v1390_v0 }
 0xc6c   : > { %v1395_v53 = vsel %vm1394_vm3, %v2155_v62, %v1391_v17 }
 0xc6d   : > { %v1400_v58 = vsel %vm1397_vm4, %v1399_v4, %v1395_v53 }
 0xc6e   : > { %v1403_v12 = vmul.f32 %v1400_v58, %v2559_v1 }
 0xc9f   : > { %v1335_v57 = vpop.permute.xlu0 %1334 }
 0xca0   : > { %v1337_v48 = vmul.f32 %v1335_v57, %v1329_v59 }
 0xca2   : > { %1339 = vrot.lane.b32.xlu2 %v1337_v48, %s2233_s22 }
 0xcc2   : > { %v1406_v5 = vpop.permute.xlu1 %1405 }
 0xcc3   : > { %v1408_v7 = vmul.f32 %v1406_v5, %v1400_v58 }
 0xcc5   : > { %1410 = vrot.lane.b32.xlu0 %v1408_v7, %s2233_s22 }
 0xcfc   : > { %v1340_v9 = vpop.permute.xlu2 %1339 }
 0xcfd   : > { %v2584_v10 = vadd.f32 %v1340_v9, %v1332_v8 }
 0xcff   : > { %2156 = vtanh.f32 %v2584_v10 }
 0xd05   : > { %v2157_v11 = vpop.eup %2156 }
 0xd06   : > { %1345 = vrot.lane.b32.xlu1 %v2157_v11, %s2234_s30 }
 0xd37   : > { %v1411_v13 = vpop.permute.xlu0 %1410 }
 0xd38   : > { %v2589_v14 = vadd.f32 %v1411_v13, %v1403_v12 }
 0xd3a   : > { %2158 = vtanh.f32 %v2589_v14 }
 0xd40   : > { %v2159_v15 = vpop.eup %2158 }
 0xd41   : > { %1416 = vrot.lane.b32.xlu2 %v2159_v15, %s2234_s30 }
 0xd78   : > { %v1346_v23 = vpop.permute.xlu1 %1345 }
 0xd79   : > { %v2593_v20 = vmul.f32 %v1346_v23, %v1329_v59 }
 0xd7b   : > { %v1454_v21 = vpack.c.bf16 %v2593_v20, %v2593_v20 }
 0xd7d   : > { %1456 = vrot.lane.b32.xlu0 %v1454_v21, %s2233_s22 }
 0xd9b   : > { %v1417_v22 = vpop.permute.xlu2 %1416 }
 0xd9c   : > { %v1419_v24 = vmul.f32 %v1417_v22, %v1400_v58 }
 0xd9e   : > { %v2598_v1 = vpack.c.bf16 %v1419_v24, %v1419_v24 }
 0xda0   : > { %v1525_v26 = vunpack.c.l.b16 %v2598_v1 }
 0xda2   : > { %v1526_v27 = vpack.c.b16 %v1525_v26, %v1525_v26 }
 0xda4   : > { %1527 = vrot.lane.b32.xlu1 %v1526_v27, %s2233_s22 }
 0xdef   : > { %v1457_v30 = vpop.permute.xlu0 %1456 }
 0xdf0   : > { %2000 = vmatmul.msk.bf16.vlgmr.msrb.gmra.mxu0 %vm457_vm1, %v1457_v30 }
 0xe16   : > { %v1528_v31 = vpop.permute.xlu1 %1527 }
 0xe17   : > { %2003 = vmatmul.msk.bf16.vlgmr.msrb.gmra.mxu1 %vm457_vm1, %v1528_v31 }
 0xe6d   : > { %v1470_v39 = vpop.f32.mrf.mxu0 }
 0xe6e   : > { %v1474_v40 = vadd.f32 %v1470_v39, %v1453_v36 }
 0xe70   : > { %2160 = vtanh.f32 %v1474_v40  ;;  %v2001_v56 = vmul.f32 -1.442695, %v1474_v40 }
 0xe75   : > { %v1472_v16 = vpop.f32.mrf.mxu0 }
 0xe76   : > { %v2161_v42 = vpop.eup %2160 }
 0xe77   : > { %1497 = vrot.lane.b32.xlu2 %v2161_v42, %s2234_s30 }
 0xe94   : > { %v1541_v51 = vpop.f32.mrf.mxu1 }
 0xe95   : > { %v1545_v32 = vadd.f32 %v1541_v51, %v1524_v50 }
 0xe97   : > { %2162 = vtanh.f32 %v1545_v32  ;;  %v2004_v58 = vmul.f32 -1.442695, %v1545_v32 }
 0xe98   : > { %2164 = vpow2.f32 %v2001_v56 }
 0xe9c   : > { %v1543_v52 = vpop.f32.mrf.mxu1 }
 0xe9d   : > { %v2163_v55 = vpop.eup %2162  ;;  %v2007_v52 = vld [vmem:[%s2358_s26 + $0x7] sm:$0x1]  ;;  %s607_s26 = scvt.s32.f32 %s606_s13 }
 0xe9e   : > { %1568 = vrot.lane.b32.xlu0 %v2163_v55, %s2234_s30  ;;  %v2165_v57 = vpop.eup %2164  ;;  %v1615_v55 = vunpack.c.l.bf16 %v2007_v52 }
 0xe9f   : > { %v1478_v59 = vadd.f32 1.0, %v2165_v57 }
 0xea0   : > { %v1616_v56 = vadd.f32 %v1615_v55, %v2416_v37 }
 0xea1   : > { %2166 = vrcp.f32 %v1478_v59  ;;  %v1490_v0 = vand.u32 2147483648, %v1478_v59  ;;  %vm1484_vm6 = vweird.f32 %v1478_v59  ;;  %v1488_v17 = vand.u32 2147483647, %v1478_v59 }
 0xea2   : > { %2168 = vpow2.f32 %v2004_v58 }
 0xea3   : > { %v1491_v2 = vor.u32 1.1754944e-38, %v1490_v0  ;;  %vm1489_vm8 = vcmp.eq.f32.partialorder %v1488_v17, 8.507059e+37 }
 0xea7   : > { %v2167_v48 = vpop.eup %2166 }
 0xea8   : > { %v1480_v61 = vmul.f32 %v2167_v48, %v1478_v59  ;;  %vm1485_vm5 = vweird.f32 %v2167_v48  ;;  %v2169_v7 = vpop.eup %2168 }
 0xea9   : > { %vm1486_vm7 = vmor %vm1484_vm6, %vm1485_vm5  ;;  %v1549_v8 = vadd.f32 1.0, %v2169_v7  ;;  %vm613_vm5 = vcmask 1040384   ;;  %vm621_vm6 = vcmask 253952  }
 0xeaa   : > { %v1481_v62 = vsub.f32 1.0, %v1480_v61 }
 0xeab   : > { %2170 = vrcp.f32 %v1549_v8  ;;  %v1561_v23 = vand.u32 2147483648, %v1549_v8  ;;  %vm1555_vm10 = vweird.f32 %v1549_v8  ;;  %v1559_v21 = vand.u32 2147483647, %v1549_v8 }
 0xeac   : > { %v1482_v63 = vmul.f32 %v2167_v48, %v1481_v62  ;;  %v1678_v62 = vstv %s1677_s14  ;;  %s768_s14 = sadd.s32 1, %s2339_s11 }
 0xead   : > { %v1562_v24 = vor.u32 1.1754944e-38, %v1561_v23  ;;  %vm1560_vm12 = vcmp.eq.f32.partialorder %v1559_v21, 8.507059e+37  ;;  %p769_p13 = scmp.lt.s32.totalorder %s768_s14, 10 }
 0xeae   : > { %v1483_v19 = vadd.f32 %v2167_v48, %v1482_v63  ;;  %v1679_v63 = vmul.f32 %v1678_v62, %v2411_v28 }
 0xeaf   : > { %s770_s13 = scalar_select %p769_p13, 1, 0 }
 0xeb0   : > { %v1487_v18 = vsel %vm1486_vm7, %v2167_v48, %v1483_v19  ;;  %v1680_v19 = vld [vmem:[%s2360_s29] sm:$0x1]  ;;  %v1683_v17 = vperm.slane %v1679_v63, 0  ;;  %s1094_s29 = sadd.s32 3, %s2339_s11  ;;  %vm1779_vm7 = vcmask 254976  }
 0xeb1   : > { %v1492_v4 = vsel %vm1489_vm8, %v1491_v2, %v1487_v18  ;;  %v2171_v9 = vpop.eup %2170  ;;  %v1681_v0 = vunpack.c.l.bf16 %v1680_v19  ;;  %p1095_p9 = scmp.lt.s32.totalorder %s1094_s29, 10  ;;  %s1257_s29 = sadd.s32 4, %s2339_s11 }
 0xeb2   : > { %v1551_v11 = vmul.f32 %v2171_v9, %v1549_v8  ;;  %vm1556_vm9 = vweird.f32 %v2171_v9  ;;  %v1495_v31 = vmul.f32 %v1492_v4, %v2584_v10  ;;  %p1258_p0 = scmp.lt.s32.totalorder %s1257_s29, 10 }
 0xeb3   : > { %vm1557_vm11 = vmor %vm1555_vm10, %vm1556_vm9  ;;  %v1685_v18 = vadd.f32 %v1683_v17, %v1681_v0  ;;  %s1096_s15 = scalar_select %p1095_p9, 1, 0  ;;  %v1587_v0 = vstv %s1586_s6  ;;  %v1277_v17 = vrot.slane %v2568_v6, 3 }
 0xeb4   : > { %v1552_v12 = vsub.f32 1.0, %v1551_v11 }
 0xeb5   : > { %s1097_s16 = scvt.s32.f32 %s1096_s15 }
 0xeb6   : > { %v1553_v13 = vmul.f32 %v2171_v9, %v1552_v12  ;;  %s1259_s15 = scalar_select %p1258_p0, 1, 0 }
 0xeb8   : > { %v1554_v15 = vadd.f32 %v2171_v9, %v1553_v13 }
 0xeba   : > { %v1558_v22 = vsel %vm1557_vm11, %v2171_v9, %v1554_v15 }
 0xebb   : > { %v1563_v27 = vsel %vm1560_vm12, %v1562_v24, %v1558_v22 }
 0xebc   : > { %v1566_v39 = vmul.f32 %v1563_v27, %v2589_v14 }
 0xed1   : > { %v1498_v53 = vpop.permute.xlu2 %1497 }
 0xed2   : > { %v1500_v5 = vmul.f32 %v1498_v53, %v1492_v4 }
 0xed4   : > { %1502 = vrot.lane.b32.xlu1 %v1500_v5, %s2233_s22 }
 0xf10   : > { %v1569_v26 = vpop.permute.xlu0 %1568 }
 0xf11   : > { %v1571_v30 = vmul.f32 %v1569_v26, %v1563_v27 }
 0xf13   : > { %1573 = vrot.lane.b32.xlu2 %v1571_v30, %s2233_s22 }
 0xf46   : > { %v1503_v34 = vpop.permute.xlu1 %1502 }
 0xf47   : > { %v2614_v35 = vadd.f32 %v1503_v34, %v1495_v31 }
 0xf49   : > { %2172 = vtanh.f32 %v2614_v35 }
 0xf4f   : > { %v2173_v36 = vpop.eup %2172 }
 0xf50   : > { %1508 = vrot.lane.b32.xlu0 %v2173_v36, %s2234_s30 }
 0xf6d   : > { %v1574_v40 = vpop.permute.xlu2 %1573 }
 0xf6e   : > { %v2619_v16 = vadd.f32 %v1574_v40, %v1566_v39 }
 0xf70   : > { %2174 = vtanh.f32 %v2619_v16 }
 0xf76   : > { %v2175_v42 = vpop.eup %2174 }
 0xf77   : > { %1579 = vrot.lane.b32.xlu1 %v2175_v42, %s2234_s30 }
 0xfc2   : > { %v1509_v10 = vpop.permute.xlu0 %1508 }
 0xfc3   : > { %v2623_v44 = vmul.f32 %v1509_v10, %v1492_v4 }
 0xfc5   : > { %v1617_v25 = vpack.c.bf16 %v2623_v44, %v2623_v44 }
 0xfc7   : > { %1619 = vrot.lane.b32.xlu2 %v1617_v25, %s2233_s22  ;;  %v608_v25 = vstv %s607_s26  ;;  %s771_s26 = scvt.s32.f32 %s770_s13 }
 0xfe9   : > { %v1580_v45 = vpop.permute.xlu1 %1579 }
 0xfea   : > { %v1582_v46 = vmul.f32 %v1580_v45, %v1563_v27 }
 0xfec   : > { %v2628_v14 = vpack.c.bf16 %v1582_v46, %v1582_v46 }
 0xfee   : > { %v1686_v49 = vunpack.c.l.b16 %v2628_v14 }
 0xff0   : > { %v1687_v50 = vpack.c.b16 %v1686_v49, %v1686_v49  ;;  %v609_v49 = vmul.f32 %v608_v25, %v2431_v29  ;;  %v788_v29 = vrot.slane %v2465_v41, 3 }
 0xff2   : > { %1688 = vrot.lane.b32.xlu0 %v1687_v50, %s2233_s22  ;;  %v610_v55 = vpack.c.bf16 %v609_v49, %v609_v49  ;;  %v791_v62 = vsel %vm613_vm5, %v2465_v41, %v788_v29 }
0x1021   : > { %v1620_v51 = vpop.permute.xlu2 %1619 }
0x1022   : > { %2008 = vmatmul.msk.bf16.vlgmr.msrb.gmra.mxu2 %vm457_vm1, %v1620_v51 }
0x1064   : > { %v1689_v32 = vpop.permute.xlu0 %1688 }
0x1065   : > { %2010 = vmatmul.msk.bf16.vlgmr.msrb.gmra.mxu3 %vm457_vm1, %v1689_v32 }
0x10a5   : > { %v1633_v57 = vpop.f32.mrf.mxu2 }
0x10a6   : > { %v1637_v59 = vadd.f32 %v1633_v57, %v1616_v56  ;;  %v612_v56 = vrot.slane %v610_v55, 3 }
0x10a8   : > { %2176 = vtanh.f32 %v1637_v59  ;;  %v2009_v5 = vmul.f32 -1.442695, %v1637_v59  ;;  %v616_v57 = vsel %vm613_vm5, %v610_v55, %v612_v56  ;;  %v1098_v59 = vstv %s1097_s16  ;;  %s1260_s16 = scvt.s32.f32 %s1259_s15 }
0x10ad   : > { %v1635_v48 = vpop.f32.mrf.mxu2 }
0x10ae   : > { %v2177_v61 = vpop.eup %2176  ;;  %v1099_v48 = vmul.f32 %v1098_v59, %v2533_v60  ;;  %v1588_v60 = vmul.f32 %v1587_v0, %v2623_v44  ;;  %v935_v44 = vstv %s934_s9 }
0x10af   : > { %1660 = vrot.lane.b32.xlu1 %v2177_v61, %s2234_s30 }
0x10b0   : > { %v1100_v61 = vpack.c.bf16 %v1099_v48, %v1099_v48 }
0x10b2   : > { %v1102_v63 = vrot.slane %v1100_v61, 3 }
0x10b4   : > { %v1105_v19 = vsel %vm613_vm5, %v1100_v61, %v1102_v63 }
0x10e8   : > { %v1702_v2 = vpop.f32.mrf.mxu3 }
0x10e9   : > { %v1706_v53 = vadd.f32 %v1702_v2, %v1685_v18  ;;  %v1589_v18 = vpack.c.bf16 %v1588_v60, %v1588_v60  ;;  %v1280_v2 = vsel %vm613_vm5, %v2568_v6, %v1277_v17 }
0x10eb   : > { %2178 = vtanh.f32 %v1706_v53  ;;  %v2011_v21 = vmul.f32 -1.442695, %v1706_v53  ;;  %v1591_v41 = vrot.slane %v1589_v18, 3 }
0x10ec   : > { %2180 = vpow2.f32 %v2009_v5 }
0x10ed   : > { %v1594_v53 = vsel %vm613_vm5, %v1589_v18, %v1591_v41 }
0x10f0   : > { %v1704_v37 = vpop.f32.mrf.mxu3 }
0x10f1   : > { %v2179_v4 = vpop.eup %2178 }
0x10f2   : > { %1729 = vrot.lane.b32.xlu2 %v2179_v4, %s2234_s30  ;;  %v2181_v58 = vpop.eup %2180 }
0x10f3   : > { %v1641_v7 = vadd.f32 1.0, %v2181_v58  ;;  %v625_v58 = vrot.slane %v2436_v33, 3 }
0x10f5   : > { %2182 = vrcp.f32 %v1641_v7  ;;  %v1653_v13 = vand.u32 2147483648, %v1641_v7  ;;  %vm1647_vm13 = vweird.f32 %v1641_v7  ;;  %v1651_v15 = vand.u32 2147483647, %v1641_v7 }
0x10f6   : > { %2184 = vpow2.f32 %v2011_v21 }
0x10f7   : > { %v1654_v22 = vor.u32 1.1754944e-38, %v1653_v13  ;;  %vm1652_vm15 = vcmp.eq.f32.partialorder %v1651_v15, 8.507059e+37 }
0x10fb   : > { %v2183_v8 = vpop.eup %2182 }
0x10fc   : > { %v1643_v9 = vmul.f32 %v2183_v8, %v1641_v7  ;;  %vm1648_vm1 = vweird.f32 %v2183_v8  ;;  %v2185_v30 = vpop.eup %2184  ;;  %v936_v7 = vmul.f32 %v935_v44, %v2499_v38 }
0x10fd   : > { %vm1649_vm14 = vmor %vm1647_vm13, %vm1648_vm1  ;;  %v1710_v31 = vadd.f32 1.0, %v2185_v30 }
0x10fe   : > { %v1644_v11 = vsub.f32 1.0, %v1643_v9 }
0x10ff   : > { %2186 = vrcp.f32 %v1710_v31  ;;  %v1722_v10 = vand.u32 2147483648, %v1710_v31  ;;  %vm1716_vm2 = vweird.f32 %v1710_v31  ;;  %v1720_v45 = vand.u32 2147483647, %v1710_v31 }
0x1100   : > { %v1645_v28 = vmul.f32 %v2183_v8, %v1644_v11 }
0x1101   : > { %v1723_v50 = vor.u32 1.1754944e-38, %v1722_v10  ;;  %vm1721_vm4 = vcmp.eq.f32.partialorder %v1720_v45, 8.507059e+37 }
0x1102   : > { %v1646_v12 = vadd.f32 %v2183_v8, %v1645_v28  ;;  %v1424_v28 = vstv %s1423_s12 }
0x1103   : > { %v1425_v13 = vmul.f32 %v1424_v28, %v2593_v20 }
0x1104   : > { %v1650_v23 = vsel %vm1649_vm14, %v2183_v8, %v1646_v12  ;;  %v937_v8 = vpack.c.bf16 %v936_v7, %v936_v7  ;;  %v1114_v12 = vrot.slane %v2538_v47, 3 }
0x1105   : > { %v2641_v26 = vsel %vm1652_vm15, %v1654_v22, %v1650_v23  ;;  %v2187_v34 = vpop.eup %2186  ;;  %v1426_v38 = vpack.c.bf16 %v1425_v13, %v1425_v13 }
0x1106   : > { %v1712_v36 = vmul.f32 %v2187_v34, %v1710_v31  ;;  %vm1717_vm0 = vweird.f32 %v2187_v34  ;;  %v1658_v37 = vmul.f32 %v2641_v26, %v2614_v35  ;;  %v628_v35 = vsel %vm613_vm5, %v2436_v33, %v625_v58 }
0x1107   : > { %vm1718_vm3 = vmor %vm1716_vm2, %vm1717_vm0  ;;  %v939_v9 = vrot.slane %v937_v8, 3  ;;  %v1117_v33 = vsel %vm613_vm5, %v2538_v47, %v1114_v12  ;;  %v1428_v15 = vrot.slane %v1426_v38, 3 }
0x1108   : > { %v1713_v39 = vsub.f32 1.0, %v1712_v36 }
0x1109   : > { %v942_v11 = vsel %vm613_vm5, %v937_v8, %v939_v9  ;;  %v1431_v23 = vsel %vm613_vm5, %v1426_v38, %v1428_v15 }
0x110a   : > { %v1714_v40 = vmul.f32 %v2187_v34, %v1713_v39  ;;  %v1261_v39 = vstv %s1260_s16 }
0x110c   : > { %v1715_v42 = vadd.f32 %v2187_v34, %v1714_v40  ;;  %v951_v40 = vrot.slane %v2504_v54, 3 }
0x110e   : > { %v1719_v46 = vsel %vm1718_vm3, %v2187_v34, %v1715_v42  ;;  %v1262_v42 = vmul.f32 %v1261_v39, %v2563_v3  ;;  %v954_v45 = vsel %vm613_vm5, %v2504_v54, %v951_v40  ;;  %v1440_v3 = vrot.slane %v2598_v1, 3 }
0x110f   : > { %v2648_v32 = vsel %vm1721_vm4, %v1723_v50, %v1719_v46 }
0x1110   : > { %v1727_v20 = vmul.f32 %v2648_v32, %v2619_v16  ;;  %v1263_v25 = vpack.c.bf16 %v1262_v42, %v1262_v42 }
0x1112   : > { %v1265_v46 = vrot.slane %v1263_v25, 3 }
0x1114   : > { %v1268_v50 = vsel %vm613_vm5, %v1263_v25, %v1265_v46 }
0x1121   : > { %v1661_v24 = vpop.permute.xlu1 %1660 }
0x1122   : > { %v1663_v27 = vmul.f32 %v1661_v24, %v2641_v26  ;;  %v772_v24 = vstv %s771_s26 }
0x1123   : > { %v773_v47 = vmul.f32 %v772_v24, %v2467_v43 }
0x1124   : > { %1665 = vrot.lane.b32.xlu0 %v1663_v27, %s2233_s22  ;;  %v1603_v27 = vrot.slane %v2628_v14, 3 }
0x1125   : > { %v774_v34 = vpack.c.bf16 %v773_v47, %v773_v47 }
0x1126   : > { %v1606_v30 = vsel %vm613_vm5, %v2628_v14, %v1603_v27 }
0x1127   : > { %v776_v36 = vrot.slane %v774_v34, 3 }
0x1129   : > { %v779_v14 = vsel %vm613_vm5, %v774_v34, %v776_v36 }
0x114c   : > { %v1730_v51 = vpop.permute.xlu2 %1729 }
0x114d   : > { %v1732_v52 = vmul.f32 %v1730_v51, %v2648_v32 }
0x114f   : > { %1734 = vrot.lane.b32.xlu1 %v1732_v52, %s2233_s22  ;;  %v1443_v52 = vsel %vm613_vm5, %v2598_v1, %v1440_v3 }
0x1157   : > { %618 = vrot.lane.b32.xlu1 %v616_v57, %s2233_s22 }
0x115f   : > { %793 = vrot.lane.b32.xlu1 %v791_v62, %s2233_s22 }
0x1167   : > { %1107 = vrot.lane.b32.xlu1 %v1105_v19, %s2233_s22 }
0x116f   : > { %1282 = vrot.lane.b32.xlu1 %v1280_v2, %s2233_s22 }
0x1177   : > { %1596 = vrot.lane.b32.xlu1 %v1594_v53, %s2233_s22 }
0x1196   : > { %v1666_v4 = vpop.permute.xlu0 %1665 }
0x1197   : > { %v2672_v5 = vadd.f32 %v1666_v4, %v1658_v37 }
0x1199   : > { %2188 = vtanh.f32 %v2672_v5 }
0x119f   : > { %v2189_v6 = vpop.eup %2188 }
0x11a0   : > { %1671 = vrot.lane.b32.xlu2 %v2189_v6, %s2234_s30 }
0x11a8   : > { %630 = vrot.lane.b32.xlu2 %v628_v35, %s2233_s22 }
0x11b0   : > { %944 = vrot.lane.b32.xlu2 %v942_v11, %s2233_s22 }
0x11b8   : > { %1119 = vrot.lane.b32.xlu2 %v1117_v33, %s2233_s22 }
0x11c0   : > { %1433 = vrot.lane.b32.xlu2 %v1431_v23, %s2233_s22 }
0x11c1   : > { %v1735_v21 = vpop.permute.xlu1 %1734 }
0x11c2   : > { %v2694_v22 = vadd.f32 %v1735_v21, %v1727_v20 }
0x11c4   : > { %2190 = vtanh.f32 %v2694_v22 }
0x11c8   : > { %1608 = vrot.lane.b32.xlu2 %v1606_v30, %s2233_s22 }
0x11c9   : > { %v619_v16 = vpop.permute.xlu1 %618 }
0x11ca   : > { %v2191_v31 = vpop.eup %2190  ;;  %622 = vst.msk [vmem:[%s2351_s20] sm:$0x1] %vm621_vm6, %v619_v16 }
0x11cb   : > { %1740 = vrot.lane.b32.xlu0 %v2191_v31, %s2234_s30  ;;  %s1744_s30 = sadd.s32 7, %s2339_s11  ;;  %s2235_s11 = smov 96  }
0x11cc   : > { %p1745_p1 = scmp.lt.s32.totalorder %s1744_s30, 10 }
0x11ce   : > { %s1746_s18 = scalar_select %p1745_p1, 1, 0 }
0x11d0   : > { %s1747_s17 = scvt.s32.f32 %s1746_s18 }
0x11d1   : > { %v794_v43 = vpop.permute.xlu1 %793 }
0x11d2   : > { %1966 = vst.msk [vmem:[%s2356_s25 + $0x6] sm:$0x1] %vm621_vm6, %v794_v43  ;;  %v1748_v54 = vstv %s1747_s17 }
0x11d3   : > { %781 = vrot.lane.b32.xlu0 %v779_v14, %s2233_s22 }
0x11d9   : > { %v1108_v10 = vpop.permute.xlu1 %1107 }
0x11da   : > { %1981 = vst.msk [vmem:[%s2351_s20 + $0x3] sm:$0x1] %vm621_vm6, %v1108_v10 }
0x11db   : > { %956 = vrot.lane.b32.xlu0 %v954_v45, %s2233_s22 }
0x11e1   : > { %v1283_v49 = vpop.permute.xlu1 %1282 }
0x11e2   : > { %1990 = vst.msk [vmem:[%s2356_s25 + $0x3] sm:$0x1] %vm621_vm6, %v1283_v49 }
0x11e3   : > { %1270 = vrot.lane.b32.xlu0 %v1268_v50, %s2233_s22 }
0x11e9   : > { %v1597_v51 = vpop.permute.xlu1 %1596 }
0x11ea   : > { %2005 = vst.msk [vmem:[%s2351_s20 + $0x6] sm:$0x1] %vm621_vm6, %v1597_v51 }
0x11eb   : > { %1445 = vrot.lane.b32.xlu0 %v1443_v52, %s2233_s22 }
0x11fa   : > { %v1672_v55 = vpop.permute.xlu2 %1671 }
0x11fb   : > { %v1674_v56 = vmul.f32 %v1672_v55, %v2641_v26 }
0x11fd   : > { %v1749_v57 = vmul.f32 %v1748_v54, %v1674_v56  ;;  %1774 = vst [vmem:[#allocation1] ss:$4 sm:$0xff] %v1674_v56 }
0x11ff   : > { %v1750_v59 = vpack.c.bf16 %v1749_v57, %v1749_v57 }
0x1201   : > { %v1752_v29 = vrot.slane %v1750_v59, 3 }
0x1202   : > { %v631_v48 = vpop.permute.xlu2 %630 }
0x1203   : > { %1958 = vst.msk [vmem:[%s2356_s25 + $0x7] sm:$0x1] %vm621_vm6, %v631_v48  ;;  %v1755_v1 = vsel %vm613_vm5, %v1750_v59, %v1752_v29 }
0x1204   : > { %1757 = vrot.lane.b32.xlu0 %v1755_v1, %s2233_s22  ;;  %v1775_v61 = vld.sshfl [vmem:[#allocation1] sm:$0xff pattern:$0x73625140] }
0x1205   : > { %1776 = vrot.lane.b32.xlu2 %v1775_v61, %s2233_s22  ;;  %1782 = vst [vmem:[#allocation1] ss:$4 sm:$0xff] %v2672_v5 }
0x120a   : > { %v945_v26 = vpop.permute.xlu2 %944 }
0x120b   : > { %1973 = vst.msk [vmem:[%s2351_s20 + $0x2] sm:$0x1] %vm621_vm6, %v945_v26 }
0x120c   : > { %v1783_v62 = vld.sshfl [vmem:[#allocation1] sm:$0xff pattern:$0x73625140] }
0x120d   : > { %1784 = vrot.lane.b32.xlu0 %v1783_v62, %s2235_s11 }
0x1212   : > { %v1120_v63 = vpop.permute.xlu2 %1119 }
0x1213   : > { %1982 = vst.msk [vmem:[%s2356_s25 + $0x4] sm:$0x1] %vm621_vm6, %v1120_v63 }
0x121a   : > { %v1434_v19 = vpop.permute.xlu2 %1433 }
0x121b   : > { %1997 = vst.msk [vmem:[%s2351_s20 + $0x5] sm:$0x1] %vm621_vm6, %v1434_v19 }
0x1222   : > { %v1609_v0 = vpop.permute.xlu2 %1608 }
0x1223   : > { %2006 = vst.msk [vmem:[%s2356_s25 + $0x1] sm:$0x1] %vm621_vm6, %v1609_v0 }
0x123d   : > { %v1741_v17 = vpop.permute.xlu0 %1740 }
0x123e   : > { %v1743_v60 = vmul.f32 %v1741_v17, %v2648_v32 }
0x1240   : > { %v1762_v18 = vpack.c.bf16 %v1743_v60, %v1743_v60  ;;  %1789 = vst [vmem:[#allocation1] ss:$4 sm:$0xff] %v1743_v60 }
0x1242   : > { %v1764_v2 = vrot.slane %v1762_v18, 3 }
0x1244   : > { %v1767_v41 = vsel %vm613_vm5, %v1762_v18, %v1764_v2 }
0x1245   : > { %1769 = vrot.lane.b32.xlu1 %v1767_v41, %s2233_s22  ;;  %v782_v53 = vpop.permute.xlu0 %781 }
0x1246   : > { %1965 = vst.msk [vmem:[%s2351_s20 + $0x1] sm:$0x1] %vm621_vm6, %v782_v53 }
0x1247   : > { %v1790_v37 = vld.sshfl [vmem:[#allocation1] sm:$0xff pattern:$0x73625140] }
0x1248   : > { %1796 = vst [vmem:[#allocation1] ss:$4 sm:$0xff] %v2694_v22 }
0x124d   : > { %1791 = vrot.lane.b32.xlu1 %v1790_v37, %s2233_s22  ;;  %v957_v4 = vpop.permute.xlu0 %956 }
0x124e   : > { %1974 = vst.msk [vmem:[%s2356_s25 + $0x5] sm:$0x1] %vm621_vm6, %v957_v4 }
0x124f   : > { %v1797_v32 = vld.sshfl [vmem:[#allocation1] sm:$0xff pattern:$0x73625140] }
0x1250   : > { %1798 = vrot.lane.b32.xlu2 %v1797_v32, %s2235_s11 }
0x1255   : > { %v1271_v5 = vpop.permute.xlu0 %1270 }
0x1256   : > { %1989 = vst.msk [vmem:[%s2351_s20 + $0x4] sm:$0x1] %vm621_vm6, %v1271_v5 }
0x125d   : > { %v1446_v6 = vpop.permute.xlu0 %1445 }
0x125e   : > { %1998 = vst.msk [vmem:[%s2356_s25 + $0x2] sm:$0x1] %vm621_vm6, %v1446_v6 }
0x125f   : > { %v1777_v44 = vpop.permute.xlu2 %1776 }
0x1260   : > { %1780 = vst.msk [vmem:[#allocation2] sm:$0x3] %vm1779_vm7, %v1777_v44 }
0x1276   : > { %v1758_v58 = vpop.permute.xlu0 %1757 }
0x1277   : > { %2012 = vst.msk [vmem:[%s2351_s20 + $0x7] sm:$0x1] %vm621_vm6, %v1758_v58 }
0x127f   : > { %v1785_v7 = vpop.permute.xlu0 %1784 }
0x1280   : > { %1787 = vst.msk [vmem:[#allocation3] sm:$0x3] %vm1779_vm7, %v1785_v7 }
0x12aa   : > { %v1799_v8 = vpop.permute.xlu2 %1798 }
0x12ab   : > { %1801 = vst.msk [vmem:[#allocation3 + $0x2] sm:$0x3] %vm1779_vm7, %v1799_v8 }
0x12b7   : > { %v1770_v35 = vpop.permute.xlu1 %1769 }
0x12b8   : > { %1772 = vst.msk [vmem:[%s2356_s25] sm:$0x1] %vm621_vm6, %v1770_v35 }
0x12bf   : > { %v1792_v9 = vpop.permute.xlu1 %1791 }
0x12c0   : > { %1794 = vst.msk [vmem:[#allocation2 + $0x2] sm:$0x3] %vm1779_vm7, %v1792_v9 }
0x12c1 PF: > { %p13_p2 = scmp.ge.s32.totalorder %s2295_s24, 4   ;;  %s2783_s18 = smov %s2218_s19 }
0x12c2   : > { %s2784_s19 = smov %s2314_s7  ;;  %s2785_s20 = smov %s2226_s21 }
0x12c3   : > { %s2786_s21 = smov %s2305_s28  ;;  %s2787_s22 = smov %s2295_s24 }
0x12c4   :  { %15 = sbr.rel (!%p13_p2) target bundleno = 3 (0x3), region = 208 }

</bundles_post_ra>
